<compile_context>
chip_gen: v5e
topology: v5e:2x2
jax: 0.10.0
libtpu: 0.0.40
codegen_flags: <defaults>
</compile_context>

<pallas_src>
import functools

import jax
import jax.numpy as jnp
from jax.experimental import pallas as pl
from jax.experimental.pallas import tpu as pltpu

Z_DIM = 16
OUT_DIM = 784
BN_EPS = 1e-5


def _sigmoid(x):
    # tanh form: a single EUP transcendental instead of exp + VPU divide.
    return 0.5 * jnp.tanh(0.5 * x) + 0.5


def decoder_kernel(z_ref,
                   w1_ref, b1_ref,   # Linear(z,128)   (BatchNorm1d(128) folded in)
                   w2_ref, b2_ref,   # Linear(128,256)
                   w3_ref, b3_ref,   # Linear(256,256) (BatchNorm1d(256) folded in)
                   w4_ref, b4_ref,   # Linear(256,512)
                   w5_ref, b5_ref,   # Linear(512,512) (BatchNorm1d(512) folded in)
                   w6_ref, b6_ref,   # Linear(512,784)
                   o_ref):
    def lin(h, w_ref, b_ref):
        # bf16 operands on the MXU, f32 accumulation, f32 bias add.
        return jnp.dot(h, w_ref[...], preferred_element_type=jnp.float32) + b_ref[...]

    def act(x):
        # ReLU, then carry the activation as bf16 between layers (same value
        # the next dot would see anyway; halves VMEM/vreg traffic).
        return jnp.maximum(x, 0.0).astype(jnp.bfloat16)

    h = z_ref[...]                       # bf16 (cast host-side)
    # TODO(synk): Dropout1d after BN1/BN3 is identity in eval mode only.
    h = act(lin(h, w1_ref, b1_ref))      # Linear -> BN(folded) -> ReLU -> Dropout1d(id)
    h = act(lin(h, w2_ref, b2_ref))      # Linear -> ReLU
    h = act(lin(h, w3_ref, b3_ref))      # Linear -> BN(folded) -> ReLU -> Dropout1d(id)
    h = act(lin(h, w4_ref, b4_ref))      # Linear -> ReLU
    h = act(lin(h, w5_ref, b5_ref))      # Linear -> BN(folded) -> ReLU
    o_ref[...] = _sigmoid(lin(h, w6_ref, b6_ref)).astype(o_ref.dtype)  # Linear -> Sigmoid


def _round_up(n, m):
    return ((n + m - 1) // m) * m


def _default_tile_b(batch):
    """~512-row tiles, but keep >= 2 grid steps when the batch allows it so the
    'parallel' batch axis can shard across both TensorCores on v7x."""
    b8 = _round_up(max(batch, 1), 8)
    tile = min(512, b8)
    if b8 // tile < 2 and b8 >= 16:
        tile = _round_up(b8 // 2, 8)
    return tile


@functools.partial(jax.jit, static_argnames=("tile_b", "out_dtype"))
def _decoder_call(z_pad, params, *, tile_b, out_dtype):
    n_tiles = z_pad.shape[0] // tile_b
    # Weights / biases: full-array blocks with a constant index_map -> loaded
    # once, resident in VMEM across all grid steps.
    weight_specs = [pl.BlockSpec(p.shape, lambda i: (0, 0)) for p in params]
    return pl.pallas_call(
        decoder_kernel,
        out_shape=jax.ShapeDtypeStruct((z_pad.shape[0], OUT_DIM), out_dtype),
        grid=(n_tiles,),
        in_specs=[pl.BlockSpec((tile_b, Z_DIM), lambda i: (i, 0))] + weight_specs,
        out_specs=pl.BlockSpec((tile_b, OUT_DIM), lambda i: (i, 0)),
        compiler_params=pltpu.CompilerParams(
            dimension_semantics=("parallel",),     # shard batch tiles across TCs (v7x)
            vmem_limit_bytes=48 * 1024 * 1024,     # headroom for big tiles on v5e
        ),
    )(z_pad, *params)


def decoder_forward(z, folded_params, tile_b=None, out_dtype=jnp.float32):
    """z: [B, Z_DIM] f32 -> [B, 784] (eval-mode Decoder forward).

    out_dtype=jnp.bfloat16 halves the dominant output HBM write if the
    consumer tolerates it.
    """
    B = z.shape[0]
    assert z.shape[1] == Z_DIM
    if tile_b is None:
        tile_b = _default_tile_b(B)
    b_pad = _round_up(B, tile_b)
    z_pad = jnp.zeros((b_pad, Z_DIM), jnp.bfloat16)
    z_pad = z_pad.at[:B].set(z.astype(jnp.bfloat16))
    out = _decoder_call(z_pad, folded_params, tile_b=tile_b, out_dtype=out_dtype)
    return out if b_pad == B else out[:B]


# ----------------------------------------------------------------------------
# Parameter construction (deterministic synthetic init) + host-side folding.
# ----------------------------------------------------------------------------
def make_raw_params(key, z_dim=Z_DIM):
    """PyTorch-equivalent params; Linear weights pre-transposed to (in, out)."""
    keys = iter(jax.random.split(key, 40))

    def lin(din, dout, scale=0.05):
        w = scale * jax.random.normal(next(keys), (din, dout), jnp.float32)
        b = 0.01 * jax.random.normal(next(keys), (1, dout), jnp.float32)
        return w, b

    def bn(d):
        gamma = 1.0 + 0.1 * jax.random.normal(next(keys), (1, d), jnp.float32)
        beta = 0.1 * jax.random.normal(next(keys), (1, d), jnp.float32)
        mean = 0.1 * jax.random.normal(next(keys), (1, d), jnp.float32)
        var = jax.random.uniform(next(keys), (1, d), jnp.float32, 0.5, 1.5)
        return gamma, beta, mean, var

    w1, b1 = lin(z_dim, 128); bn1 = bn(128)
    w2, b2 = lin(128, 256)
    w3, b3 = lin(256, 256); bn3 = bn(256)
    w4, b4 = lin(256, 512)
    w5, b5 = lin(512, 512); bn5 = bn(512)
    w6, b6 = lin(512, OUT_DIM)
    return dict(w1=w1, b1=b1, bn1=bn1, w2=w2, b2=b2, w3=w3, b3=b3, bn3=bn3,
                w4=w4, b4=b4, w5=w5, b5=b5, bn5=bn5, w6=w6, b6=b6)


def fold_params(raw):
    """Fold eval-mode BN into the preceding Linear; cast weights to bf16.
    Biases stay f32. No shape padding needed (z=16, out=784 handled natively)."""
    def fold_bn(w, b, bn_params):
        g, be, m, v = bn_params
        scale = g * jax.lax.rsqrt(v + BN_EPS)          # (1, d)
        return w * scale, (b - m) * scale + be

    w1, b1 = fold_bn(raw["w1"], raw["b1"], raw["bn1"])
    w3, b3 = fold_bn(raw["w3"], raw["b3"], raw["bn3"])
    w5, b5 = fold_bn(raw["w5"], raw["b5"], raw["bn5"])
    w2, b2 = raw["w2"], raw["b2"]
    w4, b4 = raw["w4"], raw["b4"]
    w6, b6 = raw["w6"], raw["b6"]

    bf = lambda w: w.astype(jnp.bfloat16)
    return (bf(w1), b1, bf(w2), b2, bf(w3), b3,
            bf(w4), b4, bf(w5), b5, bf(w6), b6)


# ----------------------------------------------------------------------------
# Pure-JAX references.
# ----------------------------------------------------------------------------
def decoder_reference_f32(z, raw):
    """Exact eval-mode PyTorch semantics, full f32."""
    def bn(h, params):
        g, be, m, v = params
        return (h - m) / jnp.sqrt(v + BN_EPS) * g + be

    h = jax.nn.relu(bn(z @ raw["w1"] + raw["b1"], raw["bn1"]))
    h = jax.nn.relu(h @ raw["w2"] + raw["b2"])
    h = jax.nn.relu(bn(h @ raw["w3"] + raw["b3"], raw["bn3"]))
    h = jax.nn.relu(h @ raw["w4"] + raw["b4"])
    h = jax.nn.relu(bn(h @ raw["w5"] + raw["b5"], raw["bn5"]))
    return jax.nn.sigmoid(h @ raw["w6"] + raw["b6"])


def decoder_reference_mixed(z, folded):
    """Mirrors the kernel's bf16-operand / f32-accumulate arithmetic."""
    (w1, b1, w2, b2, w3, b3, w4, b4, w5, b5, w6, b6) = folded

    def lin(h, w, b):
        return jnp.dot(h, w, preferred_element_type=jnp.float32) + b

    def act(x):
        return jnp.maximum(x, 0.0).astype(jnp.bfloat16)

    h = z.astype(jnp.bfloat16)
    h = act(lin(h, w1, b1))
    h = act(lin(h, w2, b2))
    h = act(lin(h, w3, b3))
    h = act(lin(h, w4, b4))
    h = act(lin(h, w5, b5))
    return 0.5 * jnp.tanh(0.5 * lin(h, w6, b6)) + 0.5


if __name__ == "__main__":
    key = jax.random.PRNGKey(0)
    k_z, k_p = jax.random.split(key)

    raw = make_raw_params(k_p, Z_DIM)
    folded = fold_params(raw)

    # Small single-tile case.
    batch = 8
    z = jax.random.normal(k_z, (batch, Z_DIM), jnp.float32)
    out = jax.block_until_ready(decoder_forward(z, folded))
    assert out.shape == (batch, OUT_DIM)

    # Tight check against a reference using the same mixed precision.
    ref_mixed = decoder_reference_mixed(z, folded)
    assert jnp.allclose(out, ref_mixed, atol=1e-3, rtol=1e-3), \
        "mismatch vs mixed-precision JAX reference"

    # Looser check against the exact f32 eval-mode semantics (bf16 weights).
    ref_f32 = decoder_reference_f32(z, raw)
    assert jnp.allclose(out, ref_f32, atol=3e-2, rtol=3e-2), \
        "mismatch vs f32 JAX reference"

    # Exercise batch padding + the multi-tile ("parallel") grid path.
    z2 = jax.random.normal(jax.random.PRNGKey(1), (20, Z_DIM), jnp.float32)
    out2 = jax.block_until_ready(decoder_forward(z2, folded))
    assert out2.shape == (20, OUT_DIM)
    assert jnp.allclose(out2, decoder_reference_mixed(z2, folded),
                        atol=1e-3, rtol=1e-3), \
        "mismatch vs mixed-precision JAX reference (padded batch)"

    print("KERNEL_OK")
</pallas_src>

<mosaic_0001>
module attributes {stable_mosaic.version = 11 : i64} {
  func.func @decoder_kernel(%arg0: i32, %arg1: memref<8x16xbf16, #tpu.memory_space<vmem>>, %arg2: memref<16x128xbf16, #tpu.memory_space<vmem>>, %arg3: memref<1x128xf32, #tpu.memory_space<vmem>>, %arg4: memref<128x256xbf16, #tpu.memory_space<vmem>>, %arg5: memref<1x256xf32, #tpu.memory_space<vmem>>, %arg6: memref<256x256xbf16, #tpu.memory_space<vmem>>, %arg7: memref<1x256xf32, #tpu.memory_space<vmem>>, %arg8: memref<256x512xbf16, #tpu.memory_space<vmem>>, %arg9: memref<1x512xf32, #tpu.memory_space<vmem>>, %arg10: memref<512x512xbf16, #tpu.memory_space<vmem>>, %arg11: memref<1x512xf32, #tpu.memory_space<vmem>>, %arg12: memref<512x784xbf16, #tpu.memory_space<vmem>>, %arg13: memref<1x784xf32, #tpu.memory_space<vmem>>, %arg14: memref<8x784xf32, #tpu.memory_space<vmem>>) attributes {dimension_semantics = [#tpu.dimension_semantics<parallel>], iteration_bounds = array<i64: 1>, scalar_prefetch = 0 : i64, scratch_operands = 0 : i64, tpu.core_type = #tpu.core_type<tc>, window_params = [{transform_indices = @transform_0, window_bounds = array<i64: 8, 16>}, {pipeline_mode = #tpu.pipeline_mode<synchronous>, transform_indices = @transform_1, window_bounds = array<i64: 16, 128>}, {pipeline_mode = #tpu.pipeline_mode<synchronous>, transform_indices = @transform_2, window_bounds = array<i64: 1, 128>}, {pipeline_mode = #tpu.pipeline_mode<synchronous>, transform_indices = @transform_3, window_bounds = array<i64: 128, 256>}, {pipeline_mode = #tpu.pipeline_mode<synchronous>, transform_indices = @transform_4, window_bounds = array<i64: 1, 256>}, {pipeline_mode = #tpu.pipeline_mode<synchronous>, transform_indices = @transform_5, window_bounds = array<i64: 256, 256>}, {pipeline_mode = #tpu.pipeline_mode<synchronous>, transform_indices = @transform_6, window_bounds = array<i64: 1, 256>}, {pipeline_mode = #tpu.pipeline_mode<synchronous>, transform_indices = @transform_7, window_bounds = array<i64: 256, 512>}, {pipeline_mode = #tpu.pipeline_mode<synchronous>, transform_indices = @transform_8, window_bounds = array<i64: 1, 512>}, {pipeline_mode = #tpu.pipeline_mode<synchronous>, transform_indices = @transform_9, window_bounds = array<i64: 512, 512>}, {pipeline_mode = #tpu.pipeline_mode<synchronous>, transform_indices = @transform_10, window_bounds = array<i64: 1, 512>}, {pipeline_mode = #tpu.pipeline_mode<synchronous>, transform_indices = @transform_11, window_bounds = array<i64: 512, 784>}, {pipeline_mode = #tpu.pipeline_mode<synchronous>, transform_indices = @transform_12, window_bounds = array<i64: 1, 784>}, {transform_indices = @transform_13, window_bounds = array<i64: 8, 784>}]} {
    %c0 = arith.constant 0 : index
    %c0_0 = arith.constant 0 : index
    %0 = vector.load %arg1[%c0, %c0_0] : memref<8x16xbf16, #tpu.memory_space<vmem>>, vector<8x16xbf16>
    %c0_1 = arith.constant 0 : index
    %c0_2 = arith.constant 0 : index
    %1 = vector.load %arg2[%c0_1, %c0_2] : memref<16x128xbf16, #tpu.memory_space<vmem>>, vector<16x128xbf16>
    %cst = arith.constant dense<0.000000e+00> : vector<8x128xf32>
    %2 = tpu.matmul %0, %1, %cst {dimension_numbers = #tpu.dot_dimension_numbers<[1], [0], [0], [1], [0, 0, 1, 1], [], []>} : vector<8x16xbf16>, vector<16x128xbf16>, vector<8x128xf32> -> vector<8x128xf32>
    %c0_3 = arith.constant 0 : index
    %c0_4 = arith.constant 0 : index
    %3 = vector.load %arg3[%c0_3, %c0_4] : memref<1x128xf32, #tpu.memory_space<vmem>>, vector<1x128xf32>
    %4 = vector.broadcast %3 : vector<1x128xf32> to vector<8x128xf32>
    %5 = arith.addf %2, %4 : vector<8x128xf32>
    %cst_5 = arith.constant 0.000000e+00 : f32
    %6 = vector.broadcast %cst_5 : f32 to vector<8x128xf32>
    %7 = arith.maximumf %5, %6 : vector<8x128xf32>
    %8 = arith.truncf %7 : vector<8x128xf32> to vector<8x128xbf16>
    %c0_6 = arith.constant 0 : index
    %c0_7 = arith.constant 0 : index
    %9 = vector.load %arg4[%c0_6, %c0_7] : memref<128x256xbf16, #tpu.memory_space<vmem>>, vector<128x256xbf16>
    %cst_8 = arith.constant dense<0.000000e+00> : vector<8x256xf32>
    %10 = tpu.matmul %8, %9, %cst_8 {dimension_numbers = #tpu.dot_dimension_numbers<[1], [0], [0], [1], [0, 0, 1, 1], [], []>} : vector<8x128xbf16>, vector<128x256xbf16>, vector<8x256xf32> -> vector<8x256xf32>
    %c0_9 = arith.constant 0 : index
    %c0_10 = arith.constant 0 : index
    %11 = vector.load %arg5[%c0_9, %c0_10] : memref<1x256xf32, #tpu.memory_space<vmem>>, vector<1x256xf32>
    %12 = vector.broadcast %11 : vector<1x256xf32> to vector<8x256xf32>
    %13 = arith.addf %10, %12 : vector<8x256xf32>
    %cst_11 = arith.constant 0.000000e+00 : f32
    %14 = vector.broadcast %cst_11 : f32 to vector<8x256xf32>
    %15 = arith.maximumf %13, %14 : vector<8x256xf32>
    %16 = arith.truncf %15 : vector<8x256xf32> to vector<8x256xbf16>
    %c0_12 = arith.constant 0 : index
    %c0_13 = arith.constant 0 : index
    %17 = vector.load %arg6[%c0_12, %c0_13] : memref<256x256xbf16, #tpu.memory_space<vmem>>, vector<256x256xbf16>
    %cst_14 = arith.constant dense<0.000000e+00> : vector<8x256xf32>
    %18 = tpu.matmul %16, %17, %cst_14 {dimension_numbers = #tpu.dot_dimension_numbers<[1], [0], [0], [1], [0, 0, 1, 1], [], []>} : vector<8x256xbf16>, vector<256x256xbf16>, vector<8x256xf32> -> vector<8x256xf32>
    %c0_15 = arith.constant 0 : index
    %c0_16 = arith.constant 0 : index
    %19 = vector.load %arg7[%c0_15, %c0_16] : memref<1x256xf32, #tpu.memory_space<vmem>>, vector<1x256xf32>
    %20 = vector.broadcast %19 : vector<1x256xf32> to vector<8x256xf32>
    %21 = arith.addf %18, %20 : vector<8x256xf32>
    %cst_17 = arith.constant 0.000000e+00 : f32
    %22 = vector.broadcast %cst_17 : f32 to vector<8x256xf32>
    %23 = arith.maximumf %21, %22 : vector<8x256xf32>
    %24 = arith.truncf %23 : vector<8x256xf32> to vector<8x256xbf16>
    %c0_18 = arith.constant 0 : index
    %c0_19 = arith.constant 0 : index
    %25 = vector.load %arg8[%c0_18, %c0_19] : memref<256x512xbf16, #tpu.memory_space<vmem>>, vector<256x512xbf16>
    %cst_20 = arith.constant dense<0.000000e+00> : vector<8x512xf32>
    %26 = tpu.matmul %24, %25, %cst_20 {dimension_numbers = #tpu.dot_dimension_numbers<[1], [0], [0], [1], [0, 0, 1, 1], [], []>} : vector<8x256xbf16>, vector<256x512xbf16>, vector<8x512xf32> -> vector<8x512xf32>
    %c0_21 = arith.constant 0 : index
    %c0_22 = arith.constant 0 : index
    %27 = vector.load %arg9[%c0_21, %c0_22] : memref<1x512xf32, #tpu.memory_space<vmem>>, vector<1x512xf32>
    %28 = vector.broadcast %27 : vector<1x512xf32> to vector<8x512xf32>
    %29 = arith.addf %26, %28 : vector<8x512xf32>
    %cst_23 = arith.constant 0.000000e+00 : f32
    %30 = vector.broadcast %cst_23 : f32 to vector<8x512xf32>
    %31 = arith.maximumf %29, %30 : vector<8x512xf32>
    %32 = arith.truncf %31 : vector<8x512xf32> to vector<8x512xbf16>
    %c0_24 = arith.constant 0 : index
    %c0_25 = arith.constant 0 : index
    %33 = vector.load %arg10[%c0_24, %c0_25] : memref<512x512xbf16, #tpu.memory_space<vmem>>, vector<512x512xbf16>
    %cst_26 = arith.constant dense<0.000000e+00> : vector<8x512xf32>
    %34 = tpu.matmul %32, %33, %cst_26 {dimension_numbers = #tpu.dot_dimension_numbers<[1], [0], [0], [1], [0, 0, 1, 1], [], []>} : vector<8x512xbf16>, vector<512x512xbf16>, vector<8x512xf32> -> vector<8x512xf32>
    %c0_27 = arith.constant 0 : index
    %c0_28 = arith.constant 0 : index
    %35 = vector.load %arg11[%c0_27, %c0_28] : memref<1x512xf32, #tpu.memory_space<vmem>>, vector<1x512xf32>
    %36 = vector.broadcast %35 : vector<1x512xf32> to vector<8x512xf32>
    %37 = arith.addf %34, %36 : vector<8x512xf32>
    %cst_29 = arith.constant 0.000000e+00 : f32
    %38 = vector.broadcast %cst_29 : f32 to vector<8x512xf32>
    %39 = arith.maximumf %37, %38 : vector<8x512xf32>
    %40 = arith.truncf %39 : vector<8x512xf32> to vector<8x512xbf16>
    %c0_30 = arith.constant 0 : index
    %c0_31 = arith.constant 0 : index
    %41 = vector.load %arg12[%c0_30, %c0_31] : memref<512x784xbf16, #tpu.memory_space<vmem>>, vector<512x784xbf16>
    %cst_32 = arith.constant dense<0.000000e+00> : vector<8x784xf32>
    %42 = tpu.matmul %40, %41, %cst_32 {dimension_numbers = #tpu.dot_dimension_numbers<[1], [0], [0], [1], [0, 0, 1, 1], [], []>} : vector<8x512xbf16>, vector<512x784xbf16>, vector<8x784xf32> -> vector<8x784xf32>
    %c0_33 = arith.constant 0 : index
    %c0_34 = arith.constant 0 : index
    %43 = vector.load %arg13[%c0_33, %c0_34] : memref<1x784xf32, #tpu.memory_space<vmem>>, vector<1x784xf32>
    %44 = vector.broadcast %43 : vector<1x784xf32> to vector<8x784xf32>
    %45 = arith.addf %42, %44 : vector<8x784xf32>
    %cst_35 = arith.constant 5.000000e-01 : f32
    %46 = vector.broadcast %cst_35 : f32 to vector<8x784xf32>
    %47 = arith.mulf %46, %45 : vector<8x784xf32>
    %48 = math.tanh %47 : vector<8x784xf32>
    %cst_36 = arith.constant 5.000000e-01 : f32
    %49 = vector.broadcast %cst_36 : f32 to vector<8x784xf32>
    %50 = arith.mulf %49, %48 : vector<8x784xf32>
    %cst_37 = arith.constant 5.000000e-01 : f32
    %51 = vector.broadcast %cst_37 : f32 to vector<8x784xf32>
    %52 = arith.addf %50, %51 : vector<8x784xf32>
    %c0_38 = arith.constant 0 : index
    %c0_39 = arith.constant 0 : index
    %53 = vector.load %arg14[%c0_38, %c0_39] : memref<8x784xf32, #tpu.memory_space<vmem>>, vector<8x784xf32>
    tpu.vector_store %arg14[%c0_38, %c0_39], %52 {strides = array<i32>} : memref<8x784xf32, #tpu.memory_space<vmem>>, vector<8x784xf32>,
    return
  }
  func.func @transform_0(%arg0: i32) -> (i32, i32) {
    %c0_i32 = arith.constant 0 : i32
    %c0_i32_0 = arith.constant 0 : i32
    return %arg0, %c0_i32 : i32, i32
  }
  func.func @transform_1(%arg0: i32) -> (i32, i32) {
    %c0_i32 = arith.constant 0 : i32
    %c0_i32_0 = arith.constant 0 : i32
    %c0_i32_1 = arith.constant 0 : i32
    return %c0_i32, %c0_i32_0 : i32, i32
  }
  func.func @transform_2(%arg0: i32) -> (i32, i32) {
    %c0_i32 = arith.constant 0 : i32
    %c0_i32_0 = arith.constant 0 : i32
    %c0_i32_1 = arith.constant 0 : i32
    return %c0_i32, %c0_i32_0 : i32, i32
  }
  func.func @transform_3(%arg0: i32) -> (i32, i32) {
    %c0_i32 = arith.constant 0 : i32
    %c0_i32_0 = arith.constant 0 : i32
    %c0_i32_1 = arith.constant 0 : i32
    return %c0_i32, %c0_i32_0 : i32, i32
  }
  func.func @transform_4(%arg0: i32) -> (i32, i32) {
    %c0_i32 = arith.constant 0 : i32
    %c0_i32_0 = arith.constant 0 : i32
    %c0_i32_1 = arith.constant 0 : i32
    return %c0_i32, %c0_i32_0 : i32, i32
  }
  func.func @transform_5(%arg0: i32) -> (i32, i32) {
    %c0_i32 = arith.constant 0 : i32
    %c0_i32_0 = arith.constant 0 : i32
    %c0_i32_1 = arith.constant 0 : i32
    return %c0_i32, %c0_i32_0 : i32, i32
  }
  func.func @transform_6(%arg0: i32) -> (i32, i32) {
    %c0_i32 = arith.constant 0 : i32
    %c0_i32_0 = arith.constant 0 : i32
    %c0_i32_1 = arith.constant 0 : i32
    return %c0_i32, %c0_i32_0 : i32, i32
  }
  func.func @transform_7(%arg0: i32) -> (i32, i32) {
    %c0_i32 = arith.constant 0 : i32
    %c0_i32_0 = arith.constant 0 : i32
    %c0_i32_1 = arith.constant 0 : i32
    return %c0_i32, %c0_i32_0 : i32, i32
  }
  func.func @transform_8(%arg0: i32) -> (i32, i32) {
    %c0_i32 = arith.constant 0 : i32
    %c0_i32_0 = arith.constant 0 : i32
    %c0_i32_1 = arith.constant 0 : i32
    return %c0_i32, %c0_i32_0 : i32, i32
  }
  func.func @transform_9(%arg0: i32) -> (i32, i32) {
    %c0_i32 = arith.constant 0 : i32
    %c0_i32_0 = arith.constant 0 : i32
    %c0_i32_1 = arith.constant 0 : i32
    return %c0_i32, %c0_i32_0 : i32, i32
  }
  func.func @transform_10(%arg0: i32) -> (i32, i32) {
    %c0_i32 = arith.constant 0 : i32
    %c0_i32_0 = arith.constant 0 : i32
    %c0_i32_1 = arith.constant 0 : i32
    return %c0_i32, %c0_i32_0 : i32, i32
  }
  func.func @transform_11(%arg0: i32) -> (i32, i32) {
    %c0_i32 = arith.constant 0 : i32
    %c0_i32_0 = arith.constant 0 : i32
    %c0_i32_1 = arith.constant 0 : i32
    return %c0_i32, %c0_i32_0 : i32, i32
  }
  func.func @transform_12(%arg0: i32) -> (i32, i32) {
    %c0_i32 = arith.constant 0 : i32
    %c0_i32_0 = arith.constant 0 : i32
    %c0_i32_1 = arith.constant 0 : i32
    return %c0_i32, %c0_i32_0 : i32, i32
  }
  func.func @transform_13(%arg0: i32) -> (i32, i32) {
    %c0_i32 = arith.constant 0 : i32
    %c0_i32_0 = arith.constant 0 : i32
    return %arg0, %c0_i32 : i32, i32
  }
}

</mosaic_0001>

<bundles_post_ra>
// kernel: _decoder_call.1
= control target key start
LH: loop header
LB: loop body
LE: loop exit
PB: predicated region body
PF: predicated region fallthrough
CT: control target
= control target key end

     0   :  { %vm59_vm0 = vcmask 130048   ;;  %s9172_s0 = inlined_call_operand.vmem [shape: bf16[8,16], index: 0, kind: input, shape index: {}]   ;;  %s9173_s1 = inlined_call_operand.vmem [shape: bf16[16,128], index: 1, kind: input, shape index: {}]   ;;  %s9174_s2 = inlined_call_operand.vmem [shape: f32[1,128], index: 2, kind: input, shape index: {}]   ;;  %s9175_s3 = inlined_call_operand.vmem [shape: bf16[128,256], index: 3, kind: input, shape index: {}]   ;;  %s9176_s4 = inlined_call_operand.vmem [shape: f32[1,256], index: 4, kind: input, shape index: {}]   ;;  %s9177_s5 = inlined_call_operand.vmem [shape: bf16[256,256], index: 5, kind: input, shape index: {}]   ;;  %s9178_s6 = inlined_call_operand.vmem [shape: f32[1,256], index: 6, kind: input, shape index: {}]   ;;  %s9179_s7 = inlined_call_operand.vmem [shape: bf16[256,512], index: 7, kind: input, shape index: {}]   ;;  %s9180_s8 = inlined_call_operand.vmem [shape: f32[1,512], index: 8, kind: input, shape index: {}]   ;;  %s9181_s9 = inlined_call_operand.vmem [shape: bf16[512,512], index: 9, kind: input, shape index: {}]   ;;  %s9182_s10 = inlined_call_operand.vmem [shape: f32[1,512], index: 10, kind: input, shape index: {}]   ;;  %s9183_s11 = inlined_call_operand.vmem [shape: bf16[512,784], index: 11, kind: input, shape index: {}]   ;;  %s9184_s12 = inlined_call_operand.vmem [shape: f32[1,784], index: 12, kind: input, shape index: {}]   ;;  %s9185_s13 = inlined_call_operand.hbm [shape: f32[8,784], index: 13, kind: output, shape index: {}]  }
   0x1   :  { %v5664_v0 = vld [vmem:[%s9173_s1] sm:$0xff]  ;;  %v3866_v2 = vld [vmem:[%s9175_s3 + $0x70] sm:$0xf]  ;;  %v5680_v3 = vld [vmem:[%s9175_s3 + $0x74] sm:$0xf0] }
   0x2   :  { %v46_v1 = vld [vmem:[%s9172_s0] sm:$0xf]  ;;  %v5679_v4 = vld [vmem:[%s9175_s3 + $0x74] sm:$0xf]  ;;  %v3868_v5 = vld [vmem:[%s9175_s3 + $0x78] sm:$0xf0]  ;;  %70 = vmatpush.bf16.msra.mxu0 %v5664_v0  ;;  %v3867_v6 = vor.u32 %v5680_v3, %v3866_v2 }
   0x3   :  { %v3871_v7 = vor.u32 %v5679_v4, %v3868_v5  ;;  %v3858_v8 = vld [vmem:[%s9175_s3 + $0x60] sm:$0xf]  ;;  %v5678_v9 = vld [vmem:[%s9175_s3 + $0x64] sm:$0xf0]  ;;  %v5677_v10 = vld [vmem:[%s9175_s3 + $0x64] sm:$0xf] }
   0x4   :  { %v3860_v11 = vld [vmem:[%s9175_s3 + $0x68] sm:$0xf0]  ;;  %180 = vmatpush.bf16.msra.mxu1 %v3867_v6  ;;  %v3859_v12 = vor.u32 %v5678_v9, %v3858_v8  ;;  %v3850_v14 = vld [vmem:[%s9175_s3 + $0x50] sm:$0xf]  ;;  %v5676_v15 = vld [vmem:[%s9175_s3 + $0x54] sm:$0xf0] }
   0x5   :  { %193 = vmatpush.bf16.msra.mxu2 %v3871_v7  ;;  %v3863_v13 = vor.u32 %v5677_v10, %v3860_v11  ;;  %3807 = vmatmul.msk.bf16.vlgmr.msra.gmra.mxu0 %vm59_vm0, %v46_v1  ;;  %v5675_v16 = vld [vmem:[%s9175_s3 + $0x54] sm:$0xf]  ;;  %v3852_v17 = vld [vmem:[%s9175_s3 + $0x58] sm:$0xf0]  ;;  %v3851_v18 = vor.u32 %v5676_v15, %v3850_v14  ;;  %v3842_v20 = vld [vmem:[%s9175_s3 + $0x40] sm:$0xf] }
   0x6   :  { %v3855_v19 = vor.u32 %v5675_v16, %v3852_v17  ;;  %v5674_v21 = vld [vmem:[%s9175_s3 + $0x44] sm:$0xf0]  ;;  %v5673_v22 = vld [vmem:[%s9175_s3 + $0x44] sm:$0xf]  ;;  %v3844_v23 = vld [vmem:[%s9175_s3 + $0x48] sm:$0xf0] }
   0x8   :  { %181 = vmatpush.bf16.msra.mxu1 %v3859_v12 }
   0x9   :  { %194 = vmatpush.bf16.msra.mxu2 %v3863_v13 }
   0xa   :  { %18 = vsyncpa [#allocation3], 0  ;;  %v3843_v24 = vor.u32 %v5674_v21, %v3842_v20  ;;  %v3847_v25 = vor.u32 %v5673_v22, %v3844_v23  ;;  %v3834_v26 = vld [vmem:[%s9175_s3 + $0x30] sm:$0xf]  ;;  %v5672_v27 = vld [vmem:[%s9175_s3 + $0x34] sm:$0xf0] }
   0xb   :  { %v5671_v28 = vld [vmem:[%s9175_s3 + $0x34] sm:$0xf]  ;;  %v3836_v29 = vld [vmem:[%s9175_s3 + $0x38] sm:$0xf0]  ;;  %v3835_v30 = vor.u32 %v5672_v27, %v3834_v26  ;;  %v3826_v32 = vld [vmem:[%s9175_s3 + $0x20] sm:$0xf] }
   0xc   :  { %182 = vmatpush.bf16.msra.mxu1 %v3851_v18  ;;  %v3839_v31 = vor.u32 %v5671_v28, %v3836_v29  ;;  %v5670_v33 = vld [vmem:[%s9175_s3 + $0x24] sm:$0xf0]  ;;  %v5669_v34 = vld [vmem:[%s9175_s3 + $0x24] sm:$0xf]  ;;  %v3828_v35 = vld [vmem:[%s9175_s3 + $0x28] sm:$0xf0] }
   0xd   :  { %195 = vmatpush.bf16.msra.mxu2 %v3855_v19  ;;  %v3827_v36 = vor.u32 %v5670_v33, %v3826_v32  ;;  %v3831_v37 = vor.u32 %v5669_v34, %v3828_v35  ;;  %v3818_v38 = vld [vmem:[%s9175_s3 + $0x10] sm:$0xf]  ;;  %v5668_v39 = vld [vmem:[%s9175_s3 + $0x14] sm:$0xf0]  ;;  %v5667_v40 = vld [vmem:[%s9175_s3 + $0x14] sm:$0xf] }
   0xe   :  { %v3819_v41 = vor.u32 %v5668_v39, %v3818_v38  ;;  %v3820_v42 = vld [vmem:[%s9175_s3 + $0x18] sm:$0xf0]  ;;  %v3810_v44 = vld [vmem:[%s9175_s3] sm:$0xf]  ;;  %v5666_v45 = vld [vmem:[%s9175_s3 + $0x4] sm:$0xf0] }
   0xf   :  { %v3823_v43 = vor.u32 %v5667_v40, %v3820_v42  ;;  %v5665_v46 = vld [vmem:[%s9175_s3 + $0x4] sm:$0xf]  ;;  %v3811_v47 = vor.u32 %v5666_v45, %v3810_v44  ;;  %v3812_v48 = vld [vmem:[%s9175_s3 + $0x8] sm:$0xf0]  ;;  %v3930_v50 = vld [vmem:[%s9177_s5 + $0x70] sm:$0xf] }
  0x10   :  { %183 = vmatpush.bf16.msra.mxu1 %v3843_v24  ;;  %v3815_v49 = vor.u32 %v5665_v46, %v3812_v48  ;;  %v5696_v51 = vld [vmem:[%s9177_s5 + $0x74] sm:$0xf0]  ;;  %v5695_v52 = vld [vmem:[%s9177_s5 + $0x74] sm:$0xf]  ;;  %v3932_v54 = vld [vmem:[%s9177_s5 + $0x78] sm:$0xf0] }
  0x11   :  { %196 = vmatpush.bf16.msra.mxu2 %v3847_v25  ;;  %v3931_v53 = vor.u32 %v5696_v51, %v3930_v50  ;;  %v3922_v55 = vld [vmem:[%s9177_s5 + $0x60] sm:$0xf]  ;;  %v5694_v56 = vld [vmem:[%s9177_s5 + $0x64] sm:$0xf0]  ;;  %v3935_v57 = vor.u32 %v5695_v52, %v3932_v54  ;;  %v5693_v58 = vld [vmem:[%s9177_s5 + $0x64] sm:$0xf] }
  0x12   :  { %v3924_v59 = vld [vmem:[%s9177_s5 + $0x68] sm:$0xf0]  ;;  %v3994_v60 = vld [vmem:[%s9177_s5 + $0xf0] sm:$0xf]  ;;  %v3923_v61 = vor.u32 %v5694_v56, %v3922_v55  ;;  %v5712_v62 = vld [vmem:[%s9177_s5 + $0xf4] sm:$0xf0] }
  0x13   :  { %408 = vmatpush.bf16.msra.mxu3 %v3931_v53  ;;  %v5711_v63 = vld [vmem:[%s9177_s5 + $0xf4] sm:$0xf]  ;;  %v3996_v0 = vld [vmem:[%s9177_s5 + $0xf8] sm:$0xf0]  ;;  %v3927_v1 = vor.u32 %v5693_v58, %v3924_v59  ;;  %v3995_v2 = vor.u32 %v5712_v62, %v3994_v60  ;;  %v3914_v4 = vld [vmem:[%s9177_s5 + $0x50] sm:$0xf] }
  0x14   :  { %184 = vmatpush.bf16.msra.mxu1 %v3835_v30  ;;  %v3999_v3 = vor.u32 %v5711_v63, %v3996_v0  ;;  %v5692_v5 = vld [vmem:[%s9177_s5 + $0x54] sm:$0xf0]  ;;  %v5691_v6 = vld [vmem:[%s9177_s5 + $0x54] sm:$0xf]  ;;  %v3916_v7 = vld [vmem:[%s9177_s5 + $0x58] sm:$0xf0] }
  0x15   :  { %197 = vmatpush.bf16.msra.mxu2 %v3839_v31  ;;  %v3986_v8 = vld [vmem:[%s9177_s5 + $0xe0] sm:$0xf]  ;;  %v5710_v9 = vld [vmem:[%s9177_s5 + $0xe4] sm:$0xf0]  ;;  %421 = vmatpush.bf16.msrb.mxu0 %v3995_v2  ;;  %v5709_v11 = vld [vmem:[%s9177_s5 + $0xe4] sm:$0xf]  ;;  %v3915_v13 = vor.u32 %v5692_v5, %v3914_v4  ;;  %v3919_v17 = vor.u32 %v5691_v6, %v3916_v7 }
  0x16   :  { %v3987_v10 = vor.u32 %v5710_v9, %v3986_v8  ;;  %v3988_v12 = vld [vmem:[%s9177_s5 + $0xe8] sm:$0xf0]  ;;  %v3906_v15 = vld [vmem:[%s9177_s5 + $0x40] sm:$0xf]  ;;  %v5690_v16 = vld [vmem:[%s9177_s5 + $0x44] sm:$0xf0] }
  0x17   :  { %409 = vmatpush.bf16.msra.mxu3 %v3923_v61  ;;  %v3991_v14 = vor.u32 %v5709_v11, %v3988_v12  ;;  %v3978_v18 = vld [vmem:[%s9177_s5 + $0xd0] sm:$0xf]  ;;  %v5708_v19 = vld [vmem:[%s9177_s5 + $0xd4] sm:$0xf0]  ;;  %v5707_v20 = vld [vmem:[%s9177_s5 + $0xd4] sm:$0xf]  ;;  %v3907_v27 = vor.u32 %v5690_v16, %v3906_v15 }
  0x18   :  { %185 = vmatpush.bf16.msra.mxu1 %v3827_v36  ;;  %v5689_v21 = vld [vmem:[%s9177_s5 + $0x44] sm:$0xf]  ;;  %v3908_v22 = vld [vmem:[%s9177_s5 + $0x48] sm:$0xf0]  ;;  %v3980_v23 = vld [vmem:[%s9177_s5 + $0xd8] sm:$0xf0]  ;;  %v3979_v24 = vor.u32 %v5708_v19, %v3978_v18 }
  0x19   :  { %198 = vmatpush.bf16.msra.mxu2 %v3831_v37  ;;  %422 = vmatpush.bf16.msrb.mxu0 %v3987_v10  ;;  %v3983_v25 = vor.u32 %v5707_v20, %v3980_v23  ;;  %v3970_v26 = vld [vmem:[%s9177_s5 + $0xc0] sm:$0xf]  ;;  %v5706_v28 = vld [vmem:[%s9177_s5 + $0xc4] sm:$0xf0]  ;;  %v5705_v29 = vld [vmem:[%s9177_s5 + $0xc4] sm:$0xf]  ;;  %v3911_v31 = vor.u32 %v5689_v21, %v3908_v22 }
  0x1a   :  { %v3972_v30 = vld [vmem:[%s9177_s5 + $0xc8] sm:$0xf0]  ;;  %v3898_v32 = vld [vmem:[%s9177_s5 + $0x30] sm:$0xf]  ;;  %v5688_v33 = vld [vmem:[%s9177_s5 + $0x34] sm:$0xf0]  ;;  %v3971_v36 = vor.u32 %v5706_v28, %v3970_v26 }
  0x1b   :  { %410 = vmatpush.bf16.msra.mxu3 %v3915_v13  ;;  %v5687_v34 = vld [vmem:[%s9177_s5 + $0x34] sm:$0xf]  ;;  %v3900_v35 = vld [vmem:[%s9177_s5 + $0x38] sm:$0xf0]  ;;  %v3975_v37 = vor.u32 %v5705_v29, %v3972_v30  ;;  %v3962_v38 = vld [vmem:[%s9177_s5 + $0xb0] sm:$0xf]  ;;  %v3899_v39 = vor.u32 %v5688_v33, %v3898_v32 }
  0x1c   :  { %186 = vmatpush.bf16.msra.mxu1 %v3819_v41  ;;  %v5704_v40 = vld [vmem:[%s9177_s5 + $0xb4] sm:$0xf0]  ;;  %v5703_v41 = vld [vmem:[%s9177_s5 + $0xb4] sm:$0xf]  ;;  %v3964_v42 = vld [vmem:[%s9177_s5 + $0xb8] sm:$0xf0] }
  0x1d   :  { %199 = vmatpush.bf16.msra.mxu2 %v3823_v43  ;;  %423 = vmatpush.bf16.msrb.mxu0 %v3979_v24  ;;  %v3903_v43 = vor.u32 %v5687_v34, %v3900_v35  ;;  %v3890_v44 = vld [vmem:[%s9177_s5 + $0x20] sm:$0xf]  ;;  %v5686_v45 = vld [vmem:[%s9177_s5 + $0x24] sm:$0xf0]  ;;  %v5685_v46 = vld [vmem:[%s9177_s5 + $0x24] sm:$0xf]  ;;  %v3963_v48 = vor.u32 %v5704_v40, %v3962_v38 }
  0x1e   :  { %v3891_v50 = vor.u32 %v5686_v45, %v3890_v44  ;;  %v6130_v52 = vld [vmem:[%s9174_s2] ss:$0 sm:$0xff]  ;;  %v3882_v58 = vld [vmem:[%s9177_s5 + $0x10] sm:$0xf]  ;;  %v5684_v59 = vld [vmem:[%s9177_s5 + $0x14] sm:$0xf0] }
  0x1f   :  { %411 = vmatpush.bf16.msra.mxu3 %v3907_v27  ;;  %v5683_v60 = vld [vmem:[%s9177_s5 + $0x14] sm:$0xf]  ;;  %v3883_v61 = vor.u32 %v5684_v59, %v3882_v58  ;;  %v3884_v62 = vld [vmem:[%s9177_s5 + $0x18] sm:$0xf0]  ;;  %v3954_v0 = vld [vmem:[%s9177_s5 + $0xa0] sm:$0xf] }
  0x20   :  { %187 = vmatpush.bf16.msra.mxu1 %v3811_v47  ;;  %v3892_v47 = vld [vmem:[%s9177_s5 + $0x28] sm:$0xf0]  ;;  %v3887_v63 = vor.u32 %v5683_v60, %v3884_v62  ;;  %v5701_v2 = vld [vmem:[%s9177_s5 + $0xa4] sm:$0xf]  ;;  %v3874_v6 = vld [vmem:[%s9177_s5] sm:$0xf] }
  0x21   :  { %200 = vmatpush.bf16.msra.mxu2 %v3815_v49  ;;  %424 = vmatpush.bf16.msrb.mxu0 %v3971_v36  ;;  %v3967_v49 = vor.u32 %v5703_v41, %v3964_v42  ;;  %v3895_v51 = vor.u32 %v5685_v46, %v3892_v47  ;;  %v3956_v4 = vld [vmem:[%s9177_s5 + $0xa8] sm:$0xf0]  ;;  %v5682_v7 = vld [vmem:[%s9177_s5 + $0x4] sm:$0xf0]  ;;  %v5681_v8 = vld [vmem:[%s9177_s5 + $0x4] sm:$0xf] }
  0x22   :  { %v3959_v5 = vor.u32 %v5701_v2, %v3956_v4  ;;  %v3875_v9 = vor.u32 %v5682_v7, %v3874_v6  ;;  %v3876_v10 = vld [vmem:[%s9177_s5 + $0x8] sm:$0xf0]  ;;  %v3946_v12 = vld [vmem:[%s9177_s5 + $0x90] sm:$0xf]  ;;  %v5700_v13 = vld [vmem:[%s9177_s5 + $0x94] sm:$0xf0] }
  0x23   :  { %412 = vmatpush.bf16.msra.mxu3 %v3899_v39  ;;  %v3879_v11 = vor.u32 %v5681_v8, %v3876_v10  ;;  %v5699_v15 = vld [vmem:[%s9177_s5 + $0x94] sm:$0xf]  ;;  %v3948_v16 = vld [vmem:[%s9177_s5 + $0x98] sm:$0xf0]  ;;  %v3938_v18 = vld [vmem:[%s9177_s5 + $0x80] sm:$0xf] }
  0x24   :  { %434 = vmatpush.bf16.msrb.mxu1 %v3935_v57  ;;  %v5698_v19 = vld [vmem:[%s9177_s5 + $0x84] sm:$0xf0]  ;;  %v5697_v20 = vld [vmem:[%s9177_s5 + $0x84] sm:$0xf]  ;;  %v3940_v22 = vld [vmem:[%s9177_s5 + $0x88] sm:$0xf0] }
  0x25   :  { %447 = vmatpush.bf16.msrb.mxu2 %v3999_v3  ;;  %425 = vmatpush.bf16.msrb.mxu0 %v3963_v48  ;;  %v3939_v21 = vor.u32 %v5698_v19, %v3938_v18  ;;  %v3943_v23 = vor.u32 %v5697_v20, %v3940_v22  ;;  %v4114_v24 = vld [vmem:[%s9179_s7 + $0xe0] sm:$0xf]  ;;  %v5741_v26 = vld [vmem:[%s9179_s7 + $0xe4] sm:$0xf]  ;;  %v4116_v28 = vld [vmem:[%s9179_s7 + $0xf0] sm:$0xf0] }
  0x26   :  { %v4098_v29 = vld [vmem:[%s9179_s7 + $0xc0] sm:$0xf]  ;;  %v5739_v30 = vld [vmem:[%s9179_s7 + $0xcc] sm:$0xf0]  ;;  %v5737_v34 = vld [vmem:[%s9179_s7 + $0xc4] sm:$0xf] }
  0x27   :  { %413 = vmatpush.bf16.msra.mxu3 %v3891_v50  ;;  %v4242_v32 = vld [vmem:[%s9179_s7 + $0x1e0] sm:$0xf]  ;;  %v5775_v33 = vld [vmem:[%s9179_s7 + $0x1ec] sm:$0xf0]  ;;  %v4099_v35 = vor.u32 %v5739_v30, %v4098_v29  ;;  %v5773_v38 = vld [vmem:[%s9179_s7 + $0x1e4] sm:$0xf] }
  0x28   :  { %435 = vmatpush.bf16.msrb.mxu1 %v3927_v1  ;;  %v5702_v1 = vld [vmem:[%s9177_s5 + $0xa4] sm:$0xf0]  ;;  %v4243_v36 = vor.u32 %v5775_v33, %v4242_v32  ;;  %v4244_v39 = vld [vmem:[%s9179_s7 + $0x1f0] sm:$0xf0]  ;;  %v4082_v42 = vld [vmem:[%s9179_s7 + $0xa0] sm:$0xf] }
  0x29   :  { %448 = vmatpush.bf16.msrb.mxu2 %v3991_v14  ;;  %v3955_v3 = vor.u32 %v5702_v1, %v3954_v0  ;;  %v3947_v14 = vor.u32 %v5700_v13, %v3946_v12  ;;  %v4247_v41 = vor.u32 %v5773_v38, %v4244_v39  ;;  %v4226_v44 = vld [vmem:[%s9179_s7 + $0x1c0] sm:$0xf]  ;;  %v5771_v45 = vld [vmem:[%s9179_s7 + $0x1cc] sm:$0xf0]  ;;  %v5733_v46 = vld [vmem:[%s9179_s7 + $0xa4] sm:$0xf] }
  0x2a   :  { %v4084_v47 = vld [vmem:[%s9179_s7 + $0xb0] sm:$0xf0]  ;;  %v4227_v48 = vor.u32 %v5771_v45, %v4226_v44  ;;  %v5765_v58 = vld [vmem:[%s9179_s7 + $0x1a4] sm:$0xf]  ;;  %v4194_v0 = vld [vmem:[%s9179_s7 + $0x180] sm:$0xf] }
  0x2b   :  { %414 = vmatpush.bf16.msra.mxu3 %v3883_v61  ;;  %426 = vmatpush.bf16.msrb.mxu0 %v3955_v3  ;;  %v4228_v50 = vld [vmem:[%s9179_s7 + $0x1d0] sm:$0xf0]  ;;  %v5729_v60 = vld [vmem:[%s9179_s7 + $0x84] sm:$0xf]  ;;  %v5763_v1 = vld [vmem:[%s9179_s7 + $0x18c] sm:$0xf0] }
  0x2c   :  { %436 = vmatpush.bf16.msrb.mxu1 %v3919_v17  ;;  %v3951_v17 = vor.u32 %v5699_v15, %v3948_v16  ;;  %v4068_v61 = vld [vmem:[%s9179_s7 + $0x90] sm:$0xf0]  ;;  %v5761_v3 = vld [vmem:[%s9179_s7 + $0x184] sm:$0xf]  ;;  %v4050_v7 = vld [vmem:[%s9179_s7 + $0x60] sm:$0xf] }
  0x2d   :  { %449 = vmatpush.bf16.msrb.mxu2 %v3983_v25  ;;  %v5743_v25 = vld [vmem:[%s9179_s7 + $0xec] sm:$0xf0]  ;;  %v4212_v62 = vld [vmem:[%s9179_s7 + $0x1b0] sm:$0xf0]  ;;  %v4071_v6 = vor.u32 %v5729_v60, %v4068_v61  ;;  %v5725_v10 = vld [vmem:[%s9179_s7 + $0x64] sm:$0xf] }
  0x2e   :  { %v4115_v27 = vor.u32 %v5743_v25, %v4114_v24  ;;  %v4196_v4 = vld [vmem:[%s9179_s7 + $0x190] sm:$0xf0]  ;;  %v5727_v8 = vld [vmem:[%s9179_s7 + $0x6c] sm:$0xf0]  ;;  %v4178_v13 = vld [vmem:[%s9179_s7 + $0x160] sm:$0xf] }
  0x2f   :  { %415 = vmatpush.bf16.msra.mxu3 %v3875_v9  ;;  %427 = vmatpush.bf16.msrb.mxu0 %v3947_v14  ;;  %v4195_v9 = vor.u32 %v5763_v1, %v4194_v0  ;;  %v4199_v12 = vor.u32 %v5761_v3, %v4196_v4  ;;  %v5759_v14 = vld [vmem:[%s9179_s7 + $0x16c] sm:$0xf0]  ;;  %v4051_v16 = vor.u32 %v5727_v8, %v4050_v7  ;;  %v4180_v18 = vld [vmem:[%s9179_s7 + $0x170] sm:$0xf0]  ;;  %v4034_v20 = vld [vmem:[%s9179_s7 + $0x40] sm:$0xf] }
  0x30   :  { %437 = vmatpush.bf16.msrb.mxu1 %v3911_v31  ;;  %v4119_v31 = vor.u32 %v5741_v26, %v4116_v28  ;;  %v4179_v22 = vor.u32 %v5759_v14, %v4178_v13  ;;  %v4036_v24 = vld [vmem:[%s9179_s7 + $0x50] sm:$0xf0]  ;;  %v5755_v30 = vld [vmem:[%s9179_s7 + $0x14c] sm:$0xf0]  ;;  %v5717_v38 = vld [vmem:[%s9179_s7 + $0x24] sm:$0xf] }
  0x31   :  { %450 = vmatpush.bf16.msrb.mxu2 %v3975_v37  ;;  %v4100_v37 = vld [vmem:[%s9179_s7 + $0xd0] sm:$0xf0]  ;;  %v5751_v45 = vld [vmem:[%s9179_s7 + $0x12c] sm:$0xf0]  ;;  %v5744_v0 = vld [vmem:[%s9179_s7 + $0xf4] sm:$0xf0] }
  0x32   :  { %v4103_v40 = vor.u32 %v5737_v34, %v4100_v37  ;;  %v4164_v32 = vld [vmem:[%s9179_s7 + $0x150] sm:$0xf0]  ;;  %v4018_v34 = vld [vmem:[%s9179_s7 + $0x20] sm:$0xf]  ;;  %v5742_v1 = vld [vmem:[%s9179_s7 + $0xec] sm:$0xf] }
  0x33   :  { %428 = vmatpush.bf16.msrb.mxu0 %v3939_v21  ;;  %858 = vmatpush.bf16.msrb.mxu3 %v4115_v27  ;;  %v5723_v21 = vld [vmem:[%s9179_s7 + $0x4c] sm:$0xf0]  ;;  %v4162_v27 = vld [vmem:[%s9179_s7 + $0x140] sm:$0xf]  ;;  %v4020_v39 = vld [vmem:[%s9179_s7 + $0x30] sm:$0xf0] }
  0x34   :  { %438 = vmatpush.bf16.msrb.mxu1 %v3903_v43  ;;  %v5735_v43 = vld [vmem:[%s9179_s7 + $0xac] sm:$0xf0]  ;;  %v4035_v29 = vor.u32 %v5723_v21, %v4034_v20  ;;  %v4124_v3 = vld [vmem:[%s9179_s7 + $0xf8] sm:$0xf0]  ;;  %v5745_v7 = vld [vmem:[%s9179_s7 + $0x104] sm:$0xf] }
  0x35   :  { %451 = vmatpush.bf16.msrb.mxu2 %v3967_v49  ;;  %v5769_v49 = vld [vmem:[%s9179_s7 + $0x1c4] sm:$0xf]  ;;  %v4127_v4 = vor.u32 %v5742_v1, %v4124_v3  ;;  %v4250_v14 = vld [vmem:[%s9179_s7 + $0x1e8] sm:$0xf]  ;;  %v4252_v20 = vld [vmem:[%s9179_s7 + $0x1f8] sm:$0xf0] }
  0x36   :  { %v4044_v1 = vld [vmem:[%s9179_s7 + $0x58] sm:$0xf0]  ;;  %s3794_s25 = sshll.u32 %s9185_s13, 4  ;;  %s3795_s25 = int_to_ptr.hbm [resolvable:$true] %s3794_s25 }
  0x37   :  { %871 = vmatpush.bf16.msra.mxu0 %v4243_v36  ;;  %859 = vmatpush.bf16.msrb.mxu3 %v4099_v35  ;;  %v5719_v35 = vld [vmem:[%s9179_s7 + $0x2c] sm:$0xf0] }
  0x38   :  { %439 = vmatpush.bf16.msrb.mxu1 %v3895_v51  ;;  %v4083_v51 = vor.u32 %v5735_v43, %v4082_v42  ;;  %v4146_v42 = vld [vmem:[%s9179_s7 + $0x120] sm:$0xf]  ;;  %v4019_v44 = vor.u32 %v5719_v35, %v4018_v34  ;;  %v4074_v35 = vld [vmem:[%s9179_s7 + $0x88] sm:$0xf] }
  0x39   :  { %452 = vmatpush.bf16.msrb.mxu2 %v3959_v5  ;;  %v94_v5 = vld [vmem:[%s9176_s4] sm:$0x3] }
  0x3a   :  { %v96_v15 = vperm.slane %v94_v5, 0  ;;  %v97_v37 = vperm.slane %v94_v5, 1  ;;  %v4130_v5 = vld [vmem:[%s9179_s7 + $0x100] sm:$0xf] }
  0x3b   :  { %872 = vmatpush.bf16.msra.mxu0 %v4227_v48  ;;  %860 = vmatpush.bf16.msrb.mxu3 %v4083_v51 }
  0x3c   :  { %440 = vmatpush.bf16.msrb.mxu1 %v3887_v63  ;;  %v4215_v63 = vor.u32 %v5765_v58, %v4212_v62 }
  0x3d   :  { %453 = vmatpush.bf16.msrb.mxu2 %v3951_v17  ;;  %v5757_v17 = vld [vmem:[%s9179_s7 + $0x164] sm:$0xf] }
  0x3e   :  { %v4183_v26 = vor.u32 %v5757_v17, %v4180_v18  ;;  %v4108_v18 = vld [vmem:[%s9179_s7 + $0xd8] sm:$0xf0] }
  0x40   :  { %441 = vmatpush.bf16.msrb.mxu1 %v3879_v11  ;;  %v4052_v11 = vld [vmem:[%s9179_s7 + $0x70] sm:$0xf0] }
  0x41   :  { %454 = vmatpush.bf16.msrb.mxu2 %v3943_v23  ;;  %v4055_v19 = vor.u32 %v5725_v10, %v4052_v11  ;;  %v5721_v23 = vld [vmem:[%s9179_s7 + $0x44] sm:$0xf]  ;;  %v4106_v10 = vld [vmem:[%s9179_s7 + $0xc8] sm:$0xf]  ;;  %v5740_v11 = vld [vmem:[%s9179_s7 + $0xd4] sm:$0xf0] }
  0x42   :  { %v4039_v33 = vor.u32 %v5721_v23, %v4036_v24  ;;  %v4107_v13 = vor.u32 %v5740_v11, %v4106_v10  ;;  %v4090_v23 = vld [vmem:[%s9179_s7 + $0xa8] sm:$0xf]  ;;  %v5736_v24 = vld [vmem:[%s9179_s7 + $0xb4] sm:$0xf0] }
  0x43   :  { %v5756_v11 = vld [vmem:[%s9179_s7 + $0x154] sm:$0xf0] }
  0x82   :  { %v72_v53 = vpop.f32.mrf.mxu0 }
  0x83   :  { %v73_v54 = vadd.f32 %v6130_v52, %v72_v53  ;;  %v4231_v52 = vor.u32 %v5769_v49, %v4228_v50  ;;  %v4210_v53 = vld [vmem:[%s9179_s7 + $0x1a0] sm:$0xf]  ;;  %v4023_v49 = vor.u32 %v5717_v38, %v4020_v39  ;;  %v5768_v39 = vld [vmem:[%s9179_s7 + $0x1b4] sm:$0xf0] }
  0x84   :  { %v4002_v50 = vld [vmem:[%s9179_s7] sm:$0xf] }
  0x85   :  { %v76_v55 = vmax.f32 %v73_v54, 0.0  ;;  %v5767_v54 = vld [vmem:[%s9179_s7 + $0x1ac] sm:$0xf0] }
  0x86   :  { %v4211_v59 = vor.u32 %v5767_v54, %v4210_v53  ;;  %v5713_v53 = vld [vmem:[%s9179_s7 + $0x4] sm:$0xf]  ;;  %v4004_v54 = vld [vmem:[%s9179_s7 + $0x10] sm:$0xf0] }
  0x87   :  { %v77_v56 = vpack.c.bf16 %v76_v55, %v76_v55  ;;  %v4087_v55 = vor.u32 %v5733_v46, %v4084_v47  ;;  %v5749_v46 = vld [vmem:[%s9179_s7 + $0x124] sm:$0xf]  ;;  %v4148_v47 = vld [vmem:[%s9179_s7 + $0x130] sm:$0xf0]  ;;  %v4007_v60 = vor.u32 %v5713_v53, %v4004_v54  ;;  %v4060_v53 = vld [vmem:[%s9179_s7 + $0x78] sm:$0xf0] }
  0x88   :  { %873 = vmatpush.bf16.msra.mxu0 %v4211_v59 }
  0x89   :  { %188 = vmatmul.bf16.vlgmr.msra.gmra.mxu1 %v77_v56  ;;  %201 = vmatmul.bf16.vlgmr.msra.gmra.mxu2 %v77_v56  ;;  %v4066_v56 = vld [vmem:[%s9179_s7 + $0x80] sm:$0xf] }
  0x8a   :  { %v74_v57 = vpop.f32.mrf.mxu0  ;;  %884 = vmatpush.bf16.msra.mxu1 %v4119_v31  ;;  %897 = vmatpush.bf16.msra.mxu2 %v4247_v41  ;;  %v5753_v31 = vld [vmem:[%s9179_s7 + $0x144] sm:$0xf] }
  0x8b   :  { %v5731_v57 = vld [vmem:[%s9179_s7 + $0x8c] sm:$0xf0]  ;;  %v4167_v41 = vor.u32 %v5753_v31, %v4164_v32  ;;  %v5770_v32 = vld [vmem:[%s9179_s7 + $0x1cc] sm:$0xf] }
  0x8c   :  { %v4067_v2 = vor.u32 %v5731_v57, %v4066_v56  ;;  %874 = vmatpush.bf16.msra.mxu0 %v4195_v9  ;;  %v4147_v56 = vor.u32 %v5751_v45, %v4146_v42  ;;  %v4151_v57 = vor.u32 %v5749_v46, %v4148_v47  ;;  %v4132_v9 = vld [vmem:[%s9179_s7 + $0x110] sm:$0xf0]  ;;  %v4220_v45 = vld [vmem:[%s9179_s7 + $0x1b8] sm:$0xf0]  ;;  %v4058_v47 = vld [vmem:[%s9179_s7 + $0x68] sm:$0xf] }
  0x8e   :  { %885 = vmatpush.bf16.msra.mxu1 %v4103_v40  ;;  %898 = vmatpush.bf16.msra.mxu2 %v4231_v52  ;;  %v4163_v40 = vor.u32 %v5755_v30, %v4162_v27  ;;  %v5715_v52 = vld [vmem:[%s9179_s7 + $0xc] sm:$0xf0]  ;;  %v5772_v27 = vld [vmem:[%s9179_s7 + $0x1d4] sm:$0xf0] }
  0x8f   :  { %861 = vmatpush.bf16.msrb.mxu3 %v4067_v2  ;;  %v4003_v59 = vor.u32 %v5715_v52, %v4002_v50  ;;  %v5726_v52 = vld [vmem:[%s9179_s7 + $0x6c] sm:$0xf] }
  0x90   :  { %875 = vmatpush.bf16.msra.mxu0 %v4179_v22 }
  0x92   :  { %886 = vmatpush.bf16.msra.mxu1 %v4087_v55  ;;  %899 = vmatpush.bf16.msra.mxu2 %v4215_v63  ;;  %v4122_v63 = vld [vmem:[%s9179_s7 + $0xe8] sm:$0xf] }
  0x93   :  { %862 = vmatpush.bf16.msrb.mxu3 %v4051_v16  ;;  %v4123_v2 = vor.u32 %v5744_v0, %v4122_v63  ;;  %v5738_v16 = vld [vmem:[%s9179_s7 + $0xcc] sm:$0xf]  ;;  %v5760_v63 = vld [vmem:[%s9179_s7 + $0x174] sm:$0xf0] }
  0x94   :  { %876 = vmatpush.bf16.msra.mxu0 %v4163_v40  ;;  %v4111_v21 = vor.u32 %v5738_v16, %v4108_v18  ;;  %v5730_v40 = vld [vmem:[%s9179_s7 + $0x8c] sm:$0xf]  ;;  %v4010_v18 = vld [vmem:[%s9179_s7 + $0x8] sm:$0xf] }
  0x95   :  { %v5722_v0 = vld [vmem:[%s9179_s7 + $0x4c] sm:$0xf] }
  0x96   :  { %887 = vmatpush.bf16.msra.mxu1 %v4071_v6  ;;  %900 = vmatpush.bf16.msra.mxu2 %v4199_v12  ;;  %v5747_v6 = vld [vmem:[%s9179_s7 + $0x10c] sm:$0xf0]  ;;  %v4135_v12 = vor.u32 %v5745_v7, %v4132_v9  ;;  %v4047_v3 = vor.u32 %v5722_v0, %v4044_v1  ;;  %v4026_v7 = vld [vmem:[%s9179_s7 + $0x28] sm:$0xf]  ;;  %v5754_v16 = vld [vmem:[%s9179_s7 + $0x14c] sm:$0xf] }
  0x97   :  { %863 = vmatpush.bf16.msrb.mxu3 %v4035_v29  ;;  %v4131_v8 = vor.u32 %v5747_v6, %v4130_v5  ;;  %v4092_v29 = vld [vmem:[%s9179_s7 + $0xb8] sm:$0xf0]  ;;  %v4170_v9 = vld [vmem:[%s9179_s7 + $0x148] sm:$0xf]  ;;  %v5903_v0 = vld [vmem:[%s9181_s9 + $0x3ec] sm:$0xf0] }
  0x98   :  { %877 = vmatpush.bf16.msra.mxu0 %v4147_v56  ;;  %v5762_v56 = vld [vmem:[%s9179_s7 + $0x18c] sm:$0xf]  ;;  %v4188_v5 = vld [vmem:[%s9179_s7 + $0x178] sm:$0xf0]  ;;  %v4610_v1 = vld [vmem:[%s9181_s9 + $0x2c0] sm:$0xf] }
  0x9a   :  { %888 = vmatpush.bf16.msra.mxu1 %v4055_v19  ;;  %901 = vmatpush.bf16.msra.mxu2 %v4183_v26  ;;  %v5774_v19 = vld [vmem:[%s9179_s7 + $0x1ec] sm:$0xf]  ;;  %v4091_v26 = vor.u32 %v5736_v24, %v4090_v23 }
  0x9b   :  { %864 = vmatpush.bf16.msrb.mxu3 %v4019_v44  ;;  %v4255_v22 = vor.u32 %v5774_v19, %v4252_v20  ;;  %v5766_v44 = vld [vmem:[%s9179_s7 + $0x1ac] sm:$0xf]  ;;  %v5716_v20 = vld [vmem:[%s9179_s7 + $0x14] sm:$0xf0] }
  0x9c   :  { %878 = vmatpush.bf16.msra.mxu0 %v4131_v8  ;;  %v4223_v46 = vor.u32 %v5766_v44, %v4220_v45  ;;  %v5720_v8 = vld [vmem:[%s9179_s7 + $0x34] sm:$0xf0]  ;;  %v4011_v23 = vor.u32 %v5716_v20, %v4010_v18  ;;  %v5714_v24 = vld [vmem:[%s9179_s7 + $0xc] sm:$0xf]  ;;  %v4370_v45 = vld [vmem:[%s9181_s9 + $0xe0] sm:$0xf] }
  0x9d   :  { %v4027_v10 = vor.u32 %v5720_v8, %v4026_v7  ;;  %v5835_v7 = vld [vmem:[%s9181_s9 + $0x1cc] sm:$0xf0]  ;;  %v4466_v20 = vld [vmem:[%s9181_s9 + $0x1a0] sm:$0xf] }
  0x9e   :  { %889 = vmatpush.bf16.msra.mxu1 %v4039_v33  ;;  %902 = vmatpush.bf16.msra.mxu2 %v4167_v41  ;;  %v4236_v33 = vld [vmem:[%s9179_s7 + $0x1d8] sm:$0xf0] }
  0x9f   :  { %865 = vmatpush.bf16.msrb.mxu3 %v4003_v59  ;;  %v4239_v34 = vor.u32 %v5770_v32, %v4236_v33  ;;  %v4076_v41 = vld [vmem:[%s9179_s7 + $0x98] sm:$0xf0]  ;;  %v4042_v59 = vld [vmem:[%s9179_s7 + $0x48] sm:$0xf]  ;;  %v5748_v32 = vld [vmem:[%s9179_s7 + $0x114] sm:$0xf0] }
  0xa0   :  { %v5746_v33 = vld [vmem:[%s9179_s7 + $0x10c] sm:$0xf] }
  0xa2   :  { %890 = vmatpush.bf16.msra.mxu1 %v4023_v49  ;;  %903 = vmatpush.bf16.msra.mxu2 %v4151_v57  ;;  %v4202_v49 = vld [vmem:[%s9179_s7 + $0x188] sm:$0xf]  ;;  %v4204_v57 = vld [vmem:[%s9179_s7 + $0x198] sm:$0xf0] }
  0xa6   :  { %891 = vmatpush.bf16.msra.mxu1 %v4007_v60  ;;  %904 = vmatpush.bf16.msra.mxu2 %v4135_v12  ;;  %v5724_v60 = vld [vmem:[%s9179_s7 + $0x54] sm:$0xf0]  ;;  %v5718_v12 = vld [vmem:[%s9179_s7 + $0x2c] sm:$0xf] }
 0x106   :  { %v189_v25 = vpop.f32.mrf.mxu1 }
 0x107   :  { %v190_v28 = vadd.f32 %v189_v25, %v96_v15  ;;  %v5776_v15 = vld [vmem:[%s9179_s7 + $0x1f4] sm:$0xf0]  ;;  %v4234_v25 = vld [vmem:[%s9179_s7 + $0x1c8] sm:$0xf] }
 0x108   :  { %v4251_v17 = vor.u32 %v5776_v15, %v4250_v14  ;;  %v4235_v30 = vor.u32 %v5772_v27, %v4234_v25  ;;  %v4171_v14 = vor.u32 %v5756_v11, %v4170_v9  ;;  %v4012_v25 = vld [vmem:[%s9179_s7 + $0x18] sm:$0xf0]  ;;  %v4338_v9 = vld [vmem:[%s9181_s9 + $0xa0] sm:$0xf] }
 0x109   :  { %v206_v36 = vmax.f32 %v190_v28, 0.0  ;;  %v5734_v28 = vld [vmem:[%s9179_s7 + $0xac] sm:$0xf] }
 0x10a   :  { %v4095_v31 = vor.u32 %v5734_v28, %v4092_v29  ;;  %v4156_v28 = vld [vmem:[%s9179_s7 + $0x138] sm:$0xf0]  ;;  %v4015_v29 = vor.u32 %v5714_v24, %v4012_v25 }
 0x10b   :  { %v208_v43 = vpack.c.bf16 %v206_v36, %v206_v36  ;;  %v5732_v36 = vld [vmem:[%s9179_s7 + $0x94] sm:$0xf0] }
 0x10c   :  { %v202_v48 = vpop.f32.mrf.mxu2  ;;  %v4075_v38 = vor.u32 %v5732_v36, %v4074_v35  ;;  %v4140_v35 = vld [vmem:[%s9179_s7 + $0x118] sm:$0xf0] }
 0x10d   :  { %v203_v51 = vadd.f32 %v202_v48, %v97_v37  ;;  %416 = vmatmul.bf16.vlgmr.msra.gmra.mxu3 %v208_v43  ;;  %442 = vmatmul.bf16.vlgmr.msrb.gmra.mxu1 %v208_v43  ;;  %v4218_v37 = vld [vmem:[%s9179_s7 + $0x1a8] sm:$0xf]  ;;  %v4079_v43 = vor.u32 %v5730_v40, %v4076_v41  ;;  %v5728_v48 = vld [vmem:[%s9179_s7 + $0x74] sm:$0xf0]  ;;  %v4143_v36 = vor.u32 %v5746_v33, %v4140_v35  ;;  %v5827_v33 = vld [vmem:[%s9181_s9 + $0x18c] sm:$0xf0] }
 0x10e   :  { %v191_v55 = vpop.f32.mrf.mxu1  ;;  %910 = vmatpush.bf16.msra.mxu3 %v4123_v2  ;;  %936 = vmatpush.bf16.msrb.mxu1 %v4127_v4  ;;  %v4219_v42 = vor.u32 %v5768_v39, %v4218_v37  ;;  %v4059_v50 = vor.u32 %v5728_v48, %v4058_v47  ;;  %v5758_v4 = vld [vmem:[%s9179_s7 + $0x16c] sm:$0xf]  ;;  %v5807_v47 = vld [vmem:[%s9181_s9 + $0xec] sm:$0xf0]  ;;  %v4626_v48 = vld [vmem:[%s9181_s9 + $0x2e0] sm:$0xf] }
 0x10f   :  { %v207_v58 = vmax.f32 %v203_v51, 0.0  ;;  %v5764_v51 = vld [vmem:[%s9179_s7 + $0x194] sm:$0xf0]  ;;  %v4063_v55 = vor.u32 %v5726_v52, %v4060_v53  ;;  %v4191_v6 = vor.u32 %v5758_v4, %v4188_v5  ;;  %v4371_v53 = vor.u32 %v5807_v47, %v4370_v45  ;;  %v5791_v35 = vld [vmem:[%s9181_s9 + $0x6c] sm:$0xf0] }
 0x110   :  { %v4203_v54 = vor.u32 %v5764_v51, %v4202_v49  ;;  %v5871_v49 = vld [vmem:[%s9181_s9 + $0x2ec] sm:$0xf0] }
 0x111   :  { %v209_v61 = vpack.c.bf16 %v207_v58, %v207_v58  ;;  %v4207_v58 = vor.u32 %v5762_v56, %v4204_v57  ;;  %v4627_v56 = vor.u32 %v5871_v49, %v4626_v48  ;;  %v5823_v45 = vld [vmem:[%s9181_s9 + $0x16c] sm:$0xf0] }
 0x112   :  { %911 = vmatpush.bf16.msra.mxu3 %v4107_v13  ;;  %937 = vmatpush.bf16.msrb.mxu1 %v4111_v21  ;;  %v4028_v13 = vld [vmem:[%s9179_s7 + $0x38] sm:$0xf0]  ;;  %v4154_v21 = vld [vmem:[%s9179_s7 + $0x128] sm:$0xf]  ;;  %v5787_v47 = vld [vmem:[%s9181_s9 + $0x4c] sm:$0xf0] }
 0x113   :  { %429 = vmatmul.bf16.vlgmr.msrb.gmra.mxu0 %v209_v61  ;;  %455 = vmatmul.bf16.vlgmr.msrb.gmra.mxu2 %v209_v61  ;;  %v4186_v61 = vld [vmem:[%s9179_s7 + $0x168] sm:$0xf]  ;;  %v4031_v15 = vor.u32 %v5718_v12, %v4028_v13  ;;  %v4738_v13 = vld [vmem:[%s9181_s9 + $0x3c0] sm:$0xf] }
 0x114   :  { %v204_v62 = vpop.f32.mrf.mxu2  ;;  %923 = vmatpush.bf16.msrb.mxu0 %v4251_v17  ;;  %949 = vmatpush.bf16.msrb.mxu2 %v4255_v22  ;;  %v4187_v2 = vor.u32 %v5760_v63, %v4186_v61  ;;  %v4172_v17 = vld [vmem:[%s9179_s7 + $0x158] sm:$0xf0]  ;;  %v5752_v22 = vld [vmem:[%s9179_s7 + $0x134] sm:$0xf0]  ;;  %v4754_v61 = vld [vmem:[%s9181_s9 + $0x3e0] sm:$0xf] }
 0x115   :  { %v4043_v62 = vor.u32 %v5724_v60, %v4042_v59  ;;  %v4175_v19 = vor.u32 %v5754_v16, %v4172_v17  ;;  %v4155_v27 = vor.u32 %v5752_v22, %v4154_v21  ;;  %v4354_v59 = vld [vmem:[%s9181_s9 + $0xc0] sm:$0xf]  ;;  %v5803_v60 = vld [vmem:[%s9181_s9 + $0xcc] sm:$0xf0]  ;;  %v4755_v11 = vor.u32 %v5903_v0, %v4754_v61 }
 0x116   :  { %912 = vmatpush.bf16.msra.mxu3 %v4091_v26  ;;  %938 = vmatpush.bf16.msrb.mxu1 %v4095_v31  ;;  %v5750_v26 = vld [vmem:[%s9179_s7 + $0x12c] sm:$0xf]  ;;  %v4138_v31 = vld [vmem:[%s9179_s7 + $0x108] sm:$0xf]  ;;  %v4355_v5 = vor.u32 %v5803_v60, %v4354_v59  ;;  %v5863_v16 = vld [vmem:[%s9181_s9 + $0x2ac] sm:$0xf0] }
 0x117   :  { %v5831_v21 = vld [vmem:[%s9181_s9 + $0x1ac] sm:$0xf0]  ;;  %v4322_v22 = vld [vmem:[%s9181_s9 + $0x80] sm:$0xf] }
 0x118   :  { %924 = vmatpush.bf16.msrb.mxu0 %v4235_v30  ;;  %950 = vmatpush.bf16.msrb.mxu2 %v4239_v34  ;;  %v4159_v30 = vor.u32 %v5750_v26, %v4156_v28  ;;  %v4139_v34 = vor.u32 %v5748_v32, %v4138_v31  ;;  %v4722_v26 = vld [vmem:[%s9181_s9 + $0x3a0] sm:$0xf] }
 0x119   :  { %v4578_v28 = vld [vmem:[%s9181_s9 + $0x280] sm:$0xf] }
 0x11a   :  { %913 = vmatpush.bf16.msra.mxu3 %v4075_v38  ;;  %939 = vmatpush.bf16.msrb.mxu1 %v4079_v43  ;;  %v242_v38 = vld [vmem:[%s9178_s6] sm:$0x3] }
 0x11b   :  { %v244_v39 = vperm.slane %v242_v38, 0  ;;  %v4450_v32 = vld [vmem:[%s9181_s9 + $0x180] sm:$0xf] }
 0x11c   :  { %925 = vmatpush.bf16.msrb.mxu0 %v4219_v42  ;;  %951 = vmatpush.bf16.msrb.mxu2 %v4223_v46  ;;  %v245_v42 = vperm.slane %v242_v38, 1  ;;  %v4706_v38 = vld [vmem:[%s9181_s9 + $0x380] sm:$0xf] }
 0x11d   :  { %v4274_v59 = vld [vmem:[%s9181_s9 + $0x20] sm:$0xf] }
 0x11e   :  { %914 = vmatpush.bf16.msra.mxu3 %v4059_v50  ;;  %940 = vmatpush.bf16.msrb.mxu1 %v4063_v55  ;;  %v5839_v55 = vld [vmem:[%s9181_s9 + $0x1ec] sm:$0xf0]  ;;  %v4530_v0 = vld [vmem:[%s9181_s9 + $0x220] sm:$0xf] }
 0x120   :  { %926 = vmatpush.bf16.msrb.mxu0 %v4203_v54  ;;  %952 = vmatpush.bf16.msrb.mxu2 %v4207_v58  ;;  %v4498_v54 = vld [vmem:[%s9181_s9 + $0x1e0] sm:$0xf] }
 0x121   :  { %v4499_v4 = vor.u32 %v5839_v55, %v4498_v54 }
 0x122   :  { %915 = vmatpush.bf16.msra.mxu3 %v4043_v62  ;;  %941 = vmatpush.bf16.msrb.mxu1 %v4047_v3 }
 0x124   :  { %927 = vmatpush.bf16.msrb.mxu0 %v4187_v2  ;;  %953 = vmatpush.bf16.msrb.mxu2 %v4191_v6  ;;  %v5867_v2 = vld [vmem:[%s9181_s9 + $0x2cc] sm:$0xf0]  ;;  %v4482_v6 = vld [vmem:[%s9181_s9 + $0x1c0] sm:$0xf] }
 0x125   :  { %v4611_v12 = vor.u32 %v5867_v2, %v4610_v1  ;;  %v4483_v18 = vor.u32 %v5835_v7, %v4482_v6  ;;  %v5847_v1 = vld [vmem:[%s9181_s9 + $0x22c] sm:$0xf0]  ;;  %v4258_v6 = vld [vmem:[%s9181_s9] sm:$0xf] }
 0x126   :  { %916 = vmatpush.bf16.msra.mxu3 %v4027_v10  ;;  %942 = vmatpush.bf16.msrb.mxu1 %v4031_v15  ;;  %v5799_v10 = vld [vmem:[%s9181_s9 + $0xac] sm:$0xf0]  ;;  %v4594_v15 = vld [vmem:[%s9181_s9 + $0x2a0] sm:$0xf] }
 0x127   :  { %v4595_v25 = vor.u32 %v5863_v16, %v4594_v15  ;;  %v5779_v7 = vld [vmem:[%s9181_s9 + $0xc] sm:$0xf0] }
 0x128   :  { %928 = vmatpush.bf16.msrb.mxu0 %v4171_v14  ;;  %954 = vmatpush.bf16.msrb.mxu2 %v4175_v19  ;;  %v5899_v14 = vld [vmem:[%s9181_s9 + $0x3cc] sm:$0xf0]  ;;  %v4339_v19 = vor.u32 %v5799_v10, %v4338_v9  ;;  %v4531_v10 = vor.u32 %v5847_v1, %v4530_v0  ;;  %v4259_v15 = vor.u32 %v5779_v7, %v4258_v6  ;;  %v4612_v0 = vld [vmem:[%s9181_s9 + $0x2d0] sm:$0xf0] }
 0x129   :  { %v4739_v24 = vor.u32 %v5899_v14, %v4738_v13  ;;  %v5879_v13 = vld [vmem:[%s9181_s9 + $0x32c] sm:$0xf0]  ;;  %v4740_v6 = vld [vmem:[%s9181_s9 + $0x3d0] sm:$0xf0] }
 0x12a   :  { %917 = vmatpush.bf16.msra.mxu3 %v4011_v23  ;;  %943 = vmatpush.bf16.msrb.mxu1 %v4015_v29  ;;  %v5795_v23 = vld [vmem:[%s9181_s9 + $0x8c] sm:$0xf0] }
 0x12b   :  { %v5859_v29 = vld [vmem:[%s9181_s9 + $0x28c] sm:$0xf0]  ;;  %v4323_v31 = vor.u32 %v5795_v23, %v4322_v22  ;;  %v5801_v22 = vld [vmem:[%s9181_s9 + $0xc4] sm:$0xf]  ;;  %v4356_v23 = vld [vmem:[%s9181_s9 + $0xd0] sm:$0xf0] }
 0x12c   :  { %929 = vmatpush.bf16.msrb.mxu0 %v4155_v27  ;;  %955 = vmatpush.bf16.msrb.mxu2 %v4159_v30  ;;  %v5895_v27 = vld [vmem:[%s9181_s9 + $0x3ac] sm:$0xf0]  ;;  %v4467_v30 = vor.u32 %v5831_v21, %v4466_v20  ;;  %v4500_v21 = vld [vmem:[%s9181_s9 + $0x1f0] sm:$0xf0] }
 0x130   :  { %930 = vmatpush.bf16.msrb.mxu0 %v4139_v34  ;;  %956 = vmatpush.bf16.msrb.mxu2 %v4143_v36  ;;  %v4306_v34 = vld [vmem:[%s9181_s9 + $0x60] sm:$0xf]  ;;  %v4723_v36 = vor.u32 %v5895_v27, %v4722_v26  ;;  %v4359_v26 = vor.u32 %v5801_v22, %v4356_v23  ;;  %v5833_v27 = vld [vmem:[%s9181_s9 + $0x1c4] sm:$0xf] }
 0x131   :  { %v5857_v22 = vld [vmem:[%s9181_s9 + $0x284] sm:$0xf] }
 0x18a   :  { %v443_v37 = vpop.f32.mrf.mxu1 }
 0x18b   :  { %v444_v50 = vadd.f32 %v443_v37, %v245_v42  ;;  %v4579_v37 = vor.u32 %v5859_v29, %v4578_v28  ;;  %v4451_v42 = vor.u32 %v5827_v33, %v4450_v32  ;;  %v4484_v28 = vld [vmem:[%s9181_s9 + $0x1d0] sm:$0xf0]  ;;  %v5797_v29 = vld [vmem:[%s9181_s9 + $0xa4] sm:$0xf] }
 0x18c   :  { %v5829_v33 = vld [vmem:[%s9181_s9 + $0x1a4] sm:$0xf] }
 0x190   :  { %v417_v40 = vpop.f32.mrf.mxu3  ;;  %v430_v41 = vpop.f32.mrf.mxu0 }
 0x191   :  { %v418_v43 = vadd.f32 %v417_v40, %v244_v39  ;;  %v5891_v39 = vld [vmem:[%s9181_s9 + $0x38c] sm:$0xf0]  ;;  %v4562_v40 = vld [vmem:[%s9181_s9 + $0x260] sm:$0xf] }
 0x192   :  { %v445_v44 = vpop.f32.mrf.mxu1  ;;  %v4707_v48 = vor.u32 %v5891_v39, %v4706_v38  ;;  %v5825_v39 = vld [vmem:[%s9181_s9 + $0x184] sm:$0xf] }
 0x193   :  { %v431_v46 = vadd.f32 %v430_v41, %v418_v43  ;;  %v5855_v41 = vld [vmem:[%s9181_s9 + $0x26c] sm:$0xf0]  ;;  %v4307_v43 = vor.u32 %v5791_v35, %v4306_v34  ;;  %v4434_v44 = vld [vmem:[%s9181_s9 + $0x160] sm:$0xf]  ;;  %v4468_v34 = vld [vmem:[%s9181_s9 + $0x1b0] sm:$0xf0] }
 0x194   :  { %v4563_v49 = vor.u32 %v5855_v41, %v4562_v40  ;;  %v4435_v54 = vor.u32 %v5823_v45, %v4434_v44  ;;  %v5793_v35 = vld [vmem:[%s9181_s9 + $0x84] sm:$0xf]  ;;  %v4452_v40 = vld [vmem:[%s9181_s9 + $0x190] sm:$0xf0] }
 0x195   :  { %v460_v51 = vmax.f32 %v431_v46, 0.0  ;;  %v4290_v46 = vld [vmem:[%s9181_s9 + $0x40] sm:$0xf]  ;;  %v4455_v41 = vor.u32 %v5825_v39, %v4452_v40  ;;  %v5789_v45 = vld [vmem:[%s9181_s9 + $0x64] sm:$0xf] }
 0x196   :  { %v456_v52 = vpop.f32.mrf.mxu2  ;;  %v4291_v55 = vor.u32 %v5787_v47, %v4290_v46  ;;  %v4308_v46 = vld [vmem:[%s9181_s9 + $0x70] sm:$0xf0]  ;;  %v5869_v47 = vld [vmem:[%s9181_s9 + $0x2e4] sm:$0xf] }
 0x197   :  { %v6948_v57 = vpack.c.bf16 %v460_v51, %v460_v51  ;;  %v457_v58 = vadd.f32 %v456_v52, %v444_v50  ;;  %v4690_v50 = vld [vmem:[%s9181_s9 + $0x360] sm:$0xf]  ;;  %v5887_v51 = vld [vmem:[%s9181_s9 + $0x36c] sm:$0xf0]  ;;  %v4548_v39 = vld [vmem:[%s9181_s9 + $0x250] sm:$0xf0] }
 0x198   :  { %v419_v62 = vpop.f32.mrf.mxu3  ;;  %v432_v63 = vpop.f32.mrf.mxu0  ;;  %v4546_v52 = vld [vmem:[%s9181_s9 + $0x240] sm:$0xf]  ;;  %v4691_v60 = vor.u32 %v5887_v51, %v4690_v50  ;;  %v5875_v51 = vld [vmem:[%s9181_s9 + $0x30c] sm:$0xf0] }
 0x199   :  { %v461_v3 = vmax.f32 %v457_v58, 0.0  ;;  %866 = vmatmul.bf16.vlgmr.msrb.gmra.mxu3 %v6948_v57  ;;  %892 = vmatmul.bf16.vlgmr.msra.gmra.mxu1 %v6948_v57  ;;  %v5819_v58 = vld [vmem:[%s9181_s9 + $0x14c] sm:$0xf0]  ;;  %v4674_v62 = vld [vmem:[%s9181_s9 + $0x340] sm:$0xf] }
 0x19a   :  { %1748 = vmatpush.bf16.msrb.mxu3 %v4371_v53  ;;  %1774 = vmatpush.bf16.msra.mxu1 %v4627_v56  ;;  %v5851_v53 = vld [vmem:[%s9181_s9 + $0x24c] sm:$0xf0]  ;;  %v4418_v56 = vld [vmem:[%s9181_s9 + $0x140] sm:$0xf] }
 0x19b   :  { %v6976_v8 = vpack.c.bf16 %v461_v3, %v461_v3  ;;  %v4547_v61 = vor.u32 %v5851_v53, %v4546_v52  ;;  %v5883_v63 = vld [vmem:[%s9181_s9 + $0x34c] sm:$0xf0]  ;;  %v4419_v2 = vor.u32 %v5819_v58, %v4418_v56  ;;  %v4642_v50 = vld [vmem:[%s9181_s9 + $0x300] sm:$0xf]  ;;  %v5901_v56 = vld [vmem:[%s9181_s9 + $0x3e4] sm:$0xf] }
 0x19c   :  { %v4675_v9 = vor.u32 %v5883_v63, %v4674_v62  ;;  %v4643_v53 = vor.u32 %v5875_v51, %v4642_v50  ;;  %v5865_v62 = vld [vmem:[%s9181_s9 + $0x2c4] sm:$0xf]  ;;  %v4516_v51 = vld [vmem:[%s9181_s9 + $0x210] sm:$0xf0] }
 0x19d   :  { %879 = vmatmul.bf16.vlgmr.msra.gmra.mxu0 %v6976_v8  ;;  %905 = vmatmul.bf16.vlgmr.msra.gmra.mxu2 %v6976_v8  ;;  %v4615_v1 = vor.u32 %v5865_v62, %v4612_v0  ;;  %v5841_v50 = vld [vmem:[%s9181_s9 + $0x204] sm:$0xf] }
 0x19e   :  { %v458_v17 = vpop.f32.mrf.mxu2  ;;  %1761 = vmatpush.bf16.msra.mxu0 %v4499_v4  ;;  %1749 = vmatpush.bf16.msrb.mxu3 %v4355_v5  ;;  %v4402_v4 = vld [vmem:[%s9181_s9 + $0x120] sm:$0xf]  ;;  %v5815_v5 = vld [vmem:[%s9181_s9 + $0x12c] sm:$0xf0] }
 0x19f   :  { %1787 = vmatpush.bf16.msra.mxu2 %v4755_v11  ;;  %1775 = vmatpush.bf16.msra.mxu1 %v4611_v12  ;;  %v4372_v11 = vld [vmem:[%s9181_s9 + $0xf0] sm:$0xf0]  ;;  %v4658_v12 = vld [vmem:[%s9181_s9 + $0x320] sm:$0xf]  ;;  %v4403_v14 = vor.u32 %v5815_v5, %v4402_v4  ;;  %v5897_v4 = vld [vmem:[%s9181_s9 + $0x3c4] sm:$0xf] }
 0x1a0   :  { %v4386_v17 = vld [vmem:[%s9181_s9 + $0x100] sm:$0xf]  ;;  %v4659_v20 = vor.u32 %v5879_v13, %v4658_v12  ;;  %v4743_v7 = vor.u32 %v5897_v4, %v4740_v6  ;;  %v4596_v12 = vld [vmem:[%s9181_s9 + $0x2b0] sm:$0xf0] }
 0x1a2   :  { %1762 = vmatpush.bf16.msra.mxu0 %v4483_v18  ;;  %1750 = vmatpush.bf16.msrb.mxu3 %v4339_v19  ;;  %v5811_v18 = vld [vmem:[%s9181_s9 + $0x10c] sm:$0xf0]  ;;  %v5837_v19 = vld [vmem:[%s9181_s9 + $0x1e4] sm:$0xf] }
 0x1a3   :  { %1788 = vmatpush.bf16.msra.mxu2 %v4739_v24  ;;  %1776 = vmatpush.bf16.msra.mxu1 %v4595_v25  ;;  %v4387_v24 = vor.u32 %v5811_v18, %v4386_v17  ;;  %v4503_v25 = vor.u32 %v5837_v19, %v4500_v21  ;;  %v4724_v18 = vld [vmem:[%s9181_s9 + $0x3b0] sm:$0xf0] }
 0x1a4   :  { %v4260_v21 = vld [vmem:[%s9181_s9 + $0x10] sm:$0xf0] }
 0x1a6   :  { %1763 = vmatpush.bf16.msra.mxu0 %v4467_v30  ;;  %1751 = vmatpush.bf16.msrb.mxu3 %v4323_v31  ;;  %v4340_v30 = vld [vmem:[%s9181_s9 + $0xb0] sm:$0xf0]  ;;  %v4487_v31 = vor.u32 %v5833_v27, %v4484_v28  ;;  %v5889_v28 = vld [vmem:[%s9181_s9 + $0x384] sm:$0xf] }
 0x1a7   :  { %1789 = vmatpush.bf16.msra.mxu2 %v4723_v36  ;;  %1777 = vmatpush.bf16.msra.mxu1 %v4579_v37  ;;  %v4343_v32 = vor.u32 %v5797_v29, %v4340_v30  ;;  %v4324_v36 = vld [vmem:[%s9181_s9 + $0x90] sm:$0xf0]  ;;  %v4471_v37 = vor.u32 %v5829_v33, %v4468_v34 }
 0x1a8   :  { %v4327_v38 = vor.u32 %v5793_v35, %v4324_v36  ;;  %v4388_v27 = vld [vmem:[%s9181_s9 + $0x110] sm:$0xf0]  ;;  %v5885_v35 = vld [vmem:[%s9181_s9 + $0x364] sm:$0xf] }
 0x1a9   :  { %918 = vmatmul.bf16.vlgmr.msra.gmra.mxu3 %v6948_v57  ;;  %944 = vmatmul.bf16.vlgmr.msrb.gmra.mxu1 %v6948_v57  ;;  %v5783_v57 = vld [vmem:[%s9181_s9 + $0x2c] sm:$0xf0]  ;;  %v4708_v30 = vld [vmem:[%s9181_s9 + $0x390] sm:$0xf0] }
 0x1aa   :  { %1764 = vmatpush.bf16.msra.mxu0 %v4451_v42  ;;  %1752 = vmatpush.bf16.msrb.mxu3 %v4307_v43  ;;  %v4275_v3 = vor.u32 %v5783_v57, %v4274_v59  ;;  %v4514_v42 = vld [vmem:[%s9181_s9 + $0x200] sm:$0xf]  ;;  %v5843_v43 = vld [vmem:[%s9181_s9 + $0x20c] sm:$0xf0]  ;;  %v4756_v59 = vld [vmem:[%s9181_s9 + $0x3f0] sm:$0xf0] }
 0x1ab   :  { %1790 = vmatpush.bf16.msra.mxu2 %v4707_v48  ;;  %1778 = vmatpush.bf16.msra.mxu1 %v4563_v49  ;;  %v4515_v44 = vor.u32 %v5843_v43, %v4514_v42  ;;  %v4311_v48 = vor.u32 %v5789_v45, %v4308_v46  ;;  %v4628_v49 = vld [vmem:[%s9181_s9 + $0x2f0] sm:$0xf0]  ;;  %v4759_v57 = vor.u32 %v5901_v56, %v4756_v59 }
 0x1ac   :  { %v4631_v52 = vor.u32 %v5869_v47, %v4628_v49  ;;  %v4564_v33 = vld [vmem:[%s9181_s9 + $0x270] sm:$0xf0]  ;;  %v5877_v47 = vld [vmem:[%s9181_s9 + $0x324] sm:$0xf] }
 0x1ad   :  { %931 = vmatmul.bf16.vlgmr.msrb.gmra.mxu0 %v6976_v8  ;;  %957 = vmatmul.bf16.vlgmr.msrb.gmra.mxu2 %v6976_v8  ;;  %v5805_v8 = vld [vmem:[%s9181_s9 + $0xe4] sm:$0xf]  ;;  %v4692_v36 = vld [vmem:[%s9181_s9 + $0x370] sm:$0xf0] }
 0x1ae   :  { %1765 = vmatpush.bf16.msra.mxu0 %v4435_v54  ;;  %1753 = vmatpush.bf16.msrb.mxu3 %v4291_v55  ;;  %v4375_v16 = vor.u32 %v5805_v8, %v4372_v11  ;;  %v5821_v54 = vld [vmem:[%s9181_s9 + $0x164] sm:$0xf]  ;;  %v4436_v55 = vld [vmem:[%s9181_s9 + $0x170] sm:$0xf0] }
 0x1af   :  { %1791 = vmatpush.bf16.msra.mxu2 %v4691_v60  ;;  %1779 = vmatpush.bf16.msra.mxu1 %v4547_v61  ;;  %v4439_v58 = vor.u32 %v5821_v54, %v4436_v55  ;;  %v5785_v60 = vld [vmem:[%s9181_s9 + $0x44] sm:$0xf]  ;;  %v4292_v61 = vld [vmem:[%s9181_s9 + $0x50] sm:$0xf0] }
 0x1b0   :  { %v4295_v63 = vor.u32 %v5785_v60, %v4292_v61  ;;  %v5781_v8 = vld [vmem:[%s9181_s9 + $0x24] sm:$0xf]  ;;  %v4676_v42 = vld [vmem:[%s9181_s9 + $0x350] sm:$0xf0] }
 0x1b1   :  { %v4532_v45 = vld [vmem:[%s9181_s9 + $0x230] sm:$0xf0] }
 0x1b2   :  { %1766 = vmatpush.bf16.msra.mxu0 %v4419_v2  ;;  %1754 = vmatpush.bf16.msrb.mxu3 %v4275_v3  ;;  %v5817_v2 = vld [vmem:[%s9181_s9 + $0x144] sm:$0xf]  ;;  %v4420_v3 = vld [vmem:[%s9181_s9 + $0x150] sm:$0xf0] }
 0x1b3   :  { %1792 = vmatpush.bf16.msra.mxu2 %v4675_v9  ;;  %1780 = vmatpush.bf16.msra.mxu1 %v4531_v10  ;;  %v4423_v5 = vor.u32 %v5817_v2, %v4420_v3  ;;  %v4276_v9 = vld [vmem:[%s9181_s9 + $0x30] sm:$0xf0]  ;;  %v5861_v10 = vld [vmem:[%s9181_s9 + $0x2a4] sm:$0xf]  ;;  %v4378_v2 = vld [vmem:[%s9181_s9 + $0xe8] sm:$0xf] }
 0x1b4   :  { %v4279_v11 = vor.u32 %v5781_v8, %v4276_v9  ;;  %v4599_v13 = vor.u32 %v5861_v10, %v4596_v12  ;;  %v4644_v54 = vld [vmem:[%s9181_s9 + $0x310] sm:$0xf0]  ;;  %v5808_v3 = vld [vmem:[%s9181_s9 + $0xf4] sm:$0xf0] }
 0x1b5   :  { %v5840_v8 = vld [vmem:[%s9181_s9 + $0x1f4] sm:$0xf0]  ;;  %v4379_v10 = vor.u32 %v5808_v3, %v4378_v2  ;;  %v4426_v3 = vld [vmem:[%s9181_s9 + $0x148] sm:$0xf] }
 0x1b6   :  { %1767 = vmatpush.bf16.msra.mxu0 %v4403_v14  ;;  %1755 = vmatpush.bf16.msrb.mxu3 %v4259_v15  ;;  %v5813_v14 = vld [vmem:[%s9181_s9 + $0x124] sm:$0xf]  ;;  %v4404_v15 = vld [vmem:[%s9181_s9 + $0x130] sm:$0xf0] }
 0x1b7   :  { %1793 = vmatpush.bf16.msra.mxu2 %v4659_v20  ;;  %1781 = vmatpush.bf16.msra.mxu1 %v4515_v44  ;;  %v4407_v17 = vor.u32 %v5813_v14, %v4404_v15  ;;  %v5777_v20 = vld [vmem:[%s9181_s9 + $0x4] sm:$0xf]  ;;  %v5804_v14 = vld [vmem:[%s9181_s9 + $0xd4] sm:$0xf0] }
 0x1b8   :  { %v4263_v23 = vor.u32 %v5777_v20, %v4260_v21  ;;  %v5845_v44 = vld [vmem:[%s9181_s9 + $0x224] sm:$0xf] }
 0x1b9   :  { %v4535_v46 = vor.u32 %v5845_v44, %v4532_v45  ;;  %v5792_v44 = vld [vmem:[%s9181_s9 + $0x74] sm:$0xf0]  ;;  %v4634_v45 = vld [vmem:[%s9181_s9 + $0x2e8] sm:$0xf] }
 0x1ba   :  { %1800 = vmatpush.bf16.msra.mxu3 %v4375_v16  ;;  %1768 = vmatpush.bf16.msra.mxu0 %v4387_v24  ;;  %v5893_v16 = vld [vmem:[%s9181_s9 + $0x3a4] sm:$0xf]  ;;  %v4580_v24 = vld [vmem:[%s9181_s9 + $0x290] sm:$0xf0] }
 0x1bb   :  { %1826 = vmatpush.bf16.msrb.mxu1 %v4631_v52  ;;  %1794 = vmatpush.bf16.msra.mxu2 %v4643_v53  ;;  %v4727_v19 = vor.u32 %v5893_v16, %v4724_v18  ;;  %v4519_v52 = vor.u32 %v5841_v50, %v4516_v51  ;;  %v5873_v53 = vld [vmem:[%s9181_s9 + $0x304] sm:$0xf]  ;;  %v4490_v18 = vld [vmem:[%s9181_s9 + $0x1c8] sm:$0xf]  ;;  %v5824_v50 = vld [vmem:[%s9181_s9 + $0x174] sm:$0xf0] }
 0x1bc   :  { %v4647_v55 = vor.u32 %v5873_v53, %v4644_v54  ;;  %v4762_v53 = vld [vmem:[%s9181_s9 + $0x3e8] sm:$0xf]  ;;  %v5904_v54 = vld [vmem:[%s9181_s9 + $0x3f4] sm:$0xf0] }
 0x1bd   :  { %v4763_v2 = vor.u32 %v5904_v54, %v4762_v53  ;;  %v4492_v53 = vld [vmem:[%s9181_s9 + $0x1d8] sm:$0xf0] }
 0x1be   :  { %1813 = vmatpush.bf16.msrb.mxu0 %v4503_v25  ;;  %1801 = vmatpush.bf16.msra.mxu3 %v4359_v26  ;;  %v4583_v25 = vor.u32 %v5857_v22, %v4580_v24  ;;  %v5809_v26 = vld [vmem:[%s9181_s9 + $0x104] sm:$0xf]  ;;  %v4346_v22 = vld [vmem:[%s9181_s9 + $0xa8] sm:$0xf] }
 0x1bf   :  { %1839 = vmatpush.bf16.msrb.mxu2 %v4759_v57  ;;  %1827 = vmatpush.bf16.msrb.mxu1 %v4615_v1  ;;  %v4391_v29 = vor.u32 %v5809_v26, %v4388_v27  ;;  %v4474_v27 = vld [vmem:[%s9181_s9 + $0x1a8] sm:$0xf] }
 0x1c2   :  { %1814 = vmatpush.bf16.msrb.mxu0 %v4487_v31  ;;  %1802 = vmatpush.bf16.msra.mxu3 %v4343_v32  ;;  %v4711_v31 = vor.u32 %v5889_v28, %v4708_v30  ;;  %v5853_v32 = vld [vmem:[%s9181_s9 + $0x264] sm:$0xf]  ;;  %v5832_v28 = vld [vmem:[%s9181_s9 + $0x1b4] sm:$0xf0] }
 0x1c3   :  { %1840 = vmatpush.bf16.msrb.mxu2 %v4743_v7  ;;  %1828 = vmatpush.bf16.msrb.mxu1 %v4599_v13  ;;  %v4567_v34 = vor.u32 %v5853_v32, %v4564_v33  ;;  %v4506_v7 = vld [vmem:[%s9181_s9 + $0x1e8] sm:$0xf]  ;;  %v5796_v33 = vld [vmem:[%s9181_s9 + $0x94] sm:$0xf0] }
 0x1c4   :  { %v4362_v13 = vld [vmem:[%s9181_s9 + $0xc8] sm:$0xf]  ;;  %v4507_v16 = vor.u32 %v5840_v8, %v4506_v7  ;;  %v5900_v7 = vld [vmem:[%s9181_s9 + $0x3d4] sm:$0xf0] }
 0x1c5   :  { %v4363_v21 = vor.u32 %v5804_v14, %v4362_v13  ;;  %v4330_v32 = vld [vmem:[%s9181_s9 + $0x88] sm:$0xf]  ;;  %v5864_v14 = vld [vmem:[%s9181_s9 + $0x2b4] sm:$0xf0] }
 0x1c6   :  { %1815 = vmatpush.bf16.msrb.mxu0 %v4471_v37  ;;  %1803 = vmatpush.bf16.msra.mxu3 %v4327_v38  ;;  %v4695_v37 = vor.u32 %v5885_v35, %v4692_v36  ;;  %v5849_v38 = vld [vmem:[%s9181_s9 + $0x244] sm:$0xf]  ;;  %v4475_v35 = vor.u32 %v5832_v28, %v4474_v27  ;;  %v4602_v13 = vld [vmem:[%s9181_s9 + $0x2a8] sm:$0xf]  ;;  %v5860_v28 = vld [vmem:[%s9181_s9 + $0x294] sm:$0xf0] }
 0x1c7   :  { %1841 = vmatpush.bf16.msrb.mxu2 %v4727_v19  ;;  %1829 = vmatpush.bf16.msrb.mxu1 %v4583_v25  ;;  %v4551_v40 = vor.u32 %v5849_v38, %v4548_v39  ;;  %v5836_v19 = vld [vmem:[%s9181_s9 + $0x1d4] sm:$0xf0]  ;;  %v4586_v27 = vld [vmem:[%s9181_s9 + $0x288] sm:$0xf] }
 0x1c8   :  { %v4491_v25 = vor.u32 %v5836_v19, %v4490_v18  ;;  %v5828_v38 = vld [vmem:[%s9181_s9 + $0x194] sm:$0xf0]  ;;  %v4410_v19 = vld [vmem:[%s9181_s9 + $0x128] sm:$0xf] }
 0x1ca   :  { %1816 = vmatpush.bf16.msrb.mxu0 %v4455_v41  ;;  %1804 = vmatpush.bf16.msra.mxu3 %v4311_v48  ;;  %v5881_v41 = vld [vmem:[%s9181_s9 + $0x344] sm:$0xf]  ;;  %v4660_v48 = vld [vmem:[%s9181_s9 + $0x330] sm:$0xf0] }
 0x1cb   :  { %1842 = vmatpush.bf16.msrb.mxu2 %v4711_v31  ;;  %1830 = vmatpush.bf16.msrb.mxu1 %v4567_v34  ;;  %v4679_v43 = vor.u32 %v5881_v41, %v4676_v42  ;;  %v4663_v49 = vor.u32 %v5877_v47, %v4660_v48  ;;  %v4314_v41 = vld [vmem:[%s9181_s9 + $0x68] sm:$0xf] }
 0x1ce   :  { %1817 = vmatpush.bf16.msrb.mxu0 %v4439_v58  ;;  %1805 = vmatpush.bf16.msra.mxu3 %v4295_v63  ;;  %v528_v58 = vld [vmem:[%s9180_s8] sm:$0xf] }
 0x1cf   :  { %1843 = vmatpush.bf16.msrb.mxu2 %v4695_v37  ;;  %1831 = vmatpush.bf16.msrb.mxu1 %v4551_v40  ;;  %v530_v59 = vperm.slane %v528_v58, 0  ;;  %v531_v60 = vperm.slane %v528_v58, 1  ;;  %v532_v26 = vperm.slane %v528_v58, 2  ;;  %v533_v31 = vperm.slane %v528_v58, 3  ;;  %v4458_v37 = vld [vmem:[%s9181_s9 + $0x188] sm:$0xf] }
 0x1d0   :  { %v4331_v40 = vor.u32 %v5796_v33, %v4330_v32  ;;  %v4459_v48 = vor.u32 %v5828_v38, %v4458_v37  ;;  %v4380_v32 = vld [vmem:[%s9181_s9 + $0xf8] sm:$0xf0]  ;;  %v4394_v33 = vld [vmem:[%s9181_s9 + $0x108] sm:$0xf]  ;;  %v4587_v38 = vor.u32 %v5860_v28, %v4586_v27  ;;  %v5876_v28 = vld [vmem:[%s9181_s9 + $0x314] sm:$0xf0] }
 0x1d1   :  { %v4650_v27 = vld [vmem:[%s9181_s9 + $0x308] sm:$0xf] }
 0x1d2   :  { %1818 = vmatpush.bf16.msrb.mxu0 %v4423_v5  ;;  %1806 = vmatpush.bf16.msra.mxu3 %v4279_v11 }
 0x1d3   :  { %1844 = vmatpush.bf16.msrb.mxu2 %v4679_v43  ;;  %1832 = vmatpush.bf16.msrb.mxu1 %v4535_v46  ;;  %v5872_v46 = vld [vmem:[%s9181_s9 + $0x2f4] sm:$0xf0] }
 0x1d4   :  { %v4635_v58 = vor.u32 %v5872_v46, %v4634_v45  ;;  %v5802_v46 = vld [vmem:[%s9181_s9 + $0xcc] sm:$0xf] }
 0x1d6   :  { %1819 = vmatpush.bf16.msrb.mxu0 %v4407_v17  ;;  %1807 = vmatpush.bf16.msra.mxu3 %v4263_v23  ;;  %v5800_v23 = vld [vmem:[%s9181_s9 + $0xb4] sm:$0xf0] }
 0x1d7   :  { %1845 = vmatpush.bf16.msrb.mxu2 %v4663_v49  ;;  %1833 = vmatpush.bf16.msrb.mxu1 %v4519_v52  ;;  %v4347_v30 = vor.u32 %v5800_v23, %v4346_v22  ;;  %v4442_v49 = vld [vmem:[%s9181_s9 + $0x168] sm:$0xf]  ;;  %v5896_v22 = vld [vmem:[%s9181_s9 + $0x3b4] sm:$0xf0] }
 0x1da   :  { %1820 = vmatpush.bf16.msrb.mxu0 %v4391_v29 }
 0x1db   :  { %1846 = vmatpush.bf16.msrb.mxu2 %v4647_v55 }
 0x216   :  { %v893_v56 = vpop.f32.mrf.mxu1 }
 0x217   :  { %v894_v0 = vadd.f32 %v893_v56, %v531_v60  ;;  %v4315_v56 = vor.u32 %v5792_v44, %v4314_v41 }
 0x21a   :  { %v880_v57 = vpop.f32.mrf.mxu0 }
 0x21c   :  { %v867_v61 = vpop.f32.mrf.mxu3 }
 0x21d   :  { %v868_v62 = vadd.f32 %v867_v61, %v530_v59  ;;  %v4298_v59 = vld [vmem:[%s9181_s9 + $0x48] sm:$0xf] }
 0x21e   :  { %v895_v63 = vpop.f32.mrf.mxu1 }
 0x21f   :  { %v881_v1 = vadd.f32 %v880_v57, %v868_v62  ;;  %v5788_v57 = vld [vmem:[%s9181_s9 + $0x54] sm:$0xf0]  ;;  %v4618_v62 = vld [vmem:[%s9181_s9 + $0x2c8] sm:$0xf] }
 0x220   :  { %v906_v4 = vpop.f32.mrf.mxu2  ;;  %v5868_v63 = vld [vmem:[%s9181_s9 + $0x2d4] sm:$0xf0]  ;;  %v4299_v8 = vor.u32 %v5788_v57, %v4298_v59  ;;  %v5798_v59 = vld [vmem:[%s9181_s9 + $0xac] sm:$0xf]  ;;  %v4348_v57 = vld [vmem:[%s9181_s9 + $0xb8] sm:$0xf0] }
 0x221   :  { %v962_v5 = vmax.f32 %v881_v1, 0.0  ;;  %v907_v6 = vadd.f32 %v906_v4, %v894_v0  ;;  %v4443_v1 = vor.u32 %v5824_v50, %v4442_v49  ;;  %v4698_v49 = vld [vmem:[%s9181_s9 + $0x368] sm:$0xf]  ;;  %v5888_v50 = vld [vmem:[%s9181_s9 + $0x374] sm:$0xf0] }
 0x222   :  { %v882_v9 = vpop.f32.mrf.mxu0 }
 0x223   :  { %v7341_v11 = vpack.c.bf16 %v962_v5, %v962_v5  ;;  %v963_v12 = vmax.f32 %v907_v6, 0.0  ;;  %v5820_v5 = vld [vmem:[%s9181_s9 + $0x154] sm:$0xf0]  ;;  %v4746_v6 = vld [vmem:[%s9181_s9 + $0x3c8] sm:$0xf]  ;;  %v4619_v9 = vor.u32 %v5868_v63, %v4618_v62 }
 0x224   :  { %v869_v15 = vpop.f32.mrf.mxu3  ;;  %v4747_v18 = vor.u32 %v5900_v7, %v4746_v6  ;;  %v4682_v62 = vld [vmem:[%s9181_s9 + $0x348] sm:$0xf]  ;;  %v5884_v63 = vld [vmem:[%s9181_s9 + $0x354] sm:$0xf0] }
 0x225   :  { %v7349_v17 = vpack.c.bf16 %v963_v12, %v963_v12  ;;  %1756 = vmatmul.bf16.vlgmr.msrb.gmra.mxu3 %v7341_v11  ;;  %v5784_v12 = vld [vmem:[%s9181_s9 + $0x34] sm:$0xf0]  ;;  %v4683_v7 = vor.u32 %v5884_v63, %v4682_v62  ;;  %v5778_v62 = vld [vmem:[%s9181_s9 + $0xc] sm:$0xf]  ;;  %v4268_v63 = vld [vmem:[%s9181_s9 + $0x18] sm:$0xf0] }
 0x226   :  { %1852 = vmatpush.bf16.msrb.mxu3 %v4379_v10  ;;  %v945_v20 = vpop.f32.mrf.mxu1  ;;  %v4282_v10 = vld [vmem:[%s9181_s9 + $0x28] sm:$0xf]  ;;  %v5848_v6 = vld [vmem:[%s9181_s9 + $0x234] sm:$0xf0] }
 0x227   :  { %1769 = vmatmul.bf16.vlgmr.msra.gmra.mxu0 %v7349_v17  ;;  %v946_v42 = vadd.f32 %v945_v20, %v533_v31  ;;  %v5816_v20 = vld [vmem:[%s9181_s9 + $0x134] sm:$0xf0]  ;;  %v4283_v23 = vor.u32 %v5784_v12, %v4282_v10  ;;  %v5806_v31 = vld [vmem:[%s9181_s9 + $0xec] sm:$0xf]  ;;  %v4666_v12 = vld [vmem:[%s9181_s9 + $0x328] sm:$0xf] }
 0x228   :  { %1865 = vmatpush.bf16.msra.mxu0 %v4507_v16  ;;  %v908_v24 = vpop.f32.mrf.mxu2  ;;  %v4427_v16 = vor.u32 %v5820_v5, %v4426_v3  ;;  %v4383_v41 = vor.u32 %v5806_v31, %v4380_v32  ;;  %v4351_v3 = vor.u32 %v5798_v59, %v4348_v57  ;;  %v4538_v5 = vld [vmem:[%s9181_s9 + $0x228] sm:$0xf]  ;;  %v4444_v31 = vld [vmem:[%s9181_s9 + $0x178] sm:$0xf0]  ;;  %v5902_v32 = vld [vmem:[%s9181_s9 + $0x3ec] sm:$0xf] }
 0x229   :  { %v4603_v24 = vor.u32 %v5864_v14, %v4602_v13  ;;  %v5880_v13 = vld [vmem:[%s9181_s9 + $0x334] sm:$0xf0]  ;;  %v4539_v14 = vor.u32 %v5848_v6, %v4538_v5  ;;  %v4732_v59 = vld [vmem:[%s9181_s9 + $0x3b8] sm:$0xf0]  ;;  %v5810_v5 = vld [vmem:[%s9181_s9 + $0x10c] sm:$0xf] }
 0x22a   :  { %1853 = vmatpush.bf16.msrb.mxu3 %v4363_v21  ;;  %v932_v29 = vpop.f32.mrf.mxu0  ;;  %v4730_v21 = vld [vmem:[%s9181_s9 + $0x3a8] sm:$0xf] }
 0x22b   :  { %v4966_v6 = vld [vmem:[%s9183_s11 + $0x188] sm:$0xf] }
 0x22c   :  { %1866 = vmatpush.bf16.msra.mxu0 %v4491_v25  ;;  %v919_v34 = vpop.f32.mrf.mxu3  ;;  %v4266_v25 = vld [vmem:[%s9181_s9 + $0x8] sm:$0xf] }
 0x22d   :  { %v920_v36 = vadd.f32 %v919_v34, %v532_v26  ;;  %v5780_v26 = vld [vmem:[%s9181_s9 + $0x14] sm:$0xf0] }
 0x22e   :  { %1854 = vmatpush.bf16.msrb.mxu3 %v4347_v30  ;;  %v947_v39 = vpop.f32.mrf.mxu1  ;;  %v4731_v30 = vor.u32 %v5896_v22, %v4730_v21  ;;  %v5812_v34 = vld [vmem:[%s9181_s9 + $0x114] sm:$0xf0]  ;;  %v4267_v37 = vor.u32 %v5780_v26, %v4266_v25  ;;  %v5790_v21 = vld [vmem:[%s9181_s9 + $0x6c] sm:$0xf]  ;;  %v4667_v22 = vor.u32 %v5880_v13, %v4666_v12  ;;  %v4636_v25 = vld [vmem:[%s9181_s9 + $0x2f8] sm:$0xf0]  ;;  %v4271_v12 = vor.u32 %v5778_v62, %v4268_v63 }
 0x22f   :  { %v933_v43 = vadd.f32 %v932_v29, %v920_v36  ;;  %v4411_v29 = vor.u32 %v5816_v20, %v4410_v19  ;;  %v5892_v36 = vld [vmem:[%s9181_s9 + $0x394] sm:$0xf0]  ;;  %v5838_v39 = vld [vmem:[%s9181_s9 + $0x1ec] sm:$0xf]  ;;  %v4395_v44 = vor.u32 %v5812_v34, %v4394_v33  ;;  %v4522_v19 = vld [vmem:[%s9181_s9 + $0x208] sm:$0xf] }
 0x230   :  { %1867 = vmatpush.bf16.msra.mxu0 %v4475_v35  ;;  %v958_v47 = vpop.f32.mrf.mxu2  ;;  %v4714_v35 = vld [vmem:[%s9181_s9 + $0x388] sm:$0xf]  ;;  %v5844_v20 = vld [vmem:[%s9181_s9 + $0x214] sm:$0xf0]  ;;  %v4764_v33 = vld [vmem:[%s9181_s9 + $0x3f8] sm:$0xf0] }
 0x231   :  { %v964_v51 = vmax.f32 %v933_v43, 0.0  ;;  %v959_v52 = vadd.f32 %v958_v47, %v946_v42  ;;  %v4570_v42 = vld [vmem:[%s9181_s9 + $0x268] sm:$0xf]  ;;  %v5856_v43 = vld [vmem:[%s9181_s9 + $0x274] sm:$0xf0]  ;;  %v4715_v45 = vor.u32 %v5892_v36, %v4714_v35 }
 0x232   :  { %1855 = vmatpush.bf16.msrb.mxu3 %v4331_v40  ;;  %v934_v55 = vpop.f32.mrf.mxu0  ;;  %v4508_v40 = vld [vmem:[%s9181_s9 + $0x1f8] sm:$0xf0]  ;;  %v5786_v36 = vld [vmem:[%s9181_s9 + $0x4c] sm:$0xf] }
 0x233   :  { %v7413_v60 = vpack.c.bf16 %v964_v51, %v964_v51  ;;  %v965_v61 = vmax.f32 %v959_v52, 0.0  ;;  %v4364_v47 = vld [vmem:[%s9181_s9 + $0xd8] sm:$0xf0]  ;;  %v4571_v51 = vor.u32 %v5856_v43, %v4570_v42  ;;  %v5834_v52 = vld [vmem:[%s9181_s9 + $0x1cc] sm:$0xf]  ;;  %v4767_v42 = vor.u32 %v5902_v32, %v4764_v33 }
 0x234   :  { %1868 = vmatpush.bf16.msra.mxu0 %v4459_v48  ;;  %v921_v0 = vpop.f32.mrf.mxu3  ;;  %v4511_v48 = vor.u32 %v5838_v39, %v4508_v40  ;;  %v4367_v54 = vor.u32 %v5802_v46, %v4364_v47  ;;  %v4554_v55 = vld [vmem:[%s9181_s9 + $0x248] sm:$0xf]  ;;  %v5866_v39 = vld [vmem:[%s9181_s9 + $0x2cc] sm:$0xf]  ;;  %v4620_v40 = vld [vmem:[%s9181_s9 + $0x2d8] sm:$0xf0] }
 0x235   :  { %v7424_v4 = vpack.c.bf16 %v965_v61, %v965_v61  ;;  %1782 = vmatmul.bf16.vlgmr.msra.gmra.mxu1 %v7413_v60  ;;  %1808 = vmatmul.bf16.vlgmr.msra.gmra.mxu3 %v7341_v11  ;;  %v4495_v61 = vor.u32 %v5834_v52, %v4492_v53  ;;  %v5818_v43 = vld [vmem:[%s9181_s9 + $0x14c] sm:$0xf]  ;;  %v4748_v46 = vld [vmem:[%s9181_s9 + $0x3d8] sm:$0xf0] }
 0x236   :  { %1856 = vmatpush.bf16.msrb.mxu3 %v4315_v56  ;;  %1878 = vmatpush.bf16.msra.mxu1 %v4635_v58  ;;  %v5852_v56 = vld [vmem:[%s9181_s9 + $0x254] sm:$0xf0]  ;;  %v4699_v58 = vor.u32 %v5888_v50, %v4698_v49  ;;  %v5782_v49 = vld [vmem:[%s9181_s9 + $0x2c] sm:$0xf]  ;;  %v4284_v50 = vld [vmem:[%s9181_s9 + $0x38] sm:$0xf0] }
 0x237   :  { %1795 = vmatmul.bf16.vlgmr.msra.gmra.mxu2 %v7424_v4  ;;  %1821 = vmatmul.bf16.vlgmr.msrb.gmra.mxu0 %v7349_v17  ;;  %v4555_v0 = vor.u32 %v5852_v56, %v4554_v55  ;;  %v4604_v52 = vld [vmem:[%s9181_s9 + $0x2b8] sm:$0xf0]  ;;  %v5814_v55 = vld [vmem:[%s9181_s9 + $0x12c] sm:$0xf]  ;;  %v4287_v57 = vor.u32 %v5782_v49, %v4284_v50  ;;  %v5106_v50 = vld [vmem:[%s9183_s11 + $0x2a0] sm:$0xf] }
 0x238   :  { %1869 = vmatpush.bf16.msra.mxu0 %v4443_v1  ;;  %1891 = vmatpush.bf16.msra.mxu2 %v4763_v2  ;;  %v960_v15 = vpop.f32.mrf.mxu2  ;;  %v5830_v1 = vld [vmem:[%s9181_s9 + $0x1ac] sm:$0xf]  ;;  %v4476_v2 = vld [vmem:[%s9181_s9 + $0x1b8] sm:$0xf0] }
 0x239   :  { %v4479_v10 = vor.u32 %v5830_v1, %v4476_v2  ;;  %v5826_v15 = vld [vmem:[%s9181_s9 + $0x18c] sm:$0xf]  ;;  %v4412_v56 = vld [vmem:[%s9181_s9 + $0x138] sm:$0xf0] }
 0x23a   :  { %1857 = vmatpush.bf16.msrb.mxu3 %v4299_v8  ;;  %1879 = vmatpush.bf16.msra.mxu1 %v4619_v9  ;;  %v5794_v8 = vld [vmem:[%s9181_s9 + $0x8c] sm:$0xf]  ;;  %v4332_v9 = vld [vmem:[%s9181_s9 + $0x98] sm:$0xf0]  ;;  %v4415_v2 = vor.u32 %v5814_v55, %v4412_v56  ;;  %v4854_v56 = vld [vmem:[%s9183_s11 + $0xa8] sm:$0xf] }
 0x23b   :  { %v4588_v1 = vld [vmem:[%s9181_s9 + $0x298] sm:$0xf0] }
 0x23c   :  { %1870 = vmatpush.bf16.msra.mxu0 %v4427_v16  ;;  %1892 = vmatpush.bf16.msra.mxu2 %v4747_v18  ;;  %v4460_v16 = vld [vmem:[%s9181_s9 + $0x198] sm:$0xf0]  ;;  %v4335_v18 = vor.u32 %v5794_v8, %v4332_v9  ;;  %v5890_v9 = vld [vmem:[%s9181_s9 + $0x38c] sm:$0xf] }
 0x23d   :  { %v4463_v26 = vor.u32 %v5826_v15, %v4460_v16  ;;  %v4396_v8 = vld [vmem:[%s9181_s9 + $0x118] sm:$0xf0]  ;;  %v6013_v15 = vld [vmem:[%s9183_s11 + $0x360] sm:$0xf0]  ;;  %v5854_v16 = vld [vmem:[%s9181_s9 + $0x26c] sm:$0xf] }
 0x23e   :  { %1858 = vmatpush.bf16.msrb.mxu3 %v4283_v23  ;;  %1880 = vmatpush.bf16.msra.mxu1 %v4603_v24  ;;  %v4316_v23 = vld [vmem:[%s9181_s9 + $0x78] sm:$0xf0]  ;;  %v5870_v24 = vld [vmem:[%s9181_s9 + $0x2ec] sm:$0xf] }
 0x23f   :  { %v4319_v34 = vor.u32 %v5790_v21, %v4316_v23  ;;  %v4639_v35 = vor.u32 %v5870_v24, %v4636_v25  ;;  %v5950_v23 = vld [vmem:[%s9183_s11 + $0x168] sm:$0xf0]  ;;  %v4700_v25 = vld [vmem:[%s9181_s9 + $0x378] sm:$0xf0] }
 0x240   :  { %1871 = vmatpush.bf16.msra.mxu0 %v4411_v29  ;;  %1893 = vmatpush.bf16.msra.mxu2 %v4731_v30  ;;  %v5822_v29 = vld [vmem:[%s9181_s9 + $0x16c] sm:$0xf]  ;;  %v4523_v30 = vor.u32 %v5844_v20, %v4522_v19  ;;  %v4399_v20 = vor.u32 %v5810_v5, %v4396_v8  ;;  %v4798_v5 = vld [vmem:[%s9183_s11 + $0x38] sm:$0xf]  ;;  %v4770_v8 = vld [vmem:[%s9183_s11] sm:$0xf] }
 0x241   :  { %v5886_v24 = vld [vmem:[%s9181_s9 + $0x36c] sm:$0xf] }
 0x242   :  { %1859 = vmatpush.bf16.msrb.mxu3 %v4267_v37  ;;  %1881 = vmatpush.bf16.msra.mxu1 %v4587_v38  ;;  %v4651_v37 = vor.u32 %v5876_v28, %v4650_v27  ;;  %v4300_v38 = vld [vmem:[%s9181_s9 + $0x58] sm:$0xf0]  ;;  %v5162_v28 = vld [vmem:[%s9183_s11 + $0x310] sm:$0xf]  ;;  %v4703_v33 = vor.u32 %v5886_v24, %v4700_v25  ;;  %v5978_v24 = vld [vmem:[%s9183_s11 + $0x248] sm:$0xf0] }
 0x243   :  { %v4303_v47 = vor.u32 %v5786_v36, %v4300_v38  ;;  %v5882_v36 = vld [vmem:[%s9181_s9 + $0x34c] sm:$0xf]  ;;  %v5386_v25 = vld [vmem:[%s9183_s11 + $0x4d0] sm:$0xf] }
 0x244   :  { %1872 = vmatpush.bf16.msra.mxu0 %v4395_v44  ;;  %1894 = vmatpush.bf16.msra.mxu2 %v4715_v45  ;;  %v4428_v44 = vld [vmem:[%s9181_s9 + $0x158] sm:$0xf0]  ;;  %v5898_v45 = vld [vmem:[%s9181_s9 + $0x3cc] sm:$0xf] }
 0x245   :  { %1834 = vmatmul.bf16.vlgmr.msrb.gmra.mxu1 %v7413_v60  ;;  %1860 = vmatmul.bf16.vlgmr.msrb.gmra.mxu3 %v7341_v11  ;;  %v4431_v53 = vor.u32 %v5818_v43, %v4428_v44 }
 0x246   :  { %1904 = vmatpush.bf16.msra.mxu3 %v4383_v41  ;;  %1882 = vmatpush.bf16.msra.mxu1 %v4571_v51  ;;  %v4447_v41 = vor.u32 %v5822_v29, %v4444_v31  ;;  %v5862_v51 = vld [vmem:[%s9181_s9 + $0x2ac] sm:$0xf]  ;;  %v4556_v31 = vld [vmem:[%s9181_s9 + $0x258] sm:$0xf0] }
 0x247   :  { %1847 = vmatmul.bf16.vlgmr.msrb.gmra.mxu2 %v7424_v4  ;;  %1873 = vmatmul.bf16.vlgmr.msra.gmra.mxu0 %v7349_v17  ;;  %v6006_v29 = vld [vmem:[%s9183_s11 + $0x328] sm:$0xf0] }
 0x248   :  { %1917 = vmatpush.bf16.msrb.mxu0 %v4511_v48  ;;  %1895 = vmatpush.bf16.msra.mxu2 %v4699_v58  ;;  %v4623_v48 = vor.u32 %v5866_v39, %v4620_v40  ;;  %v5894_v58 = vld [vmem:[%s9181_s9 + $0x3ac] sm:$0xf]  ;;  %v5163_v38 = vor.u32 %v6006_v29, %v5162_v28  ;;  %v5134_v40 = vld [vmem:[%s9183_s11 + $0x2d8] sm:$0xf]  ;;  %v5940_v28 = vld [vmem:[%s9183_s11 + $0x11c] sm:$0xf] }
 0x249   :  { %v4912_v29 = vld [vmem:[%s9183_s11 + $0x134] sm:$0xf0] }
 0x24a   :  { %1905 = vmatpush.bf16.msra.mxu3 %v4367_v54  ;;  %1883 = vmatpush.bf16.msra.mxu1 %v4555_v0  ;;  %v4751_v54 = vor.u32 %v5898_v45, %v4748_v46  ;;  %v5858_v0 = vld [vmem:[%s9181_s9 + $0x28c] sm:$0xf]  ;;  %v4882_v45 = vld [vmem:[%s9183_s11 + $0xe0] sm:$0xf] }
 0x24b   :  { %v4591_v13 = vor.u32 %v5858_v0, %v4588_v1  ;;  %v5878_v46 = vld [vmem:[%s9181_s9 + $0x32c] sm:$0xf]  ;;  %v4826_v1 = vld [vmem:[%s9183_s11 + $0x70] sm:$0xf] }
 0x24c   :  { %1918 = vmatpush.bf16.msrb.mxu0 %v4495_v61  ;;  %1896 = vmatpush.bf16.msra.mxu2 %v4683_v7  ;;  %v4607_v61 = vor.u32 %v5862_v51, %v4604_v52  ;;  %v5957_v7 = vld [vmem:[%s9183_s11 + $0x1a0] sm:$0xf0]  ;;  %v5992_v51 = vld [vmem:[%s9183_s11 + $0x2b8] sm:$0xf0]  ;;  %v5842_v52 = vld [vmem:[%s9181_s9 + $0x20c] sm:$0xf] }
 0x24d   :  { %v4967_v19 = vor.u32 %v5957_v7, %v4966_v6  ;;  %v5915_v6 = vld [vmem:[%s9183_s11 + $0x50] sm:$0xf0] }
 0x24e   :  { %1906 = vmatpush.bf16.msra.mxu3 %v4351_v3  ;;  %1884 = vmatpush.bf16.msra.mxu1 %v4539_v14  ;;  %v4735_v3 = vor.u32 %v5894_v58, %v4732_v59  ;;  %v5190_v14 = vld [vmem:[%s9183_s11 + $0x348] sm:$0xf]  ;;  %v5929_v58 = vld [vmem:[%s9183_s11 + $0xc0] sm:$0xf0]  ;;  %v5874_v59 = vld [vmem:[%s9181_s9 + $0x30c] sm:$0xf]  ;;  %v4799_v7 = vor.u32 %v5915_v6, %v4798_v5 }
 0x24f   :  { %v4855_v63 = vor.u32 %v5929_v58, %v4854_v56  ;;  %v6003_v56 = vld [vmem:[%s9183_s11 + $0x314] sm:$0xf]  ;;  %v5136_v5 = vld [vmem:[%s9183_s11 + $0x2f4] sm:$0xf0] }
 0x250   :  { %1919 = vmatpush.bf16.msrb.mxu0 %v4479_v10  ;;  %1897 = vmatpush.bf16.msra.mxu2 %v4667_v22  ;;  %v4716_v10 = vld [vmem:[%s9181_s9 + $0x398] sm:$0xf0]  ;;  %v4938_v22 = vld [vmem:[%s9183_s11 + $0x150] sm:$0xf] }
 0x251   :  { %v4719_v21 = vor.u32 %v5890_v9, %v4716_v10  ;;  %v4939_v32 = vor.u32 %v5950_v23, %v4938_v22  ;;  %v5908_v9 = vld [vmem:[%s9183_s11 + $0x18] sm:$0xf0]  ;;  %v5050_v23 = vld [vmem:[%s9183_s11 + $0x230] sm:$0xf] }
 0x252   :  { %1907 = vmatpush.bf16.msra.mxu3 %v4335_v18  ;;  %1885 = vmatpush.bf16.msra.mxu1 %v4523_v30  ;;  %v4572_v18 = vld [vmem:[%s9181_s9 + $0x278] sm:$0xf0]  ;;  %v5850_v30 = vld [vmem:[%s9181_s9 + $0x24c] sm:$0xf]  ;;  %v4771_v10 = vor.u32 %v5908_v9, %v4770_v8  ;;  %v6027_v8 = vld [vmem:[%s9183_s11 + $0x3d0] sm:$0xf0] }
 0x253   :  { %v4575_v27 = vor.u32 %v5854_v16, %v4572_v18  ;;  %v4559_v39 = vor.u32 %v5850_v30, %v4556_v31  ;;  %v6069_v18 = vld [vmem:[%s9183_s11 + $0x520] sm:$0xf0]  ;;  %v4915_v31 = vor.u32 %v5940_v28, %v4912_v29  ;;  %v5610_v29 = vld [vmem:[%s9183_s11 + $0x690] sm:$0xf] }
 0x254   :  { %1920 = vmatpush.bf16.msrb.mxu0 %v4463_v26  ;;  %1898 = vmatpush.bf16.msra.mxu2 %v4651_v37  ;;  %v5191_v26 = vor.u32 %v6013_v15, %v5190_v14  ;;  %v4684_v37 = vld [vmem:[%s9181_s9 + $0x358] sm:$0xf0]  ;;  %v5985_v14 = vld [vmem:[%s9183_s11 + $0x280] sm:$0xf0]  ;;  %v5414_v15 = vld [vmem:[%s9183_s11 + $0x508] sm:$0xf] }
 0x255   :  { %1886 = vmatmul.bf16.vlgmr.msra.gmra.mxu1 %v7413_v60  ;;  %v4687_v44 = vor.u32 %v5882_v36, %v4684_v37  ;;  %v6055_v36 = vld [vmem:[%s9183_s11 + $0x4b0] sm:$0xf0] }
 0x256   :  { %1908 = vmatpush.bf16.msra.mxu3 %v4319_v34  ;;  %1930 = vmatpush.bf16.msrb.mxu1 %v4639_v35  ;;  %v4910_v34 = vld [vmem:[%s9183_s11 + $0x118] sm:$0xf]  ;;  %v5943_v35 = vld [vmem:[%s9183_s11 + $0x130] sm:$0xf0] }
 0x257   :  { %1899 = vmatmul.bf16.vlgmr.msra.gmra.mxu2 %v7424_v4  ;;  %v4911_v43 = vor.u32 %v5943_v35, %v4910_v34  ;;  %v5358_v34 = vld [vmem:[%s9183_s11 + $0x498] sm:$0xf] }
 0x258   :  { %1921 = vmatpush.bf16.msrb.mxu0 %v4447_v41  ;;  %1943 = vmatpush.bf16.msrb.mxu2 %v4767_v42  ;;  %v5846_v41 = vld [vmem:[%s9181_s9 + $0x22c] sm:$0xf]  ;;  %v4540_v42 = vld [vmem:[%s9181_s9 + $0x238] sm:$0xf0]  ;;  %v5359_v37 = vor.u32 %v6055_v36, %v5358_v34  ;;  %v5388_v36 = vld [vmem:[%s9183_s11 + $0x4ec] sm:$0xf0] }
 0x259   :  { %v4543_v49 = vor.u32 %v5846_v41, %v4540_v42  ;;  %v5964_v41 = vld [vmem:[%s9183_s11 + $0x1d8] sm:$0xf0]  ;;  %v5330_v42 = vld [vmem:[%s9183_s11 + $0x460] sm:$0xf] }
 0x25a   :  { %1909 = vmatpush.bf16.msra.mxu3 %v4303_v47  ;;  %1931 = vmatpush.bf16.msrb.mxu1 %v4623_v48  ;;  %v4668_v47 = vld [vmem:[%s9181_s9 + $0x338] sm:$0xf0] }
 0x25b   :  { %v4671_v55 = vor.u32 %v5878_v46, %v4668_v47 }
 0x25c   :  { %1922 = vmatpush.bf16.msrb.mxu0 %v4431_v53  ;;  %1944 = vmatpush.bf16.msrb.mxu2 %v4751_v54  ;;  %v4524_v53 = vld [vmem:[%s9181_s9 + $0x218] sm:$0xf0] }
 0x25d   :  { %v4527_v62 = vor.u32 %v5842_v52, %v4524_v53  ;;  %v6041_v52 = vld [vmem:[%s9183_s11 + $0x440] sm:$0xf0] }
 0x25e   :  { %1910 = vmatpush.bf16.msra.mxu3 %v4287_v57  ;;  %1932 = vmatpush.bf16.msrb.mxu1 %v4607_v61  ;;  %v4652_v57 = vld [vmem:[%s9181_s9 + $0x318] sm:$0xf0]  ;;  %v5107_v61 = vor.u32 %v5992_v51, %v5106_v50  ;;  %v5302_v51 = vld [vmem:[%s9183_s11 + $0x428] sm:$0xf] }
 0x25f   :  { %v4655_v0 = vor.u32 %v5874_v59, %v4652_v57  ;;  %v5303_v53 = vor.u32 %v6041_v52, %v5302_v51  ;;  %v5164_v59 = vld [vmem:[%s9183_s11 + $0x32c] sm:$0xf0]  ;;  %v5961_v51 = vld [vmem:[%s9183_s11 + $0x1c4] sm:$0xf]  ;;  %v4996_v52 = vld [vmem:[%s9183_s11 + $0x1dc] sm:$0xf0] }
 0x260   :  { %1923 = vmatpush.bf16.msrb.mxu0 %v4415_v2  ;;  %1945 = vmatpush.bf16.msrb.mxu2 %v4735_v3  ;;  %v5922_v2 = vld [vmem:[%s9183_s11 + $0x88] sm:$0xf0]  ;;  %v5167_v57 = vor.u32 %v6003_v56, %v5164_v59  ;;  %v5332_v56 = vld [vmem:[%s9183_s11 + $0x47c] sm:$0xf0] }
 0x261   :  { %v4827_v3 = vor.u32 %v5922_v2, %v4826_v1  ;;  %v4800_v1 = vld [vmem:[%s9183_s11 + $0x54] sm:$0xf0]  ;;  %v5996_v2 = vld [vmem:[%s9183_s11 + $0x2dc] sm:$0xf] }
 0x262   :  { %1911 = vmatpush.bf16.msra.mxu3 %v4271_v12  ;;  %1933 = vmatpush.bf16.msrb.mxu1 %v4591_v13  ;;  %v5954_v12 = vld [vmem:[%s9183_s11 + $0x18c] sm:$0xf]  ;;  %v5078_v13 = vld [vmem:[%s9183_s11 + $0x268] sm:$0xf]  ;;  %v5139_v6 = vor.u32 %v5996_v2, %v5136_v5 }
 0x263   :  { %v5079_v16 = vor.u32 %v5985_v14, %v5078_v13  ;;  %v5108_v13 = vld [vmem:[%s9183_s11 + $0x2bc] sm:$0xf0] }
 0x264   :  { %1924 = vmatpush.bf16.msrb.mxu0 %v4399_v20  ;;  %1946 = vmatpush.bf16.msrb.mxu2 %v4719_v21  ;;  %v5947_v20 = vld [vmem:[%s9183_s11 + $0x154] sm:$0xf]  ;;  %v4940_v21 = vld [vmem:[%s9183_s11 + $0x16c] sm:$0xf0] }
 0x265   :  { %1912 = vmatmul.bf16.vlgmr.msra.gmra.mxu3 %v7341_v11  ;;  %v5999_v11 = vld [vmem:[%s9183_s11 + $0x2f0] sm:$0xf0]  ;;  %v4943_v22 = vor.u32 %v5947_v20, %v4940_v21  ;;  %v6125_v20 = vld [vmem:[%s9183_s11 + $0x6e0] sm:$0xf0]  ;;  %v5982_v21 = vld [vmem:[%s9183_s11 + $0x26c] sm:$0xf] }
 0x266   :  { %3388 = vmatpush.bf16.msrb.mxu3 %v4967_v19  ;;  %1934 = vmatpush.bf16.msrb.mxu1 %v4575_v27  ;;  %v5135_v48 = vor.u32 %v5999_v11, %v5134_v40  ;;  %v5415_v19 = vor.u32 %v6069_v18, %v5414_v15  ;;  %v6062_v27 = vld [vmem:[%s9183_s11 + $0x4e8] sm:$0xf0]  ;;  %v4994_v11 = vld [vmem:[%s9183_s11 + $0x1c0] sm:$0xf]  ;;  %v5638_v18 = vld [vmem:[%s9183_s11 + $0x6c8] sm:$0xf] }
 0x267   :  { %1925 = vmatmul.bf16.vlgmr.msrb.gmra.mxu0 %v7349_v17  ;;  %v5936_v17 = vld [vmem:[%s9183_s11 + $0xf8] sm:$0xf0]  ;;  %v5387_v30 = vor.u32 %v6062_v27, %v5386_v25  ;;  %v5218_v15 = vld [vmem:[%s9183_s11 + $0x380] sm:$0xf]  ;;  %v6066_v25 = vld [vmem:[%s9183_s11 + $0x50c] sm:$0xf] }
 0x268   :  { %3401 = vmatpush.bf16.msra.mxu0 %v5191_v26  ;;  %1947 = vmatpush.bf16.msrb.mxu2 %v4703_v33  ;;  %v4883_v54 = vor.u32 %v5936_v17, %v4882_v45  ;;  %v5051_v26 = vor.u32 %v5978_v24, %v5050_v23  ;;  %v5971_v33 = vld [vmem:[%s9183_s11 + $0x210] sm:$0xf0]  ;;  %v5926_v45 = vld [vmem:[%s9183_s11 + $0xac] sm:$0xf]  ;;  %v4856_v17 = vld [vmem:[%s9183_s11 + $0xc4] sm:$0xf0]  ;;  %v5639_v23 = vor.u32 %v6125_v20, %v5638_v18 }
 0x269   :  { %v4859_v47 = vor.u32 %v5926_v45, %v4856_v17  ;;  %v5360_v45 = vld [vmem:[%s9183_s11 + $0x4b4] sm:$0xf0]  ;;  %v8012_v17 = vld [vmem:[%s9182_s10] sm:$0xf]  ;;  %v6024_v20 = vld [vmem:[%s9183_s11 + $0x3bc] sm:$0xf] }
 0x26a   :  { %3389 = vmatpush.bf16.msrb.mxu3 %v4939_v32  ;;  %1935 = vmatpush.bf16.msrb.mxu1 %v4559_v39  ;;  %v5022_v32 = vld [vmem:[%s9183_s11 + $0x1f8] sm:$0xf]  ;;  %v4884_v39 = vld [vmem:[%s9183_s11 + $0xfc] sm:$0xf0] }
 0x26b   :  { %v5023_v35 = vor.u32 %v5971_v33, %v5022_v32  ;;  %v5975_v32 = vld [vmem:[%s9183_s11 + $0x234] sm:$0xf]  ;;  %v5052_v33 = vld [vmem:[%s9183_s11 + $0x24c] sm:$0xf0] }
 0x26c   :  { %3402 = vmatpush.bf16.msra.mxu0 %v5163_v38  ;;  %1948 = vmatpush.bf16.msrb.mxu2 %v4687_v44  ;;  %v5933_v38 = vld [vmem:[%s9183_s11 + $0xe4] sm:$0xf]  ;;  %v6048_v44 = vld [vmem:[%s9183_s11 + $0x478] sm:$0xf0]  ;;  %v5055_v34 = vor.u32 %v5975_v32, %v5052_v33 }
 0x26d   :  { %v4887_v40 = vor.u32 %v5933_v38, %v4884_v39  ;;  %v5331_v46 = vor.u32 %v6048_v44, %v5330_v42  ;;  %v5582_v39 = vld [vmem:[%s9183_s11 + $0x658] sm:$0xf]  ;;  %v6017_v33 = vld [vmem:[%s9183_s11 + $0x384] sm:$0xf] }
 0x26e   :  { %3390 = vmatpush.bf16.msrb.mxu3 %v4911_v43  ;;  %1936 = vmatpush.bf16.msrb.mxu1 %v4543_v49  ;;  %v4995_v43 = vor.u32 %v5964_v41, %v4994_v11  ;;  %v5192_v49 = vld [vmem:[%s9183_s11 + $0x364] sm:$0xf0]  ;;  %v5968_v41 = vld [vmem:[%s9183_s11 + $0x1fc] sm:$0xf]  ;;  %v5024_v42 = vld [vmem:[%s9183_s11 + $0x214] sm:$0xf0] }
 0x26f   :  { %v5027_v44 = vor.u32 %v5968_v41, %v5024_v42 }
 0x270   :  { %3403 = vmatpush.bf16.msra.mxu0 %v5135_v48  ;;  %1949 = vmatpush.bf16.msrb.mxu2 %v4671_v55  ;;  %v6010_v48 = vld [vmem:[%s9183_s11 + $0x34c] sm:$0xf]  ;;  %v4828_v55 = vld [vmem:[%s9183_s11 + $0x8c] sm:$0xf0] }
 0x271   :  { %v5195_v50 = vor.u32 %v6010_v48, %v5192_v49  ;;  %v5554_v48 = vld [vmem:[%s9183_s11 + $0x620] sm:$0xf]  ;;  %v6104_v49 = vld [vmem:[%s9183_s11 + $0x638] sm:$0xf0] }
 0x272   :  { %3391 = vmatpush.bf16.msrb.mxu3 %v4883_v54  ;;  %1937 = vmatpush.bf16.msrb.mxu1 %v4527_v62  ;;  %v5919_v54 = vld [vmem:[%s9183_s11 + $0x74] sm:$0xf]  ;;  %v6034_v62 = vld [vmem:[%s9183_s11 + $0x408] sm:$0xf0] }
 0x273   :  { %v4831_v58 = vor.u32 %v5919_v54, %v4828_v55  ;;  %v1100_v54 = vperm.slane %v8012_v17, 0  ;;  %v4999_v55 = vor.u32 %v5961_v51, %v4996_v52 }
 0x274   :  { %3404 = vmatpush.bf16.msra.mxu0 %v5107_v61  ;;  %1950 = vmatpush.bf16.msrb.mxu2 %v4655_v0  ;;  %v5274_v61 = vld [vmem:[%s9183_s11 + $0x3f0] sm:$0xf]  ;;  %v5912_v0 = vld [vmem:[%s9183_s11 + $0x3c] sm:$0xf] }
 0x275   :  { %1938 = vmatmul.bf16.vlgmr.msrb.gmra.mxu1 %v7413_v60  ;;  %v4968_v60 = vld [vmem:[%s9183_s11 + $0x1a4] sm:$0xf0] }
 0x276   :  { %3392 = vmatpush.bf16.msrb.mxu3 %v4855_v63  ;;  %3414 = vmatpush.bf16.msra.mxu1 %v5415_v19  ;;  %v5275_v63 = vor.u32 %v6034_v62, %v5274_v61  ;;  %v6097_v61 = vld [vmem:[%s9183_s11 + $0x600] sm:$0xf0] }
 0x277   :  { %1951 = vmatmul.bf16.vlgmr.msrb.gmra.mxu2 %v7424_v4  ;;  %v4971_v4 = vor.u32 %v5954_v12, %v4968_v60  ;;  %v4772_v12 = vld [vmem:[%s9183_s11 + $0x1c] sm:$0xf0]  ;;  %v5989_v60 = vld [vmem:[%s9183_s11 + $0x2a4] sm:$0xf] }
 0x278   :  { %3405 = vmatpush.bf16.msra.mxu0 %v5079_v16  ;;  %v5111_v14 = vor.u32 %v5989_v60, %v5108_v13  ;;  %v6020_v16 = vld [vmem:[%s9183_s11 + $0x398] sm:$0xf0]  ;;  %3427 = vmatpush.bf16.msra.mxu2 %v5639_v23  ;;  %v4974_v23 = vld [vmem:[%s9183_s11 + $0x190] sm:$0xf] }
 0x279   :  { %v5219_v19 = vor.u32 %v6020_v16, %v5218_v15  ;;  %v6083_v15 = vld [vmem:[%s9183_s11 + $0x590] sm:$0xf0] }
 0x27a   :  { %3393 = vmatpush.bf16.msrb.mxu3 %v4827_v3  ;;  %3415 = vmatpush.bf16.msra.mxu1 %v5387_v30  ;;  %v4803_v3 = vor.u32 %v5912_v0, %v4800_v1  ;;  %v6118_v30 = vld [vmem:[%s9183_s11 + $0x6a8] sm:$0xf0]  ;;  %v5304_v1 = vld [vmem:[%s9183_s11 + $0x444] sm:$0xf0] }
 0x27b   :  { %v6038_v0 = vld [vmem:[%s9183_s11 + $0x42c] sm:$0xf] }
 0x27c   :  { %3406 = vmatpush.bf16.msra.mxu0 %v5051_v26  ;;  %v5416_v26 = vld [vmem:[%s9183_s11 + $0x524] sm:$0xf0] }
 0x27d   :  { %v5419_v28 = vor.u32 %v6066_v25, %v5416_v26 }
 0x27e   :  { %3394 = vmatpush.bf16.msrb.mxu3 %v4799_v7  ;;  %3416 = vmatpush.bf16.msra.mxu1 %v5359_v37  ;;  %v5246_v7 = vld [vmem:[%s9183_s11 + $0x3b8] sm:$0xf] }
 0x27f   :  { %v5247_v9 = vor.u32 %v6027_v8, %v5246_v7  ;;  %v6090_v7 = vld [vmem:[%s9183_s11 + $0x5c8] sm:$0xf0] }
 0x280   :  { %3407 = vmatpush.bf16.msra.mxu0 %v5023_v35  ;;  %v6059_v35 = vld [vmem:[%s9183_s11 + $0x4d4] sm:$0xf] }
 0x281   :  { %v5391_v38 = vor.u32 %v6059_v35, %v5388_v36  ;;  %v6122_v35 = vld [vmem:[%s9183_s11 + $0x6cc] sm:$0xf] }
 0x282   :  { %3395 = vmatpush.bf16.msrb.mxu3 %v4771_v10  ;;  %3417 = vmatpush.bf16.msra.mxu1 %v5331_v46  ;;  %v5905_v10 = vld [vmem:[%s9183_s11 + $0x4] sm:$0xf] }
 0x284   :  { %3408 = vmatpush.bf16.msra.mxu0 %v4995_v43  ;;  %v6052_v43 = vld [vmem:[%s9183_s11 + $0x49c] sm:$0xf] }
 0x286   :  { %3440 = vmatpush.bf16.msra.mxu3 %v4971_v4  ;;  %3418 = vmatpush.bf16.msra.mxu1 %v5303_v53  ;;  %v4775_v4 = vor.u32 %v5905_v10, %v4772_v12  ;;  %v6045_v53 = vld [vmem:[%s9183_s11 + $0x464] sm:$0xf]  ;;  %v5276_v10 = vld [vmem:[%s9183_s11 + $0x40c] sm:$0xf0] }
 0x287   :  { %v5335_v59 = vor.u32 %v6045_v53, %v5332_v56  ;;  %v4890_v53 = vld [vmem:[%s9183_s11 + $0xe8] sm:$0xf]  ;;  %v6108_v56 = vld [vmem:[%s9183_s11 + $0x65c] sm:$0xf] }
 0x288   :  { %3453 = vmatpush.bf16.msrb.mxu0 %v5195_v50  ;;  %v5555_v50 = vor.u32 %v6104_v49, %v5554_v48  ;;  %v6115_v48 = vld [vmem:[%s9183_s11 + $0x694] sm:$0xf]  ;;  %v5612_v49 = vld [vmem:[%s9183_s11 + $0x6ac] sm:$0xf0] }
 0x28a   :  { %3441 = vmatpush.bf16.msra.mxu3 %v4943_v22  ;;  %3419 = vmatpush.bf16.msra.mxu1 %v5275_v63  ;;  %v5080_v22 = vld [vmem:[%s9183_s11 + $0x284] sm:$0xf0] }
 0x28b   :  { %v5083_v24 = vor.u32 %v5982_v21, %v5080_v22  ;;  %v5248_v21 = vld [vmem:[%s9183_s11 + $0x3d4] sm:$0xf0] }
 0x28c   :  { %3454 = vmatpush.bf16.msrb.mxu0 %v5167_v57  ;;  %v5526_v57 = vld [vmem:[%s9183_s11 + $0x5e8] sm:$0xf]  ;;  %v5251_v25 = vor.u32 %v6024_v20, %v5248_v21  ;;  %v1102_v21 = vperm.slane %v8012_v17, 2 }
 0x28d   :  { %v5527_v63 = vor.u32 %v6097_v61, %v5526_v57  ;;  %v5528_v20 = vld [vmem:[%s9183_s11 + $0x604] sm:$0xf0] }
 0x28e   :  { %3442 = vmatpush.bf16.msra.mxu3 %v4915_v31  ;;  %3420 = vmatpush.bf16.msra.mxu1 %v5247_v9  ;;  %v5611_v31 = vor.u32 %v6118_v30, %v5610_v29  ;;  %v6031_v9 = vld [vmem:[%s9183_s11 + $0x3f4] sm:$0xf]  ;;  %v5442_v29 = vld [vmem:[%s9183_s11 + $0x540] sm:$0xf]  ;;  %v6076_v30 = vld [vmem:[%s9183_s11 + $0x558] sm:$0xf0] }
 0x28f   :  { %v5279_v60 = vor.u32 %v6031_v9, %v5276_v10  ;;  %v5443_v32 = vor.u32 %v6076_v30, %v5442_v29  ;;  %v5142_v29 = vld [vmem:[%s9183_s11 + $0x2e0] sm:$0xf] }
 0x290   :  { %3455 = vmatpush.bf16.msrb.mxu0 %v5139_v6  ;;  %3428 = vmatpush.bf16.msra.mxu2 %v5611_v31  ;;  %v5498_v6 = vld [vmem:[%s9183_s11 + $0x5b0] sm:$0xf] }
 0x291   :  { %v5499_v8 = vor.u32 %v6090_v7, %v5498_v6  ;;  %v6014_v6 = vld [vmem:[%s9183_s11 + $0x368] sm:$0xf0]  ;;  %v6101_v7 = vld [vmem:[%s9183_s11 + $0x624] sm:$0xf] }
 0x292   :  { %3443 = vmatpush.bf16.msra.mxu3 %v4887_v40  ;;  %3421 = vmatpush.bf16.msra.mxu1 %v5219_v19  ;;  %v6111_v40 = vld [vmem:[%s9183_s11 + $0x670] sm:$0xf0] }
 0x293   :  { %v5583_v11 = vor.u32 %v6111_v40, %v5582_v39  ;;  %v5640_v40 = vld [vmem:[%s9183_s11 + $0x6e4] sm:$0xf0] }
 0x294   :  { %3456 = vmatpush.bf16.msrb.mxu0 %v5111_v14  ;;  %v5470_v14 = vld [vmem:[%s9183_s11 + $0x578] sm:$0xf]  ;;  %v5643_v41 = vor.u32 %v6122_v35, %v5640_v40  ;;  %v5909_v40 = vld [vmem:[%s9183_s11 + $0x20] sm:$0xf0] }
 0x295   :  { %3429 = vmatpush.bf16.msra.mxu2 %v5583_v11  ;;  %v5471_v19 = vor.u32 %v6083_v15, %v5470_v14  ;;  %v5923_v14 = vld [vmem:[%s9183_s11 + $0x90] sm:$0xf0]  ;;  %v5170_v15 = vld [vmem:[%s9183_s11 + $0x318] sm:$0xf] }
 0x296   :  { %3444 = vmatpush.bf16.msra.mxu3 %v4859_v47  ;;  %3466 = vmatpush.bf16.msrb.mxu1 %v5419_v28  ;;  %v5363_v47 = vor.u32 %v6052_v43, %v5360_v45  ;;  %v4918_v45 = vld [vmem:[%s9183_s11 + $0x120] sm:$0xf] }
 0x298   :  { %3457 = vmatpush.bf16.msrb.mxu0 %v5083_v24  ;;  %v5958_v24 = vld [vmem:[%s9183_s11 + $0x1a8] sm:$0xf0] }
 0x299   :  { %3430 = vmatpush.bf16.msra.mxu2 %v5555_v50  ;;  %v4975_v31 = vor.u32 %v5958_v24, %v4974_v23  ;;  %v5615_v50 = vor.u32 %v6115_v48, %v5612_v49 }
 0x29a   :  { %3445 = vmatpush.bf16.msra.mxu3 %v4831_v58  ;;  %3467 = vmatpush.bf16.msrb.mxu1 %v5391_v38  ;;  %v5951_v38 = vld [vmem:[%s9183_s11 + $0x170] sm:$0xf0] }
 0x29c   :  { %3458 = vmatpush.bf16.msrb.mxu0 %v5055_v34  ;;  %v5220_v34 = vld [vmem:[%s9183_s11 + $0x39c] sm:$0xf0] }
 0x29d   :  { %3431 = vmatpush.bf16.msra.mxu2 %v5527_v63  ;;  %v5223_v39 = vor.u32 %v6017_v33, %v5220_v34  ;;  %v5500_v33 = vld [vmem:[%s9183_s11 + $0x5cc] sm:$0xf0] }
 0x29e   :  { %3446 = vmatpush.bf16.msra.mxu3 %v4803_v3  ;;  %3468 = vmatpush.bf16.msrb.mxu1 %v5363_v47  ;;  %v5307_v3 = vor.u32 %v6038_v0, %v5304_v1  ;;  %v5944_v47 = vld [vmem:[%s9183_s11 + $0x138] sm:$0xf0]  ;;  %v4862_v1 = vld [vmem:[%s9183_s11 + $0xb0] sm:$0xf] }
 0x29f   :  { %v4919_v52 = vor.u32 %v5944_v47, %v4918_v45  ;;  %v5955_v45 = vld [vmem:[%s9183_s11 + $0x194] sm:$0xf] }
 0x2a0   :  { %3459 = vmatpush.bf16.msrb.mxu0 %v5027_v44 }
 0x2a1   :  { %3432 = vmatpush.bf16.msra.mxu2 %v5499_v8  ;;  %v5556_v8 = vld [vmem:[%s9183_s11 + $0x63c] sm:$0xf0] }
 0x2a2   :  { %3447 = vmatpush.bf16.msra.mxu3 %v4775_v4  ;;  %3469 = vmatpush.bf16.msrb.mxu1 %v5335_v59  ;;  %v5559_v9 = vor.u32 %v6101_v7, %v5556_v8  ;;  %v5979_v7 = vld [vmem:[%s9183_s11 + $0x250] sm:$0xf0]  ;;  %v5394_v8 = vld [vmem:[%s9183_s11 + $0x4d8] sm:$0xf] }
 0x2a4   :  { %v7971_v27 = vpop.f32.mrf.mxu0  ;;  %3460 = vmatpush.bf16.msrb.mxu0 %v4999_v55  ;;  %v5937_v55 = vld [vmem:[%s9183_s11 + $0x100] sm:$0xf0] }
 0x2a5   :  { %3433 = vmatpush.bf16.msra.mxu2 %v5471_v19  ;;  %v4891_v0 = vor.u32 %v5937_v55, %v4890_v53  ;;  %v6094_v19 = vld [vmem:[%s9183_s11 + $0x5ec] sm:$0xf] }
 0x2a6   :  { %3470 = vmatpush.bf16.msrb.mxu1 %v5307_v3  ;;  %v5198_v3 = vld [vmem:[%s9183_s11 + $0x350] sm:$0xf] }
 0x2a8   :  { %v1757_v37 = vpop.f32.mrf.mxu3 }
 0x2a9   :  { %v1758_v2 = vadd.f32 %v1757_v37, %v1100_v54  ;;  %v4946_v37 = vld [vmem:[%s9183_s11 + $0x158] sm:$0xf]  ;;  %3434 = vmatpush.bf16.msra.mxu2 %v5443_v32  ;;  %v6087_v32 = vld [vmem:[%s9183_s11 + $0x5b4] sm:$0xf] }
 0x2aa   :  { %3471 = vmatpush.bf16.msrb.mxu1 %v5279_v60  ;;  %v4947_v44 = vor.u32 %v5951_v38, %v4946_v37  ;;  %v5503_v35 = vor.u32 %v6087_v32, %v5500_v33  ;;  %v6049_v32 = vld [vmem:[%s9183_s11 + $0x480] sm:$0xf0]  ;;  %v5927_v33 = vld [vmem:[%s9183_s11 + $0xb4] sm:$0xf] }
 0x2ab   :  { %v1771_v12 = vadd.f32 %v7971_v27, %v1758_v2  ;;  %v1101_v27 = vperm.slane %v8012_v17, 1  ;;  %v5930_v2 = vld [vmem:[%s9183_s11 + $0xc8] sm:$0xf0] }
 0x2ac   :  { %v1772_v46 = vpop.f32.mrf.mxu0  ;;  %v4863_v60 = vor.u32 %v5930_v2, %v4862_v1 }
 0x2ad   :  { %3479 = vmatpush.bf16.msrb.mxu2 %v5643_v41  ;;  %v5993_v41 = vld [vmem:[%s9183_s11 + $0x2c0] sm:$0xf0] }
 0x2ae   :  { %3472 = vmatpush.bf16.msrb.mxu1 %v5251_v25 }
 0x2b0   :  { %v1759_v58 = vpop.f32.mrf.mxu3 }
 0x2b1   :  { %3480 = vmatpush.bf16.msrb.mxu2 %v5615_v50  ;;  %v5584_v58 = vld [vmem:[%s9183_s11 + $0x674] sm:$0xf0] }
 0x2b2   :  { %v1783_v62 = vpop.f32.mrf.mxu1  ;;  %3473 = vmatpush.bf16.msrb.mxu1 %v5223_v39  ;;  %v5587_v59 = vor.u32 %v6108_v56, %v5584_v58  ;;  %v4778_v39 = vld [vmem:[%s9183_s11 + $0x8] sm:$0xf]  ;;  %v5422_v56 = vld [vmem:[%s9183_s11 + $0x510] sm:$0xf]  ;;  %v6073_v58 = vld [vmem:[%s9183_s11 + $0x544] sm:$0xf] }
 0x2b3   :  { %v1784_v13 = vadd.f32 %v1783_v62, %v1771_v12  ;;  %v4779_v49 = vor.u32 %v5909_v40, %v4778_v39  ;;  %v1103_v40 = vperm.slane %v8012_v17, 3  ;;  %v4836_v17 = vld [vmem:[%s9183_s11 + $0x94] sm:$0xf0] }
 0x2b4   :  { %v1822_v5 = vpop.f32.mrf.mxu0 }
 0x2b5   :  { %3481 = vmatpush.bf16.msrb.mxu2 %v5587_v59  ;;  %v5444_v59 = vld [vmem:[%s9183_s11 + $0x55c] sm:$0xf0] }
 0x2b8   :  { %v1809_v4 = vpop.f32.mrf.mxu3 }
 0x2b9   :  { %v1810_v46 = vadd.f32 %v1809_v4, %v1101_v27  ;;  %v5199_v4 = vor.u32 %v6014_v6, %v5198_v3  ;;  %3482 = vmatpush.bf16.msrb.mxu2 %v5559_v9  ;;  %v4806_v27 = vld [vmem:[%s9183_s11 + $0x40] sm:$0xf]  ;;  %v5058_v6 = vld [vmem:[%s9183_s11 + $0x238] sm:$0xf] }
 0x2ba   :  { %v1785_v16 = vpop.f32.mrf.mxu1  ;;  %v1796_v18 = vpop.f32.mrf.mxu2 }
 0x2bb   :  { %v1797_v22 = vadd.f32 %v1796_v18, %v1784_v13  ;;  %v1823_v54 = vadd.f32 %v1822_v5, %v1810_v46  ;;  %v4834_v13 = vld [vmem:[%s9183_s11 + $0x78] sm:$0xf]  ;;  %v6007_v18 = vld [vmem:[%s9183_s11 + $0x330] sm:$0xf0]  ;;  %v4976_v46 = vld [vmem:[%s9183_s11 + $0x1ac] sm:$0xf0] }
 0x2bc   :  { %v1824_v26 = vpop.f32.mrf.mxu0  ;;  %v4835_v25 = vor.u32 %v5923_v14, %v4834_v13  ;;  %v4979_v55 = vor.u32 %v5955_v45, %v4976_v46  ;;  %v5059_v13 = vor.u32 %v5979_v7, %v5058_v6  ;;  %v5920_v45 = vld [vmem:[%s9183_s11 + $0x7c] sm:$0xf]  ;;  %v5990_v6 = vld [vmem:[%s9183_s11 + $0x2ac] sm:$0xf]  ;;  %v5116_v7 = vld [vmem:[%s9183_s11 + $0x2c4] sm:$0xf0] }
 0x2bd   :  { %v1956_v28 = vmax.f32 %v1797_v22, 0.0  ;;  %v5531_v22 = vor.u32 %v6094_v19, %v5528_v20  ;;  %v5171_v26 = vor.u32 %v6007_v18, %v5170_v15  ;;  %v5030_v19 = vld [vmem:[%s9183_s11 + $0x200] sm:$0xf]  ;;  %v5972_v20 = vld [vmem:[%s9183_s11 + $0x218] sm:$0xf0] }
 0x2bf   :  { %v8092_v36 = vpack.c.bf16 %v1956_v28, %v1956_v28  ;;  %v5916_v28 = vld [vmem:[%s9183_s11 + $0x58] sm:$0xf0]  ;;  %3483 = vmatpush.bf16.msrb.mxu2 %v5531_v22 }
 0x2c0   :  { %v1811_v11 = vpop.f32.mrf.mxu3  ;;  %v4807_v37 = vor.u32 %v5916_v28, %v4806_v27  ;;  %v6056_v22 = vld [vmem:[%s9183_s11 + $0x4b8] sm:$0xf0] }
 0x2c1   :  { %3396 = vmatmul.bf16.vlgmr.msrb.gmra.mxu3 %v8092_v36  ;;  %v5114_v11 = vld [vmem:[%s9183_s11 + $0x2a8] sm:$0xf] }
 0x2c2   :  { %3492 = vmatpush.bf16.msrb.mxu3 %v4975_v31  ;;  %v1798_v42 = vpop.f32.mrf.mxu2  ;;  %v1835_v43 = vpop.f32.mrf.mxu1  ;;  %v6000_v31 = vld [vmem:[%s9183_s11 + $0x2f8] sm:$0xf0]  ;;  %v5115_v50 = vor.u32 %v5993_v41, %v5114_v11 }
 0x2c3   :  { %v1836_v57 = vadd.f32 %v1835_v43, %v1823_v54  ;;  %v5143_v38 = vor.u32 %v6000_v31, %v5142_v29  ;;  %3484 = vmatpush.bf16.msrb.mxu2 %v5503_v35  ;;  %v6080_v42 = vld [vmem:[%s9183_s11 + $0x57c] sm:$0xf]  ;;  %v5472_v43 = vld [vmem:[%s9183_s11 + $0x594] sm:$0xf0]  ;;  %v5002_v29 = vld [vmem:[%s9183_s11 + $0x1c8] sm:$0xf] }
 0x2c4   :  { %v8116_v51 = vpop.f32.mrf.mxu0  ;;  %v5475_v47 = vor.u32 %v6080_v42, %v5472_v43  ;;  %v5338_v31 = vld [vmem:[%s9183_s11 + $0x468] sm:$0xf]  ;;  %v5310_v42 = vld [vmem:[%s9183_s11 + $0x430] sm:$0xf] }
 0x2c5   :  { %v5339_v11 = vor.u32 %v6049_v32, %v5338_v31 }
 0x2c6   :  { %3493 = vmatpush.bf16.msrb.mxu3 %v4947_v44 }
 0x2c7   :  { %3485 = vmatpush.bf16.msrb.mxu2 %v5475_v47  ;;  %v6004_v47 = vld [vmem:[%s9183_s11 + $0x31c] sm:$0xf] }
 0x2c8   :  { %v1861_v61 = vpop.f32.mrf.mxu3 }
 0x2c9   :  { %v1862_v34 = vadd.f32 %v1861_v61, %v1102_v21  ;;  %v6070_v61 = vld [vmem:[%s9183_s11 + $0x528] sm:$0xf0]  ;;  %v5366_v21 = vld [vmem:[%s9183_s11 + $0x4a0] sm:$0xf] }
 0x2ca   :  { %3494 = vmatpush.bf16.msrb.mxu3 %v4919_v52  ;;  %v1837_v62 = vpop.f32.mrf.mxu1  ;;  %v1848_v63 = vpop.f32.mrf.mxu2  ;;  %v5086_v52 = vld [vmem:[%s9183_s11 + $0x270] sm:$0xf]  ;;  %v5423_v3 = vor.u32 %v6070_v61, %v5422_v56  ;;  %v5367_v27 = vor.u32 %v6056_v22, %v5366_v21  ;;  %v5913_v56 = vld [vmem:[%s9183_s11 + $0x44] sm:$0xf] }
 0x2cb   :  { %v1849_v5 = vadd.f32 %v1848_v63, %v1836_v57  ;;  %v1875_v44 = vadd.f32 %v8116_v51, %v1862_v34  ;;  %v5986_v51 = vld [vmem:[%s9183_s11 + $0x288] sm:$0xf0]  ;;  %v5948_v62 = vld [vmem:[%s9183_s11 + $0x15c] sm:$0xf]  ;;  %v4948_v63 = vld [vmem:[%s9183_s11 + $0x174] sm:$0xf0] }
 0x2cc   :  { %v1876_v12 = vpop.f32.mrf.mxu0  ;;  %v5087_v2 = vor.u32 %v5986_v51, %v5086_v52  ;;  %v4864_v34 = vld [vmem:[%s9183_s11 + $0xcc] sm:$0xf0]  ;;  %v4839_v52 = vor.u32 %v5920_v45, %v4836_v17  ;;  %v5282_v51 = vld [vmem:[%s9183_s11 + $0x3f8] sm:$0xf] }
 0x2cd   :  { %v1957_v10 = vmax.f32 %v1849_v5, 0.0  ;;  %v4951_v5 = vor.u32 %v5948_v62, %v4948_v63  ;;  %v5941_v12 = vld [vmem:[%s9183_s11 + $0x124] sm:$0xf]  ;;  %v4867_v41 = vor.u32 %v5927_v33, %v4864_v34  ;;  %v5254_v63 = vld [vmem:[%s9183_s11 + $0x3c0] sm:$0xf] }
 0x2ce   :  { %3495 = vmatpush.bf16.msrb.mxu3 %v4891_v0  ;;  %v5447_v0 = vor.u32 %v6073_v58, %v5444_v59  ;;  %v4808_v58 = vld [vmem:[%s9183_s11 + $0x5c] sm:$0xf0]  ;;  %v5997_v59 = vld [vmem:[%s9183_s11 + $0x2e4] sm:$0xf]  ;;  %v5646_v22 = vld [vmem:[%s9183_s11 + $0x6d0] sm:$0xf] }
 0x2cf   :  { %v8157_v16 = vpack.c.bf16 %v1957_v10, %v1957_v10  ;;  %v6063_v10 = vld [vmem:[%s9183_s11 + $0x4f0] sm:$0xf0]  ;;  %v4811_v62 = vor.u32 %v5913_v56, %v4808_v58  ;;  %v5938_v56 = vld [vmem:[%s9183_s11 + $0x108] sm:$0xf0] }
 0x2d0   :  { %v1863_v23 = vpop.f32.mrf.mxu3  ;;  %3486 = vmatpush.bf16.msrb.mxu2 %v5447_v0  ;;  %v5395_v15 = vor.u32 %v6063_v10, %v5394_v8  ;;  %v6028_v0 = vld [vmem:[%s9183_s11 + $0x3d8] sm:$0xf0]  ;;  %v4982_v8 = vld [vmem:[%s9183_s11 + $0x198] sm:$0xf]  ;;  %v5959_v10 = vld [vmem:[%s9183_s11 + $0x1b0] sm:$0xf0] }
 0x2d1   :  { %3409 = vmatmul.bf16.vlgmr.msra.gmra.mxu0 %v8157_v16  ;;  %3448 = vmatmul.bf16.vlgmr.msra.gmra.mxu3 %v8092_v36  ;;  %v5934_v23 = vld [vmem:[%s9183_s11 + $0xec] sm:$0xf]  ;;  %v4983_v21 = vor.u32 %v5959_v10, %v4982_v8  ;;  %v6015_v8 = vld [vmem:[%s9183_s11 + $0x370] sm:$0xf0] }
 0x2d2   :  { %3496 = vmatpush.bf16.msrb.mxu3 %v4863_v60  ;;  %3505 = vmatpush.bf16.msra.mxu0 %v5199_v4  ;;  %v1850_v24 = vpop.f32.mrf.mxu2  ;;  %v1887_v30 = vpop.f32.mrf.mxu1  ;;  %v4920_v60 = vld [vmem:[%s9183_s11 + $0x13c] sm:$0xf0] }
 0x2d3   :  { %v1888_v48 = vadd.f32 %v1887_v30, %v1875_v44  ;;  %v4923_v18 = vor.u32 %v5941_v12, %v4920_v60  ;;  %v4892_v24 = vld [vmem:[%s9183_s11 + $0x104] sm:$0xf0]  ;;  %v5965_v30 = vld [vmem:[%s9183_s11 + $0x1e0] sm:$0xf0]  ;;  %v6042_v44 = vld [vmem:[%s9183_s11 + $0x448] sm:$0xf0] }
 0x2d4   :  { %v4895_v28 = vor.u32 %v5934_v23, %v4892_v24  ;;  %v5003_v39 = vor.u32 %v5965_v30, %v5002_v29  ;;  %v6126_v23 = vld [vmem:[%s9183_s11 + $0x6e8] sm:$0xf0]  ;;  %v5983_v24 = vld [vmem:[%s9183_s11 + $0x274] sm:$0xf]  ;;  %v4954_v29 = vld [vmem:[%s9183_s11 + $0x160] sm:$0xf] }
 0x2d5   :  { %v5952_v30 = vld [vmem:[%s9183_s11 + $0x178] sm:$0xf0]  ;;  %v5647_v32 = vor.u32 %v6126_v23, %v5646_v22  ;;  %v5178_v22 = vld [vmem:[%s9183_s11 + $0x320] sm:$0xf] }
 0x2d6   :  { %3497 = vmatpush.bf16.msrb.mxu3 %v4835_v25  ;;  %3506 = vmatpush.bf16.msra.mxu0 %v5171_v26  ;;  %v5031_v26 = vor.u32 %v5972_v20, %v5030_v19  ;;  %v5119_v20 = vor.u32 %v5990_v6, %v5116_v7  ;;  %v5931_v6 = vld [vmem:[%s9183_s11 + $0xd0] sm:$0xf0]  ;;  %v5206_v7 = vld [vmem:[%s9183_s11 + $0x358] sm:$0xf]  ;;  %v6008_v23 = vld [vmem:[%s9183_s11 + $0x338] sm:$0xf0] }
 0x2da   :  { %3498 = vmatpush.bf16.msrb.mxu3 %v4807_v37  ;;  %3507 = vmatpush.bf16.msra.mxu0 %v5143_v38  ;;  %v1889_v53 = vpop.f32.mrf.mxu1  ;;  %v1900_v54 = vpop.f32.mrf.mxu2  ;;  %v6011_v37 = vld [vmem:[%s9183_s11 + $0x354] sm:$0xf]  ;;  %v5200_v38 = vld [vmem:[%s9183_s11 + $0x36c] sm:$0xf0] }
 0x2db   :  { %v1901_v57 = vadd.f32 %v1900_v54, %v1888_v48  ;;  %v5203_v43 = vor.u32 %v6011_v37, %v5200_v38  ;;  %v5172_v48 = vld [vmem:[%s9183_s11 + $0x334] sm:$0xf0]  ;;  %v6119_v38 = vld [vmem:[%s9183_s11 + $0x6b0] sm:$0xf0] }
 0x2dc   :  { %v5175_v54 = vor.u32 %v6004_v47, %v5172_v48  ;;  %v5618_v37 = vld [vmem:[%s9183_s11 + $0x698] sm:$0xf]  ;;  %v5590_v48 = vld [vmem:[%s9183_s11 + $0x660] sm:$0xf] }
 0x2dd   :  { %v1958_v1 = vmax.f32 %v1901_v57, 0.0  ;;  %v5144_v57 = vld [vmem:[%s9183_s11 + $0x2fc] sm:$0xf0]  ;;  %v5619_v17 = vor.u32 %v6119_v38, %v5618_v37  ;;  %v6001_v37 = vld [vmem:[%s9183_s11 + $0x300] sm:$0xf0] }
 0x2de   :  { %3499 = vmatpush.bf16.msrb.mxu3 %v4779_v49  ;;  %3508 = vmatpush.bf16.msra.mxu0 %v5115_v50  ;;  %v5311_v50 = vor.u32 %v6042_v44, %v5310_v42  ;;  %v5396_v42 = vld [vmem:[%s9183_s11 + $0x4f4] sm:$0xf0]  ;;  %v5945_v44 = vld [vmem:[%s9183_s11 + $0x140] sm:$0xf0] }
 0x2df   :  { %v8247_v9 = vpack.c.bf16 %v1958_v1, %v1958_v1 }
 0x2e1   :  { %3461 = vmatmul.bf16.vlgmr.msrb.gmra.mxu0 %v8157_v16  ;;  %3500 = vmatmul.bf16.vlgmr.msrb.gmra.mxu3 %v8092_v36 }
 0x2e2   :  { %3544 = vmatpush.bf16.msra.mxu3 %v4979_v55  ;;  %3422 = vmatmul.bf16.vlgmr.msra.gmra.mxu1 %v8247_v9  ;;  %v1902_v14 = vpop.f32.mrf.mxu2  ;;  %v6035_v55 = vld [vmem:[%s9183_s11 + $0x410] sm:$0xf0] }
 0x2e3   :  { %3509 = vmatpush.bf16.msra.mxu0 %v5087_v2  ;;  %3518 = vmatpush.bf16.msra.mxu1 %v5423_v3  ;;  %v5283_v61 = vor.u32 %v6035_v55, %v5282_v51  ;;  %v5147_v2 = vor.u32 %v5997_v59, %v5144_v57  ;;  %v5906_v3 = vld [vmem:[%s9183_s11 + $0xc] sm:$0xf]  ;;  %v5032_v51 = vld [vmem:[%s9183_s11 + $0x21c] sm:$0xf0]  ;;  %v4898_v55 = vld [vmem:[%s9183_s11 + $0xf0] sm:$0xf] }
 0x2e4   :  { %v8258_v4 = vpop.f32.mrf.mxu0  ;;  %v5562_v59 = vld [vmem:[%s9183_s11 + $0x628] sm:$0xf] }
 0x2e6   :  { %3545 = vmatpush.bf16.msra.mxu3 %v4951_v5  ;;  %v4780_v5 = vld [vmem:[%s9183_s11 + $0x24] sm:$0xf0] }
 0x2e7   :  { %3510 = vmatpush.bf16.msra.mxu0 %v5059_v13  ;;  %3519 = vmatpush.bf16.msra.mxu1 %v5395_v15  ;;  %v5255_v13 = vor.u32 %v6028_v0, %v5254_v63  ;;  %v4783_v14 = vor.u32 %v5906_v3, %v4780_v5  ;;  %v5226_v15 = vld [vmem:[%s9183_s11 + $0x388] sm:$0xf]  ;;  %v5962_v63 = vld [vmem:[%s9183_s11 + $0x1cc] sm:$0xf]  ;;  %v4870_v5 = vld [vmem:[%s9183_s11 + $0xb8] sm:$0xf] }
 0x2e8   :  { %v1913_v25 = vpop.f32.mrf.mxu3  ;;  %v5004_v0 = vld [vmem:[%s9183_s11 + $0x1e4] sm:$0xf0] }
 0x2e9   :  { %v1914_v53 = vadd.f32 %v1913_v25, %v1103_v40  ;;  %v5088_v25 = vld [vmem:[%s9183_s11 + $0x28c] sm:$0xf0]  ;;  %v4955_v40 = vor.u32 %v5952_v30, %v4954_v29  ;;  %v5340_v3 = vld [vmem:[%s9183_s11 + $0x484] sm:$0xf0]  ;;  %v5179_v29 = vor.u32 %v6008_v23, %v5178_v22  ;;  %v6032_v30 = vld [vmem:[%s9183_s11 + $0x3fc] sm:$0xf] }
 0x2ea   :  { %3546 = vmatpush.bf16.msra.mxu3 %v4923_v18  ;;  %v6021_v18 = vld [vmem:[%s9183_s11 + $0x3a0] sm:$0xf0]  ;;  %v5091_v34 = vor.u32 %v5983_v24, %v5088_v25 }
 0x2eb   :  { %3511 = vmatpush.bf16.msra.mxu0 %v5031_v26  ;;  %3520 = vmatpush.bf16.msra.mxu1 %v5367_v27  ;;  %v1927_v1 = vadd.f32 %v8258_v4, %v1914_v53  ;;  %v6067_v26 = vld [vmem:[%s9183_s11 + $0x514] sm:$0xf]  ;;  %v5424_v27 = vld [vmem:[%s9183_s11 + $0x52c] sm:$0xf0]  ;;  %v5227_v31 = vor.u32 %v6021_v18, %v5226_v15  ;;  %v6053_v53 = vld [vmem:[%s9183_s11 + $0x4a4] sm:$0xf]  ;;  %v5207_v15 = vor.u32 %v6015_v8, %v5206_v7 }
 0x2ec   :  { %v1928_v35 = vpop.f32.mrf.mxu0  ;;  %v6039_v18 = vld [vmem:[%s9183_s11 + $0x434] sm:$0xf]  ;;  %v6109_v23 = vld [vmem:[%s9183_s11 + $0x664] sm:$0xf] }
 0x2ed   :  { %v5427_v35 = vor.u32 %v6067_v26, %v5424_v27  ;;  %v5506_v26 = vld [vmem:[%s9183_s11 + $0x5b8] sm:$0xf]  ;;  %v6091_v27 = vld [vmem:[%s9183_s11 + $0x5d0] sm:$0xf0] }
 0x2ee   :  { %3547 = vmatpush.bf16.msra.mxu3 %v4895_v28  ;;  %v5507_v38 = vor.u32 %v6091_v27, %v5506_v26  ;;  %v5038_v27 = vld [vmem:[%s9183_s11 + $0x208] sm:$0xf] }
 0x2ef   :  { %3512 = vmatpush.bf16.msra.mxu0 %v5003_v39  ;;  %3521 = vmatpush.bf16.msra.mxu1 %v5339_v11  ;;  %v5976_v39 = vld [vmem:[%s9183_s11 + $0x23c] sm:$0xf]  ;;  %v5060_v11 = vld [vmem:[%s9183_s11 + $0x254] sm:$0xf0] }
 0x2f0   :  { %v1915_v46 = vpop.f32.mrf.mxu3 }
 0x2f1   :  { %v5063_v46 = vor.u32 %v5976_v39, %v5060_v11  ;;  %v6084_v11 = vld [vmem:[%s9183_s11 + $0x598] sm:$0xf0] }
 0x2f2   :  { %v1939_v49 = vpop.f32.mrf.mxu1  ;;  %3548 = vmatpush.bf16.msra.mxu3 %v4867_v41  ;;  %3513 = vmatmul.bf16.vlgmr.msra.gmra.mxu0 %v8157_v16  ;;  %v6060_v41 = vld [vmem:[%s9183_s11 + $0x4dc] sm:$0xf] }
 0x2f3   :  { %3557 = vmatpush.bf16.msrb.mxu0 %v5203_v43  ;;  %3474 = vmatmul.bf16.vlgmr.msrb.gmra.mxu1 %v8247_v9  ;;  %v1940_v12 = vadd.f32 %v1939_v49, %v1927_v1  ;;  %v4926_v43 = vld [vmem:[%s9183_s11 + $0x128] sm:$0xf]  ;;  %v5399_v47 = vor.u32 %v6060_v41, %v5396_v42  ;;  %v6112_v49 = vld [vmem:[%s9183_s11 + $0x678] sm:$0xf0]  ;;  %v4899_v1 = vor.u32 %v5938_v56, %v4898_v55 }
 0x2f4   :  { %3522 = vmatpush.bf16.msra.mxu1 %v5311_v50  ;;  %v5969_v50 = vld [vmem:[%s9183_s11 + $0x204] sm:$0xf]  ;;  %v5591_v58 = vor.u32 %v6112_v49, %v5590_v48  ;;  %v5956_v49 = vld [vmem:[%s9183_s11 + $0x19c] sm:$0xf] }
 0x2f5   :  { %v5035_v57 = vor.u32 %v5969_v50, %v5032_v51  ;;  %v4984_v50 = vld [vmem:[%s9183_s11 + $0x1b4] sm:$0xf0]  ;;  %v5450_v51 = vld [vmem:[%s9183_s11 + $0x548] sm:$0xf] }
 0x2f6   :  { %3549 = vmatpush.bf16.msra.mxu3 %v4839_v52  ;;  %v4927_v52 = vor.u32 %v5945_v44, %v4926_v43  ;;  %v6025_v43 = vld [vmem:[%s9183_s11 + $0x3c4] sm:$0xf]  ;;  %v5256_v44 = vld [vmem:[%s9183_s11 + $0x3dc] sm:$0xf0] }
 0x2f7   :  { %3558 = vmatpush.bf16.msrb.mxu0 %v5175_v54  ;;  %v5368_v54 = vld [vmem:[%s9183_s11 + $0x4bc] sm:$0xf0] }
 0x2f8   :  { %3523 = vmatpush.bf16.msra.mxu1 %v5283_v61  ;;  %v5371_v61 = vor.u32 %v6053_v53, %v5368_v54  ;;  %v6077_v53 = vld [vmem:[%s9183_s11 + $0x560] sm:$0xf0]  ;;  %v6018_v54 = vld [vmem:[%s9183_s11 + $0x38c] sm:$0xf] }
 0x2fa   :  { %v1941_v60 = vpop.f32.mrf.mxu1  ;;  %v1952_v4 = vpop.f32.mrf.mxu2  ;;  %3550 = vmatpush.bf16.msra.mxu3 %v4811_v62  ;;  %v6105_v62 = vld [vmem:[%s9183_s11 + $0x640] sm:$0xf0] }
 0x2fb   :  { %v1953_v19 = vadd.f32 %v1952_v4, %v1940_v12  ;;  %3559 = vmatpush.bf16.msrb.mxu0 %v5147_v2  ;;  %v6046_v2 = vld [vmem:[%s9183_s11 + $0x46c] sm:$0xf]  ;;  %v5563_v10 = vor.u32 %v6105_v62, %v5562_v59  ;;  %v5007_v12 = vor.u32 %v5962_v63, %v5004_v0  ;;  %v5534_v4 = vld [vmem:[%s9183_s11 + $0x5f0] sm:$0xf]  ;;  %v6123_v59 = vld [vmem:[%s9183_s11 + $0x6d4] sm:$0xf] }
 0x2fc   :  { %3524 = vmatpush.bf16.msra.mxu1 %v5255_v13  ;;  %v5343_v60 = vor.u32 %v6046_v2, %v5340_v3  ;;  %v6098_v13 = vld [vmem:[%s9183_s11 + $0x608] sm:$0xf0]  ;;  %v5094_v62 = vld [vmem:[%s9183_s11 + $0x278] sm:$0xf]  ;;  %v5987_v63 = vld [vmem:[%s9183_s11 + $0x290] sm:$0xf0] }
 0x2fd   :  { %v1959_v28 = vmax.f32 %v1953_v19, 0.0  ;;  %v5312_v19 = vld [vmem:[%s9183_s11 + $0x44c] sm:$0xf0]  ;;  %v5535_v24 = vor.u32 %v6098_v13, %v5534_v4  ;;  %v5430_v0 = vld [vmem:[%s9183_s11 + $0x518] sm:$0xf]  ;;  %v5095_v8 = vor.u32 %v5987_v63, %v5094_v62 }
 0x2fe   :  { %3551 = vmatpush.bf16.msra.mxu3 %v4783_v14  ;;  %v4871_v14 = vor.u32 %v5931_v6, %v4870_v5  ;;  %v5315_v25 = vor.u32 %v6039_v18, %v5312_v19  ;;  %v6071_v2 = vld [vmem:[%s9183_s11 + $0x530] sm:$0xf0]  ;;  %v5949_v3 = vld [vmem:[%s9183_s11 + $0x164] sm:$0xf]  ;;  %v4956_v5 = vld [vmem:[%s9183_s11 + $0x17c] sm:$0xf0] }
 0x2ff   :  { %v8399_v33 = vpack.c.bf16 %v1959_v28, %v1959_v28  ;;  %3560 = vmatpush.bf16.msrb.mxu0 %v5119_v20  ;;  %v4842_v20 = vld [vmem:[%s9183_s11 + $0x80] sm:$0xf]  ;;  %v4959_v4 = vor.u32 %v5949_v3, %v4956_v5  ;;  %v6064_v18 = vld [vmem:[%s9183_s11 + $0x4f8] sm:$0xf0]  ;;  %v5942_v19 = vld [vmem:[%s9183_s11 + $0x12c] sm:$0xf] }
 0x300   :  { %3525 = vmatpush.bf16.msra.mxu1 %v5227_v31  ;;  %v5284_v31 = vld [vmem:[%s9183_s11 + $0x414] sm:$0xf0]  ;;  %v5066_v13 = vld [vmem:[%s9183_s11 + $0x240] sm:$0xf]  ;;  %v6088_v62 = vld [vmem:[%s9183_s11 + $0x5bc] sm:$0xf] }
 0x301   :  { %3435 = vmatmul.bf16.vlgmr.msra.gmra.mxu2 %v8399_v33  ;;  %3552 = vmatmul.bf16.vlgmr.msra.gmra.mxu3 %v8092_v36  ;;  %v5287_v39 = vor.u32 %v6032_v30, %v5284_v31  ;;  %v6057_v30 = vld [vmem:[%s9183_s11 + $0x4c0] sm:$0xf0]  ;;  %v5935_v31 = vld [vmem:[%s9183_s11 + $0xf4] sm:$0xf]  ;;  %v5508_v63 = vld [vmem:[%s9183_s11 + $0x5d4] sm:$0xf0] }
 0x302   :  { %3596 = vmatpush.bf16.msrb.mxu3 %v4983_v21  ;;  %3531 = vmatpush.bf16.msra.mxu2 %v5647_v32  ;;  %v1954_v45 = vpop.f32.mrf.mxu2  ;;  %v5924_v21 = vld [vmem:[%s9183_s11 + $0x98] sm:$0xf0]  ;;  %v4814_v32 = vld [vmem:[%s9183_s11 + $0x48] sm:$0xf] }
 0x303   :  { %3561 = vmatpush.bf16.msrb.mxu0 %v5091_v34  ;;  %3526 = vmatmul.bf16.vlgmr.msra.gmra.mxu1 %v8247_v9  ;;  %v4843_v28 = vor.u32 %v5924_v21, %v4842_v20  ;;  %v5917_v34 = vld [vmem:[%s9183_s11 + $0x60] sm:$0xf0]  ;;  %v4786_v45 = vld [vmem:[%s9183_s11 + $0x10] sm:$0xf]  ;;  %v4928_v20 = vld [vmem:[%s9183_s11 + $0x144] sm:$0xf0] }
 0x304   :  { %3570 = vmatpush.bf16.msrb.mxu1 %v5427_v35  ;;  %v5150_v35 = vld [vmem:[%s9183_s11 + $0x2e8] sm:$0xf]  ;;  %v4815_v41 = vor.u32 %v5917_v34, %v4814_v32  ;;  %v4931_v26 = vor.u32 %v5942_v19, %v4928_v20  ;;  %v4900_v32 = vld [vmem:[%s9183_s11 + $0x10c] sm:$0xf0]  ;;  %v6036_v5 = vld [vmem:[%s9183_s11 + $0x418] sm:$0xf0] }
 0x305   :  { %v5151_v42 = vor.u32 %v6001_v37, %v5150_v35  ;;  %v6102_v37 = vld [vmem:[%s9183_s11 + $0x62c] sm:$0xf]  ;;  %v5907_v20 = vld [vmem:[%s9183_s11 + $0x14] sm:$0xf] }
 0x306   :  { %3597 = vmatpush.bf16.msrb.mxu3 %v4955_v40  ;;  %3532 = vmatpush.bf16.msra.mxu2 %v5619_v17  ;;  %v5478_v40 = vld [vmem:[%s9183_s11 + $0x580] sm:$0xf]  ;;  %v5910_v17 = vld [vmem:[%s9183_s11 + $0x28] sm:$0xf0] }
 0x307   :  { %3562 = vmatpush.bf16.msrb.mxu0 %v5063_v46  ;;  %v5122_v46 = vld [vmem:[%s9183_s11 + $0x2b0] sm:$0xf]  ;;  %v5479_v48 = vor.u32 %v6084_v11, %v5478_v40  ;;  %v4787_v55 = vor.u32 %v5910_v17, %v4786_v45  ;;  %v4903_v40 = vor.u32 %v5935_v31, %v4900_v32  ;;  %v4872_v45 = vld [vmem:[%s9183_s11 + $0xd4] sm:$0xf0]  ;;  %v6127_v32 = vld [vmem:[%s9183_s11 + $0x6f0] sm:$0xf0] }
 0x308   :  { %3571 = vmatpush.bf16.msrb.mxu1 %v5399_v47  ;;  %v5994_v47 = vld [vmem:[%s9183_s11 + $0x2c8] sm:$0xf0]  ;;  %v5010_v11 = vld [vmem:[%s9183_s11 + $0x1d0] sm:$0xf]  ;;  %v5654_v31 = vld [vmem:[%s9183_s11 + $0x6d8] sm:$0xf] }
 0x309   :  { %v5123_v56 = vor.u32 %v5994_v47, %v5122_v46  ;;  %v6012_v46 = vld [vmem:[%s9183_s11 + $0x35c] sm:$0xf]  ;;  %v5208_v47 = vld [vmem:[%s9183_s11 + $0x374] sm:$0xf0] }
 0x30a   :  { %3598 = vmatpush.bf16.msrb.mxu3 %v4927_v52  ;;  %3533 = vmatpush.bf16.msra.mxu2 %v5591_v58  ;;  %v5259_v52 = vor.u32 %v6025_v43, %v5256_v44  ;;  %v5228_v58 = vld [vmem:[%s9183_s11 + $0x3a4] sm:$0xf0]  ;;  %v6050_v43 = vld [vmem:[%s9183_s11 + $0x488] sm:$0xf0]  ;;  %v5928_v44 = vld [vmem:[%s9183_s11 + $0xbc] sm:$0xf] }
 0x30b   :  { %3563 = vmatpush.bf16.msrb.mxu0 %v5035_v57  ;;  %v5648_v57 = vld [vmem:[%s9183_s11 + $0x6ec] sm:$0xf0]  ;;  %v5231_v6 = vor.u32 %v6018_v54, %v5228_v58  ;;  %v5211_v54 = vor.u32 %v6012_v46, %v5208_v47  ;;  %v4844_v58 = vld [vmem:[%s9183_s11 + $0x9c] sm:$0xf0]  ;;  %v6120_v47 = vld [vmem:[%s9183_s11 + $0x6b8] sm:$0xf0] }
 0x30c   :  { %3572 = vmatpush.bf16.msrb.mxu1 %v5371_v61  ;;  %v4987_v61 = vor.u32 %v5956_v49, %v4984_v50  ;;  %v5651_v7 = vor.u32 %v6123_v59, %v5648_v57  ;;  %v6095_v49 = vld [vmem:[%s9183_s11 + $0x5f4] sm:$0xf]  ;;  %v5536_v50 = vld [vmem:[%s9183_s11 + $0x60c] sm:$0xf0]  ;;  %v6005_v57 = vld [vmem:[%s9183_s11 + $0x324] sm:$0xf] }
 0x30d   :  { %v5539_v59 = vor.u32 %v6095_v49, %v5536_v50  ;;  %v5626_v46 = vld [vmem:[%s9183_s11 + $0x6a0] sm:$0xf]  ;;  %v5977_v50 = vld [vmem:[%s9183_s11 + $0x244] sm:$0xf] }
 0x30e   :  { %3599 = vmatpush.bf16.msrb.mxu3 %v4899_v1  ;;  %3534 = vmatpush.bf16.msra.mxu2 %v5563_v10  ;;  %v5451_v1 = vor.u32 %v6077_v53, %v5450_v51  ;;  %v6116_v10 = vld [vmem:[%s9183_s11 + $0x69c] sm:$0xf]  ;;  %v4875_v51 = vor.u32 %v5928_v44, %v4872_v45  ;;  %v5318_v53 = vld [vmem:[%s9183_s11 + $0x438] sm:$0xf]  ;;  %v4962_v44 = vld [vmem:[%s9183_s11 + $0x168] sm:$0xf] }
 0x30f   :  { %3564 = vmatpush.bf16.msrb.mxu0 %v5007_v12  ;;  %v5620_v12 = vld [vmem:[%s9183_s11 + $0x6b4] sm:$0xf0]  ;;  %v5953_v45 = vld [vmem:[%s9183_s11 + $0x180] sm:$0xf0] }
 0x310   :  { %3573 = vmatpush.bf16.msrb.mxu1 %v5343_v60  ;;  %v5431_v60 = vor.u32 %v6071_v2, %v5430_v0  ;;  %v5623_v21 = vor.u32 %v6116_v10, %v5620_v12  ;;  %v5290_v2 = vld [vmem:[%s9183_s11 + $0x400] sm:$0xf]  ;;  %v5998_v10 = vld [vmem:[%s9183_s11 + $0x2ec] sm:$0xf]  ;;  %v5152_v12 = vld [vmem:[%s9183_s11 + $0x304] sm:$0xf0] }
 0x311   :  { %3487 = vmatmul.bf16.vlgmr.msrb.gmra.mxu2 %v8399_v33  ;;  %v5155_v19 = vor.u32 %v5998_v10, %v5152_v12  ;;  %v6106_v10 = vld [vmem:[%s9183_s11 + $0x648] sm:$0xf0] }
 0x312   :  { %3600 = vmatpush.bf16.msrb.mxu3 %v4871_v14  ;;  %3535 = vmatpush.bf16.msra.mxu2 %v5535_v24  ;;  %v5980_v14 = vld [vmem:[%s9183_s11 + $0x258] sm:$0xf0]  ;;  %v5592_v24 = vld [vmem:[%s9183_s11 + $0x67c] sm:$0xf0] }
 0x313   :  { %3609 = vmatpush.bf16.msra.mxu0 %v5207_v15  ;;  %v5402_v15 = vld [vmem:[%s9183_s11 + $0x4e0] sm:$0xf]  ;;  %v5067_v22 = vor.u32 %v5980_v14, %v5066_v13  ;;  %v5595_v34 = vor.u32 %v6109_v23, %v5592_v24  ;;  %v5291_v13 = vor.u32 %v6036_v5, %v5290_v2  ;;  %v5124_v24 = vld [vmem:[%s9183_s11 + $0x2cc] sm:$0xf0]  ;;  %v6054_v2 = vld [vmem:[%s9183_s11 + $0x4ac] sm:$0xf] }
 0x314   :  { %3565 = vmatmul.bf16.vlgmr.msrb.gmra.mxu0 %v8157_v16  ;;  %3574 = vmatpush.bf16.msrb.mxu1 %v5315_v25  ;;  %v5403_v25 = vor.u32 %v6064_v18, %v5402_v15  ;;  %v5262_v15 = vld [vmem:[%s9183_s11 + $0x3c8] sm:$0xf]  ;;  %v6029_v18 = vld [vmem:[%s9183_s11 + $0x3e0] sm:$0xf0] }
 0x316   :  { %3601 = vmatpush.bf16.msrb.mxu3 %v4843_v28  ;;  %3536 = vmatpush.bf16.msra.mxu2 %v5507_v38  ;;  %v5973_v28 = vld [vmem:[%s9183_s11 + $0x220] sm:$0xf0]  ;;  %v5564_v38 = vld [vmem:[%s9183_s11 + $0x644] sm:$0xf0] }
 0x317   :  { %3610 = vmatpush.bf16.msra.mxu0 %v5179_v29  ;;  %v5374_v29 = vld [vmem:[%s9183_s11 + $0x4a8] sm:$0xf]  ;;  %v5039_v35 = vor.u32 %v5973_v28, %v5038_v27  ;;  %v5567_v17 = vor.u32 %v6102_v37, %v5564_v38  ;;  %v6074_v27 = vld [vmem:[%s9183_s11 + $0x54c] sm:$0xf]  ;;  %v5234_v37 = vld [vmem:[%s9183_s11 + $0x390] sm:$0xf] }
 0x318   :  { %3575 = vmatpush.bf16.msrb.mxu1 %v5287_v39  ;;  %v5375_v39 = vor.u32 %v6057_v30, %v5374_v29  ;;  %v5452_v28 = vld [vmem:[%s9183_s11 + $0x564] sm:$0xf0]  ;;  %v5263_v29 = vor.u32 %v6029_v18, %v5262_v15  ;;  %v6022_v38 = vld [vmem:[%s9183_s11 + $0x3a8] sm:$0xf0]  ;;  %v6047_v15 = vld [vmem:[%s9183_s11 + $0x474] sm:$0xf] }
 0x319   :  { %v5348_v18 = vld [vmem:[%s9183_s11 + $0x48c] sm:$0xf0] }
 0x31a   :  { %3602 = vmatpush.bf16.msrb.mxu3 %v4815_v41  ;;  %3537 = vmatpush.bf16.msra.mxu2 %v5479_v48  ;;  %v5966_v41 = vld [vmem:[%s9183_s11 + $0x1e8] sm:$0xf0] }
 0x31b   :  { %3611 = vmatpush.bf16.msra.mxu0 %v5151_v42  ;;  %v5346_v42 = vld [vmem:[%s9183_s11 + $0x470] sm:$0xf]  ;;  %v5011_v48 = vor.u32 %v5966_v41, %v5010_v11  ;;  %v5096_v11 = vld [vmem:[%s9183_s11 + $0x294] sm:$0xf0]  ;;  %v6068_v41 = vld [vmem:[%s9183_s11 + $0x51c] sm:$0xf] }
 0x31c   :  { %3576 = vmatpush.bf16.msrb.mxu1 %v5259_v52  ;;  %v5347_v52 = vor.u32 %v6050_v43, %v5346_v42  ;;  %v5432_v42 = vld [vmem:[%s9183_s11 + $0x534] sm:$0xf0]  ;;  %v5655_v43 = vor.u32 %v6127_v32, %v5654_v31  ;;  %v6040_v31 = vld [vmem:[%s9183_s11 + $0x43c] sm:$0xf] }
 0x31d   :  { %v5435_v49 = vor.u32 %v6068_v41, %v5432_v42  ;;  %v5320_v32 = vld [vmem:[%s9183_s11 + $0x454] sm:$0xf0] }
 0x31e   :  { %3603 = vmatpush.bf16.msrb.mxu3 %v4787_v55  ;;  %3538 = vmatpush.bf16.msra.mxu2 %v5451_v1  ;;  %v6043_v55 = vld [vmem:[%s9183_s11 + $0x450] sm:$0xf0]  ;;  %v5323_v41 = vor.u32 %v6040_v31, %v5320_v32  ;;  %v6110_v32 = vld [vmem:[%s9183_s11 + $0x66c] sm:$0xf] }
 0x31f   :  { %3612 = vmatpush.bf16.msra.mxu0 %v5123_v56  ;;  %v5921_v56 = vld [vmem:[%s9183_s11 + $0x84] sm:$0xf]  ;;  %v5319_v0 = vor.u32 %v6043_v55, %v5318_v53  ;;  %v5627_v55 = vor.u32 %v6120_v47, %v5626_v46  ;;  %v5918_v47 = vld [vmem:[%s9183_s11 + $0x68] sm:$0xf0] }
 0x320   :  { %3577 = vmatpush.bf16.msrb.mxu1 %v5231_v6  ;;  %v4847_v1 = vor.u32 %v5921_v56, %v4844_v58  ;;  %v5914_v6 = vld [vmem:[%s9183_s11 + $0x4c] sm:$0xf]  ;;  %v6061_v53 = vld [vmem:[%s9183_s11 + $0x4e4] sm:$0xf]  ;;  %v4934_v56 = vld [vmem:[%s9183_s11 + $0x130] sm:$0xf] }
 0x321   :  { %3604 = vmatmul.bf16.vlgmr.msrb.gmra.mxu3 %v8092_v36  ;;  %3539 = vmatmul.bf16.vlgmr.msra.gmra.mxu2 %v8399_v33  ;;  %v5946_v58 = vld [vmem:[%s9183_s11 + $0x148] sm:$0xf0] }
 0x322   :  { %3648 = vmatpush.bf16.msra.mxu3 %v4987_v61  ;;  %3583 = vmatpush.bf16.msrb.mxu2 %v5651_v7  ;;  %v5180_v61 = vld [vmem:[%s9183_s11 + $0x33c] sm:$0xf0]  ;;  %v4816_v7 = vld [vmem:[%s9183_s11 + $0x64] sm:$0xf0] }
 0x323   :  { %3613 = vmatpush.bf16.msra.mxu0 %v5095_v8  ;;  %3578 = vmatmul.bf16.vlgmr.msrb.gmra.mxu1 %v8247_v9  ;;  %v5183_v3 = vor.u32 %v6005_v57, %v5180_v61  ;;  %v5511_v8 = vor.u32 %v6088_v62, %v5508_v63  ;;  %v4819_v14 = vor.u32 %v5914_v6, %v4816_v7  ;;  %v6113_v57 = vld [vmem:[%s9183_s11 + $0x680] sm:$0xf0]  ;;  %v5970_v63 = vld [vmem:[%s9183_s11 + $0x20c] sm:$0xf]  ;;  %v4906_v6 = vld [vmem:[%s9183_s11 + $0xf8] sm:$0xf] }
 0x324   :  { %3622 = vmatpush.bf16.msra.mxu1 %v5431_v60  ;;  %v6081_v60 = vld [vmem:[%s9183_s11 + $0x584] sm:$0xf]  ;;  %v5939_v7 = vld [vmem:[%s9183_s11 + $0x110] sm:$0xf0] }
 0x326   :  { %3649 = vmatpush.bf16.msra.mxu3 %v4959_v4  ;;  %3584 = vmatpush.bf16.msrb.mxu2 %v5623_v21  ;;  %v5480_v4 = vld [vmem:[%s9183_s11 + $0x59c] sm:$0xf0]  ;;  %v4788_v21 = vld [vmem:[%s9183_s11 + $0x2c] sm:$0xf0] }
 0x327   :  { %3614 = vmatpush.bf16.msra.mxu0 %v5067_v22  ;;  %v5991_v22 = vld [vmem:[%s9183_s11 + $0x2b4] sm:$0xf]  ;;  %v5483_v23 = vor.u32 %v6081_v60, %v5480_v4  ;;  %v4791_v30 = vor.u32 %v5907_v20, %v4788_v21  ;;  %v5932_v21 = vld [vmem:[%s9183_s11 + $0xd8] sm:$0xf0] }
 0x328   :  { %3623 = vmatpush.bf16.msra.mxu1 %v5403_v25  ;;  %v4990_v25 = vld [vmem:[%s9183_s11 + $0x1a0] sm:$0xf]  ;;  %v5963_v4 = vld [vmem:[%s9183_s11 + $0x1d4] sm:$0xf] }
 0x32a   :  { %3650 = vmatpush.bf16.msra.mxu3 %v4931_v26  ;;  %3585 = vmatpush.bf16.msrb.mxu2 %v5595_v34  ;;  %v5960_v26 = vld [vmem:[%s9183_s11 + $0x1b8] sm:$0xf0]  ;;  %v5127_v34 = vor.u32 %v5991_v22, %v5124_v24  ;;  %v5214_v22 = vld [vmem:[%s9183_s11 + $0x360] sm:$0xf]  ;;  %v5542_v24 = vld [vmem:[%s9183_s11 + $0x5f8] sm:$0xf] }
 0x32b   :  { %3615 = vmatpush.bf16.msra.mxu0 %v5039_v35  ;;  %v4991_v35 = vor.u32 %v5960_v26, %v4990_v25  ;;  %v6099_v25 = vld [vmem:[%s9183_s11 + $0x610] sm:$0xf0] }
 0x32c   :  { %3624 = vmatpush.bf16.msra.mxu1 %v5375_v39  ;;  %v5984_v39 = vld [vmem:[%s9183_s11 + $0x27c] sm:$0xf] }
 0x32e   :  { %3651 = vmatpush.bf16.msra.mxu3 %v4903_v40  ;;  %3586 = vmatpush.bf16.msrb.mxu2 %v5567_v17  ;;  %v5455_v40 = vor.u32 %v6074_v27, %v5452_v28  ;;  %v5235_v17 = vor.u32 %v6022_v38, %v5234_v37  ;;  %v5351_v27 = vor.u32 %v6047_v15, %v5348_v18  ;;  %v5925_v37 = vld [vmem:[%s9183_s11 + $0xa0] sm:$0xf0]  ;;  %v5186_v38 = vld [vmem:[%s9183_s11 + $0x328] sm:$0xf]  ;;  %v6072_v15 = vld [vmem:[%s9183_s11 + $0x538] sm:$0xf0] }
 0x32f   :  { %3616 = vmatpush.bf16.msra.mxu0 %v5011_v48  ;;  %v5099_v48 = vor.u32 %v5984_v39, %v5096_v11  ;;  %v6009_v39 = vld [vmem:[%s9183_s11 + $0x340] sm:$0xf0]  ;;  %v6092_v11 = vld [vmem:[%s9183_s11 + $0x5d8] sm:$0xf0] }
 0x330   :  { %3625 = vmatpush.bf16.msra.mxu1 %v5347_v52  ;;  %v4963_v52 = vor.u32 %v5953_v45, %v4962_v44  ;;  %v6033_v44 = vld [vmem:[%s9183_s11 + $0x404] sm:$0xf]  ;;  %v5292_v45 = vld [vmem:[%s9183_s11 + $0x41c] sm:$0xf0] }
 0x332   :  { %3652 = vmatpush.bf16.msra.mxu3 %v4875_v51  ;;  %3587 = vmatpush.bf16.msrb.mxu2 %v5539_v59  ;;  %v5068_v51 = vld [vmem:[%s9183_s11 + $0x25c] sm:$0xf0]  ;;  %v5598_v59 = vld [vmem:[%s9183_s11 + $0x668] sm:$0xf] }
 0x333   :  { %3661 = vmatpush.bf16.msrb.mxu0 %v5211_v54  ;;  %v5404_v54 = vld [vmem:[%s9183_s11 + $0x4fc] sm:$0xf0]  ;;  %v5071_v61 = vor.u32 %v5977_v50, %v5068_v51  ;;  %v5599_v5 = vor.u32 %v6113_v57, %v5598_v59  ;;  %v5486_v50 = vld [vmem:[%s9183_s11 + $0x588] sm:$0xf]  ;;  %v5295_v51 = vor.u32 %v6033_v44, %v5292_v45  ;;  %v4794_v59 = vld [vmem:[%s9183_s11 + $0x18] sm:$0xf] }
 0x334   :  { %3617 = vmatmul.bf16.vlgmr.msra.gmra.mxu0 %v8157_v16  ;;  %3626 = vmatpush.bf16.msra.mxu1 %v5319_v0  ;;  %v5407_v62 = vor.u32 %v6061_v53, %v5404_v54  ;;  %v4935_v0 = vor.u32 %v5946_v58, %v4934_v56  ;;  %v6026_v56 = vld [vmem:[%s9183_s11 + $0x3cc] sm:$0xf]  ;;  %v5264_v58 = vld [vmem:[%s9183_s11 + $0x3e4] sm:$0xf0] }
 0x336   :  { %3653 = vmatpush.bf16.msra.mxu3 %v4847_v1  ;;  %3588 = vmatpush.bf16.msrb.mxu2 %v5511_v8  ;;  %v5040_v1 = vld [vmem:[%s9183_s11 + $0x224] sm:$0xf0]  ;;  %v5570_v8 = vld [vmem:[%s9183_s11 + $0x630] sm:$0xf] }
 0x337   :  { %3662 = vmatpush.bf16.msrb.mxu0 %v5183_v3  ;;  %v5376_v3 = vld [vmem:[%s9183_s11 + $0x4c4] sm:$0xf0]  ;;  %v5043_v12 = vor.u32 %v5970_v63, %v5040_v1  ;;  %v5571_v20 = vor.u32 %v6106_v10, %v5570_v8  ;;  %v5995_v63 = vld [vmem:[%s9183_s11 + $0x2d0] sm:$0xf0]  ;;  %v5458_v1 = vld [vmem:[%s9183_s11 + $0x550] sm:$0xf] }
 0x338   :  { %3627 = vmatpush.bf16.msra.mxu1 %v5291_v13  ;;  %v5379_v60 = vor.u32 %v6054_v2, %v5376_v3  ;;  %v5012_v13 = vld [vmem:[%s9183_s11 + $0x1ec] sm:$0xf0]  ;;  %v6078_v2 = vld [vmem:[%s9183_s11 + $0x568] sm:$0xf0]  ;;  %v5267_v3 = vor.u32 %v6026_v56, %v5264_v58  ;;  %v6019_v10 = vld [vmem:[%s9183_s11 + $0x394] sm:$0xf] }
 0x339   :  { %v5015_v26 = vor.u32 %v5963_v4, %v5012_v13  ;;  %v5459_v4 = vor.u32 %v6078_v2, %v5458_v1  ;;  %v5988_v13 = vld [vmem:[%s9183_s11 + $0x298] sm:$0xf0]  ;;  %v5326_v56 = vld [vmem:[%s9183_s11 + $0x440] sm:$0xf]  ;;  %v5298_v1 = vld [vmem:[%s9183_s11 + $0x408] sm:$0xf] }
 0x33a   :  { %3654 = vmatpush.bf16.msra.mxu3 %v4819_v14  ;;  %3589 = vmatpush.bf16.msrb.mxu2 %v5483_v23  ;;  %v4907_v14 = vor.u32 %v5939_v7, %v4906_v6  ;;  %v6016_v23 = vld [vmem:[%s9183_s11 + $0x378] sm:$0xf0]  ;;  %v5656_v6 = vld [vmem:[%s9183_s11 + $0x6f4] sm:$0xf0]  ;;  %v6037_v2 = vld [vmem:[%s9183_s11 + $0x420] sm:$0xf0] }
 0x33b   :  { %3663 = vmatpush.bf16.msrb.mxu0 %v5155_v19  ;;  %v4878_v19 = vld [vmem:[%s9183_s11 + $0xc0] sm:$0xf]  ;;  %v6044_v58 = vld [vmem:[%s9183_s11 + $0x458] sm:$0xf0] }
 0x33c   :  { %3628 = vmatpush.bf16.msra.mxu1 %v5263_v29  ;;  %v4879_v29 = vor.u32 %v5932_v21, %v4878_v19  ;;  %v5628_v21 = vld [vmem:[%s9183_s11 + $0x6bc] sm:$0xf0] }
 0x33e   :  { %3655 = vmatpush.bf16.msra.mxu3 %v4791_v30  ;;  %3590 = vmatpush.bf16.msrb.mxu2 %v5455_v40  ;;  %v5215_v30 = vor.u32 %v6016_v23, %v5214_v22  ;;  %v5514_v40 = vld [vmem:[%s9183_s11 + $0x5c0] sm:$0xf] }
 0x33f   :  { %3664 = vmatpush.bf16.msrb.mxu0 %v5127_v34  ;;  %v4850_v34 = vld [vmem:[%s9183_s11 + $0x88] sm:$0xf]  ;;  %v5515_v46 = vor.u32 %v6092_v11, %v5514_v40  ;;  %v6058_v40 = vld [vmem:[%s9183_s11 + $0x4c8] sm:$0xf0] }
 0x340   :  { %3629 = vmatpush.bf16.msra.mxu1 %v5235_v17  ;;  %v4851_v42 = vor.u32 %v5925_v37, %v4850_v34  ;;  %v4822_v17 = vld [vmem:[%s9183_s11 + $0x50] sm:$0xf]  ;;  %v5600_v34 = vld [vmem:[%s9183_s11 + $0x684] sm:$0xf0] }
 0x341   :  { %3656 = vmatmul.bf16.vlgmr.msra.gmra.mxu3 %v8092_v36  ;;  %3591 = vmatmul.bf16.vlgmr.msrb.gmra.mxu2 %v8399_v33  ;;  %v4823_v54 = vor.u32 %v5918_v47, %v4822_v17  ;;  %v5603_v11 = vor.u32 %v6110_v32, %v5600_v34  ;;  %v5018_v17 = vld [vmem:[%s9183_s11 + $0x1d8] sm:$0xf]  ;;  %v5606_v32 = vld [vmem:[%s9183_s11 + $0x670] sm:$0xf]  ;;  %v6114_v34 = vld [vmem:[%s9183_s11 + $0x688] sm:$0xf0] }
 0x342   :  { %3700 = vmatpush.bf16.msrb.mxu3 %v4991_v35  ;;  %3635 = vmatpush.bf16.msra.mxu2 %v5655_v43  ;;  %v5543_v35 = vor.u32 %v6099_v25, %v5542_v24  ;;  %v5187_v43 = vor.u32 %v6009_v39, %v5186_v38  ;;  %v5074_v25 = vld [vmem:[%s9183_s11 + $0x248] sm:$0xf]  ;;  %v5046_v38 = vld [vmem:[%s9183_s11 + $0x210] sm:$0xf]  ;;  %v5354_v47 = vld [vmem:[%s9183_s11 + $0x478] sm:$0xf] }
 0x343   :  { %3665 = vmatpush.bf16.msrb.mxu0 %v5099_v48  ;;  %3630 = vmatmul.bf16.vlgmr.msra.gmra.mxu1 %v8247_v9  ;;  %v5158_v48 = vld [vmem:[%s9183_s11 + $0x2f0] sm:$0xf] }
 0x344   :  { %3674 = vmatpush.bf16.msrb.mxu1 %v5435_v49  ;;  %v8881_v28 = vpop.f32.mrf.mxu3  ;;  %v6002_v49 = vld [vmem:[%s9183_s11 + $0x308] sm:$0xf0]  ;;  %v5382_v39 = vld [vmem:[%s9183_s11 + $0x4b0] sm:$0xf] }
 0x345   :  { %v5383_v45 = vor.u32 %v6058_v40, %v5382_v39  ;;  %v5578_v40 = vld [vmem:[%s9183_s11 + $0x638] sm:$0xf] }
 0x346   :  { %3701 = vmatpush.bf16.msrb.mxu3 %v4963_v52  ;;  %3636 = vmatpush.bf16.msra.mxu2 %v5627_v55  ;;  %v6085_v52 = vld [vmem:[%s9183_s11 + $0x5a0] sm:$0xf0]  ;;  %v5159_v55 = vor.u32 %v6002_v49, %v5158_v48  ;;  %v6051_v48 = vld [vmem:[%s9183_s11 + $0x490] sm:$0xf0] }
 0x347   :  { %3666 = vmatpush.bf16.msrb.mxu0 %v5071_v61  ;;  %v5487_v57 = vor.u32 %v6085_v52, %v5486_v50  ;;  %v5911_v61 = vld [vmem:[%s9183_s11 + $0x30] sm:$0xf0] }
 0x348   :  { %3675 = vmatpush.bf16.msrb.mxu1 %v5407_v62  ;;  %v5130_v62 = vld [vmem:[%s9183_s11 + $0x2b8] sm:$0xf]  ;;  %v4795_v7 = vor.u32 %v5911_v61, %v4794_v59  ;;  %v5516_v61 = vld [vmem:[%s9183_s11 + $0x5dc] sm:$0xf0] }
 0x349   :  { %v5131_v8 = vor.u32 %v5995_v63, %v5130_v62  ;;  %v5327_v63 = vor.u32 %v6044_v58, %v5326_v56 }
 0x34a   :  { %3702 = vmatpush.bf16.msrb.mxu3 %v4935_v0  ;;  %3637 = vmatpush.bf16.msra.mxu2 %v5599_v5  ;;  %v6124_v5 = vld [vmem:[%s9183_s11 + $0x6dc] sm:$0xf] }
 0x34b   :  { %3667 = vmatpush.bf16.msrb.mxu0 %v5043_v12  ;;  %v5236_v12 = vld [vmem:[%s9183_s11 + $0x3ac] sm:$0xf0]  ;;  %v5659_v18 = vor.u32 %v6124_v5, %v5656_v6 }
 0x34c   :  { %3676 = vmatpush.bf16.msrb.mxu1 %v5379_v60  ;;  %v3399_v53 = vpop.f32.mrf.mxu3  ;;  %v5102_v60 = vld [vmem:[%s9183_s11 + $0x280] sm:$0xf]  ;;  %v5239_v19 = vor.u32 %v6019_v10, %v5236_v12  ;;  %v5299_v10 = vor.u32 %v6037_v2, %v5298_v1  ;;  %v5270_v12 = vld [vmem:[%s9183_s11 + $0x3d0] sm:$0xf] }
 0x34d   :  { %v5103_v23 = vor.u32 %v5988_v13, %v5102_v60  ;;  %v5544_v53 = vld [vmem:[%s9183_s11 + $0x614] sm:$0xf0]  ;;  %v6030_v60 = vld [vmem:[%s9183_s11 + $0x3e8] sm:$0xf0]  ;;  %v5460_v13 = vld [vmem:[%s9183_s11 + $0x56c] sm:$0xf0] }
 0x34e   :  { %3703 = vmatpush.bf16.msrb.mxu3 %v4907_v14  ;;  %3638 = vmatpush.bf16.msra.mxu2 %v5571_v20  ;;  %v8950_v0 = vpop.f32.mrf.mxu0  ;;  %v5438_v14 = vld [vmem:[%s9183_s11 + $0x520] sm:$0xf]  ;;  %v6117_v20 = vld [vmem:[%s9183_s11 + $0x6a4] sm:$0xf] }
 0x34f   :  { %3668 = vmatpush.bf16.msrb.mxu0 %v5015_v26  ;;  %v5439_v24 = vor.u32 %v6072_v15, %v5438_v14  ;;  %v5981_v26 = vld [vmem:[%s9183_s11 + $0x260] sm:$0xf0]  ;;  %v5631_v31 = vor.u32 %v6117_v20, %v5628_v21  ;;  %v5271_v15 = vor.u32 %v6030_v60, %v5270_v12  ;;  %v5242_v20 = vld [vmem:[%s9183_s11 + $0x398] sm:$0xf]  ;;  %v6023_v21 = vld [vmem:[%s9183_s11 + $0x3b0] sm:$0xf0] }
 0x350   :  { %3677 = vmatpush.bf16.msrb.mxu1 %v5351_v27  ;;  %v5410_v27 = vld [vmem:[%s9183_s11 + $0x4e8] sm:$0xf] }
 0x352   :  { %3704 = vmatpush.bf16.msrb.mxu3 %v4879_v29  ;;  %3639 = vmatpush.bf16.msra.mxu2 %v5543_v35  ;;  %v6065_v29 = vld [vmem:[%s9183_s11 + $0x500] sm:$0xf0]  ;;  %v5075_v35 = vor.u32 %v5981_v26, %v5074_v25 }
 0x353   :  { %3713 = vmatpush.bf16.msra.mxu0 %v5215_v30  ;;  %v5411_v37 = vor.u32 %v6065_v29, %v5410_v27  ;;  %v5243_v27 = vor.u32 %v6023_v21, %v5242_v20  ;;  %v5634_v29 = vld [vmem:[%s9183_s11 + $0x6a8] sm:$0xf] }
 0x354   :  { %3669 = vmatmul.bf16.vlgmr.msrb.gmra.mxu0 %v8157_v16  ;;  %3678 = vmatpush.bf16.msrb.mxu1 %v5323_v41  ;;  %v8988_v22 = vpop.f32.mrf.mxu3  ;;  %v6103_v41 = vld [vmem:[%s9183_s11 + $0x634] sm:$0xf] }
 0x356   :  { %3705 = vmatpush.bf16.msrb.mxu3 %v4851_v42  ;;  %3640 = vmatpush.bf16.msra.mxu2 %v5515_v46  ;;  %v3412_v30 = vpop.f32.mrf.mxu0  ;;  %v5572_v42 = vld [vmem:[%s9183_s11 + $0x64c] sm:$0xf0]  ;;  %v5967_v46 = vld [vmem:[%s9183_s11 + $0x1f0] sm:$0xf0] }
 0x357   :  { %3714 = vmatpush.bf16.msra.mxu0 %v5187_v43  ;;  %v5575_v50 = vor.u32 %v6103_v41, %v5572_v42  ;;  %v6121_v30 = vld [vmem:[%s9183_s11 + $0x6c0] sm:$0xf0] }
 0x358   :  { %3679 = vmatpush.bf16.msrb.mxu1 %v5295_v51  ;;  %v6096_v51 = vld [vmem:[%s9183_s11 + $0x5fc] sm:$0xf] }
 0x359   :  { %v5547_v59 = vor.u32 %v6096_v51, %v5544_v53 }
 0x35a   :  { %3706 = vmatpush.bf16.msrb.mxu3 %v4823_v54  ;;  %3641 = vmatpush.bf16.msra.mxu2 %v5487_v57  ;;  %v5019_v54 = vor.u32 %v5967_v46, %v5018_v17  ;;  %v6089_v57 = vld [vmem:[%s9183_s11 + $0x5c4] sm:$0xf] }
 0x35b   :  { %3715 = vmatpush.bf16.msra.mxu0 %v5159_v55  ;;  %v5355_v55 = vor.u32 %v6051_v48, %v5354_v47  ;;  %v5519_v5 = vor.u32 %v6089_v57, %v5516_v61  ;;  %v5522_v47 = vld [vmem:[%s9183_s11 + $0x5c8] sm:$0xf]  ;;  %v6079_v57 = vld [vmem:[%s9183_s11 + $0x570] sm:$0xf0] }
 0x35c   :  { %3680 = vmatpush.bf16.msrb.mxu1 %v5267_v3  ;;  %v3451_v43 = vpop.f32.mrf.mxu3 }
 0x35d   :  { %v6100_v43 = vld [vmem:[%s9183_s11 + $0x618] sm:$0xf0] }
 0x35e   :  { %3707 = vmatpush.bf16.msrb.mxu3 %v4795_v7  ;;  %3642 = vmatpush.bf16.msra.mxu2 %v5459_v4  ;;  %v9041_v49 = vpop.f32.mrf.mxu0  ;;  %v6082_v7 = vld [vmem:[%s9183_s11 + $0x58c] sm:$0xf]  ;;  %v6075_v4 = vld [vmem:[%s9183_s11 + $0x554] sm:$0xf] }
 0x35f   :  { %3716 = vmatpush.bf16.msra.mxu0 %v5131_v8  ;;  %v9043_v52 = vpop.f32.mrf.mxu1  ;;  %v5488_v8 = vld [vmem:[%s9183_s11 + $0x5a4] sm:$0xf0] }
 0x360   :  { %3681 = vmatpush.bf16.msrb.mxu1 %v5239_v19  ;;  %v6128_v19 = vld [vmem:[%s9183_s11 + $0x6f8] sm:$0xf0] }
 0x361   :  { %3708 = vmatmul.bf16.vlgmr.msrb.gmra.mxu3 %v8092_v36  ;;  %3643 = vmatmul.bf16.vlgmr.msra.gmra.mxu2 %v8399_v33  ;;  %v5974_v36 = vld [vmem:[%s9183_s11 + $0x228] sm:$0xf0] }
 0x362   :  { %3687 = vmatpush.bf16.msrb.mxu2 %v5659_v18  ;;  %v5047_v44 = vor.u32 %v5974_v36, %v5046_v38  ;;  %v5662_v18 = vld [vmem:[%s9183_s11 + $0x6e0] sm:$0xf]  ;;  %v5607_v36 = vor.u32 %v6114_v34, %v5606_v32 }
 0x363   :  { %3717 = vmatpush.bf16.msra.mxu0 %v5103_v23  ;;  %3682 = vmatmul.bf16.vlgmr.msrb.gmra.mxu1 %v8247_v9  ;;  %v5663_v26 = vor.u32 %v6128_v19, %v5662_v18 }
 0x364   :  { %3726 = vmatpush.bf16.msra.mxu1 %v5439_v24  ;;  %v9063_v62 = vpop.f32.mrf.mxu3  ;;  %v5463_v24 = vor.u32 %v6075_v4, %v5460_v13 }
 0x366   :  { %3688 = vmatpush.bf16.msrb.mxu2 %v5631_v31  ;;  %v3464_v3 = vpop.f32.mrf.mxu0  ;;  %v5635_v31 = vor.u32 %v6121_v30, %v5634_v29 }
 0x367   :  { %3718 = vmatpush.bf16.msra.mxu0 %v5075_v35  ;;  %v3425_v6 = vpop.f32.mrf.mxu1  ;;  %v9119_v35 = vld [vmem:[%s9184_s12] sm:$0x7f] }
 0x368   :  { %3727 = vmatpush.bf16.msra.mxu1 %v5411_v37  ;;  %v2222_v39 = vperm.slane %v9119_v35, 0  ;;  %v2223_v58 = vperm.slane %v9119_v35, 1  ;;  %v2224_v13 = vperm.slane %v9119_v35, 2 }
 0x36a   :  { %3689 = vmatpush.bf16.msrb.mxu2 %v5603_v11  ;;  %v6107_v11 = vld [vmem:[%s9183_s11 + $0x650] sm:$0xf0]  ;;  %v3398_v42 = vadd.f32 %v8881_v28, %v2222_v39  ;;  %v6093_v28 = vld [vmem:[%s9183_s11 + $0x5e0] sm:$0xf0]  ;;  %v3450_v3 = vadd.f32 %v8988_v22, %v2223_v58  ;;  %v3502_v18 = vadd.f32 %v9063_v62, %v2224_v13  ;;  %v2225_v62 = vperm.slane %v9119_v35, 3 }
 0x36b   :  { %3719 = vmatpush.bf16.msra.mxu0 %v5047_v44  ;;  %v5579_v41 = vor.u32 %v6107_v11, %v5578_v40  ;;  %v5523_v53 = vor.u32 %v6093_v28, %v5522_v47 }
 0x36c   :  { %3728 = vmatpush.bf16.msra.mxu1 %v5383_v45  ;;  %v3503_v14 = vpop.f32.mrf.mxu3  ;;  %v3411_v44 = vadd.f32 %v8950_v0, %v3398_v42  ;;  %v5494_v0 = vld [vmem:[%s9183_s11 + $0x590] sm:$0xf] }
 0x36e   :  { %3690 = vmatpush.bf16.msrb.mxu2 %v5575_v50  ;;  %v3424_v46 = vadd.f32 %v9043_v52, %v3411_v44  ;;  %v6086_v52 = vld [vmem:[%s9183_s11 + $0x5a8] sm:$0xf0] }
 0x36f   :  { %3720 = vmatpush.bf16.msra.mxu0 %v5019_v54  ;;  %v9102_v23 = vpop.f32.mrf.mxu0  ;;  %v5495_v56 = vor.u32 %v6086_v52, %v5494_v0 }
 0x370   :  { %3729 = vmatpush.bf16.msra.mxu1 %v5355_v55  ;;  %v3475_v25 = vpop.f32.mrf.mxu1 }
 0x372   :  { %3691 = vmatpush.bf16.msrb.mxu2 %v5547_v59  ;;  %3721 = vmatmul.bf16.vlgmr.msra.gmra.mxu0 %v8157_v16  ;;  %v5491_v16 = vor.u32 %v6082_v7, %v5488_v8  ;;  %v5466_v59 = vld [vmem:[%s9183_s11 + $0x558] sm:$0xf]  ;;  %v3463_v7 = vadd.f32 %v9041_v49, %v3450_v3  ;;  %v3515_v49 = vadd.f32 %v9102_v23, %v3502_v18 }
 0x373   :  { %v5467_v1 = vor.u32 %v6079_v57, %v5466_v59 }
 0x374   :  { %3730 = vmatpush.bf16.msra.mxu1 %v5327_v63 }
 0x376   :  { %3692 = vmatpush.bf16.msrb.mxu2 %v5519_v5 }
 0x377   :  { %v3516_v37 = vpop.f32.mrf.mxu0 }
 0x378   :  { %3731 = vmatpush.bf16.msra.mxu1 %v5299_v10  ;;  %v3477_v38 = vpop.f32.mrf.mxu1  ;;  %v3476_v10 = vadd.f32 %v3475_v25, %v3463_v7 }
 0x37a   :  { %3693 = vmatpush.bf16.msrb.mxu2 %v5491_v16 }
 0x37c   :  { %3732 = vmatpush.bf16.msra.mxu1 %v5271_v15 }
 0x37e   :  { %3694 = vmatpush.bf16.msrb.mxu2 %v5463_v24 }
 0x380   :  { %3733 = vmatpush.bf16.msra.mxu1 %v5243_v27  ;;  %v3527_v45 = vpop.f32.mrf.mxu1 }
 0x381   :  { %3695 = vmatmul.bf16.vlgmr.msrb.gmra.mxu2 %v8399_v33  ;;  %v3528_v24 = vadd.f32 %v3527_v45, %v3515_v49 }
 0x382   :  { %3739 = vmatpush.bf16.msra.mxu2 %v5663_v26 }
 0x383   :  { %3734 = vmatmul.bf16.vlgmr.msra.gmra.mxu1 %v8247_v9  ;;  %v5550_v9 = vld [vmem:[%s9183_s11 + $0x600] sm:$0xf]  ;;  %s6171_s11 = smov [#allocation2]  }
 0x384   :  { %v5551_v17 = vor.u32 %v6100_v43, %v5550_v9  ;;  %v3436_v48 = vpop.f32.mrf.mxu2  ;;  %v3553_v50 = vpop.f32.mrf.mxu3  ;;  %s3792_s23 = sshll.u32 %s6171_s11, 4  ;;  %s3793_s23 = int_to_ptr.vmem [resolvable:$true] %s3792_s23 }
 0x385   :  { %v3437_v51 = vadd.f32 %v3436_v48, %v3424_v46  ;;  %v3554_v23 = vadd.f32 %v3553_v50, %v2225_v62 }
 0x386   :  { %3740 = vmatpush.bf16.msra.mxu2 %v5635_v31 }
 0x387   :  { %v3752_v54 = vmul.f32 0.5, %v3437_v51  ;;  %v2226_v51 = vperm.slane %v9119_v35, 4 }
 0x388   :  { %v3529_v55 = vpop.f32.mrf.mxu1 }
 0x389   :  { %6131 = vtanh.f32 %v3752_v54 }
 0x38a   :  { %3741 = vmatpush.bf16.msra.mxu2 %v5607_v36 }
 0x38c   :  { %v3438_v61 = vpop.f32.mrf.mxu2  ;;  %v3555_v63 = vpop.f32.mrf.mxu3 }
 0x38e   :  { %3742 = vmatpush.bf16.msra.mxu2 %v5579_v41 }
 0x38f   :  { %v6132_v2 = vpop.eup %6131 }
 0x390   :  { %v3766_v6 = vmul.f32 0.5, %v6132_v2 }
 0x391   :  { %v3566_v5 = vpop.f32.mrf.mxu0 }
 0x392   :  { %3743 = vmatpush.bf16.msra.mxu2 %v5551_v17  ;;  %v3773_v8 = vadd.f32 0.5, %v3766_v6  ;;  %v3567_v39 = vadd.f32 %v3566_v5, %v3554_v23  ;;  %v2227_v6 = vperm.slane %v9119_v35, 5 }
 0x394   :  { %3780 = vst [vmem:[#allocation2] sm:$0xff] %v3773_v8  ;;  %v3488_v12 = vpop.f32.mrf.mxu2 }
 0x395   :  { %v3489_v60 = vadd.f32 %v3488_v12, %v3476_v10 }
 0x396   :  { %3744 = vmatpush.bf16.msra.mxu2 %v5523_v53 }
 0x397   :  { %v3753_v16 = vmul.f32 0.5, %v3489_v60 }
 0x399   :  { %v3568_v4 = vpop.f32.mrf.mxu0  ;;  %6133 = vtanh.f32 %v3753_v16 }
 0x39a   :  { %3745 = vmatpush.bf16.msra.mxu2 %v5495_v56 }
 0x39c   :  { %v3490_v14 = vpop.f32.mrf.mxu2 }
 0x39e   :  { %3746 = vmatpush.bf16.msra.mxu2 %v5467_v1 }
 0x39f   :  { %v6134_v15 = vpop.eup %6133 }
 0x3a0   :  { %v3579_v22 = vpop.f32.mrf.mxu1  ;;  %v3767_v19 = vmul.f32 0.5, %v6134_v15 }
 0x3a1   :  { %3747 = vmatmul.bf16.vlgmr.msra.gmra.mxu2 %v8399_v33  ;;  %v3580_v11 = vadd.f32 %v3579_v22, %v3567_v39 }
 0x3a2   :  { %v3774_v20 = vadd.f32 0.5, %v3767_v19  ;;  %v2228_v19 = vperm.slane %v9119_v35, 6 }
 0x3a4   :  { %v3605_v21 = vpop.f32.mrf.mxu3  ;;  %3781 = vst [vmem:[#allocation2 + $0x8] sm:$0xff] %v3774_v20  ;;  %v3540_v25 = vpop.f32.mrf.mxu2 }
 0x3a5   :  { %v3541_v26 = vadd.f32 %v3540_v25, %v3528_v24  ;;  %v3606_v50 = vadd.f32 %v3605_v21, %v2226_v51 }
 0x3a7   :  { %v3754_v27 = vmul.f32 0.5, %v3541_v26 }
 0x3a8   :  { %v3581_v33 = vpop.f32.mrf.mxu1 }
 0x3a9   :  { %6135 = vtanh.f32 %v3754_v27 }
 0x3ac   :  { %v3607_v29 = vpop.f32.mrf.mxu3  ;;  %v3542_v31 = vpop.f32.mrf.mxu2 }
 0x3af   :  { %v6136_v32 = vpop.eup %6135 }
 0x3b0   :  { %v3768_v34 = vmul.f32 0.5, %v6136_v32 }
 0x3b1   :  { %v3618_v30 = vpop.f32.mrf.mxu0 }
 0x3b2   :  { %v3775_v37 = vadd.f32 0.5, %v3768_v34  ;;  %v3619_v54 = vadd.f32 %v3618_v30, %v3606_v50 }
 0x3b4   :  { %3782 = vst [vmem:[#allocation2 + $0x10] sm:$0xff] %v3775_v37 }
 0x3b9   :  { %v3620_v38 = vpop.f32.mrf.mxu0 }
 0x3c0   :  { %v3631_v36 = vpop.f32.mrf.mxu1 }
 0x3c1   :  { %v3632_v52 = vadd.f32 %v3631_v36, %v3619_v54 }
 0x3c4   :  { %v3657_v40 = vpop.f32.mrf.mxu3  ;;  %v3592_v41 = vpop.f32.mrf.mxu2 }
 0x3c5   :  { %v3593_v42 = vadd.f32 %v3592_v41, %v3580_v11  ;;  %v3658_v7 = vadd.f32 %v3657_v40, %v2227_v6 }
 0x3c7   :  { %v3755_v9 = vmul.f32 0.5, %v3593_v42 }
 0x3c8   :  { %v3633_v43 = vpop.f32.mrf.mxu1 }
 0x3c9   :  { %6137 = vtanh.f32 %v3755_v9 }
 0x3cc   :  { %v3659_v44 = vpop.f32.mrf.mxu3  ;;  %v3594_v45 = vpop.f32.mrf.mxu2 }
 0x3cf   :  { %v6138_v46 = vpop.eup %6137 }
 0x3d0   :  { %v3769_v47 = vmul.f32 0.5, %v6138_v46 }
 0x3d1   :  { %v3670_v17 = vpop.f32.mrf.mxu0 }
 0x3d2   :  { %v3776_v28 = vadd.f32 0.5, %v3769_v47  ;;  %v3671_v10 = vadd.f32 %v3670_v17, %v3658_v7 }
 0x3d4   :  { %3783 = vst [vmem:[#allocation2 + $0x18] sm:$0xff] %v3776_v28 }
 0x3d9   :  { %v3672_v48 = vpop.f32.mrf.mxu0 }
 0x3e0   :  { %v3683_v53 = vpop.f32.mrf.mxu1 }
 0x3e1   :  { %v3684_v12 = vadd.f32 %v3683_v53, %v3671_v10 }
 0x3e4   :  { %v3709_v0 = vpop.f32.mrf.mxu3  ;;  %v3644_v55 = vpop.f32.mrf.mxu2 }
 0x3e5   :  { %v3645_v56 = vadd.f32 %v3644_v55, %v3632_v52  ;;  %v3710_v49 = vadd.f32 %v3709_v0, %v2228_v19 }
 0x3e7   :  { %v3756_v58 = vmul.f32 0.5, %v3645_v56 }
 0x3e8   :  { %v3685_v59 = vpop.f32.mrf.mxu1 }
 0x3e9   :  { %6139 = vtanh.f32 %v3756_v58 }
 0x3ec   :  { %v3711_v57 = vpop.f32.mrf.mxu3  ;;  %v3646_v61 = vpop.f32.mrf.mxu2 }
 0x3ef   :  { %v3722_v63 = vpop.f32.mrf.mxu0  ;;  %v6140_v1 = vpop.eup %6139 }
 0x3f0   :  { %v3770_v2 = vmul.f32 0.5, %v6140_v1  ;;  %v3723_v20 = vadd.f32 %v3722_v63, %v3710_v49 }
 0x3f2   :  { %v3777_v3 = vadd.f32 0.5, %v3770_v2 }
 0x3f4   :  { %3784 = vst [vmem:[#allocation2 + $0x20] sm:$0xff] %v3777_v3 }
 0x3f7   :  { %v3724_v5 = vpop.f32.mrf.mxu0 }
 0x400   :  { %v3735_v8 = vpop.f32.mrf.mxu1 }
 0x401   :  { %v3736_v21 = vadd.f32 %v3735_v8, %v3723_v20 }
 0x404   :  { %v3696_v60 = vpop.f32.mrf.mxu2 }
 0x405   :  { %v3697_v16 = vadd.f32 %v3696_v60, %v3684_v12 }
 0x407   :  { %v3757_v4 = vmul.f32 0.5, %v3697_v16 }
 0x408   :  { %v3737_v13 = vpop.f32.mrf.mxu1 }
 0x409   :  { %6141 = vtanh.f32 %v3757_v4 }
 0x40c   :  { %v3698_v14 = vpop.f32.mrf.mxu2 }
 0x40f   :  { %v6142_v15 = vpop.eup %6141 }
 0x410   :  { %v3771_v22 = vmul.f32 0.5, %v6142_v15 }
 0x412   :  { %v3778_v18 = vadd.f32 0.5, %v3771_v22 }
 0x414   :  { %3785 = vst [vmem:[#allocation2 + $0x28] sm:$0xff] %v3778_v18 }
 0x424   :  { %v3748_v24 = vpop.f32.mrf.mxu2 }
 0x425   :  { %v3749_v25 = vadd.f32 %v3748_v24, %v3736_v21 }
 0x427   :  { %v3758_v26 = vmul.f32 0.5, %v3749_v25 }
 0x429   :  { %6143 = vtanh.f32 %v3758_v26 }
 0x42c   :  { %v3750_v33 = vpop.f32.mrf.mxu2 }
 0x42f   :  { %v6144_v27 = vpop.eup %6143 }
 0x430   :  { %v3772_v29 = vmul.f32 0.5, %v6144_v27 }
 0x432   :  { %v3779_v30 = vadd.f32 0.5, %v3772_v29 }
 0x434   :  { %3786 = vst.msk [vmem:[#allocation2 + $0x30] sm:$0xff] %vm59_vm0, %v3779_v30 }
 0x435   :  { %3797 = dma.vmem_to_hbm [thread:$0]  %s3793_s23, 896, %s3795_s25, [#allocation3]  }
 0x436   :  { %6169 = dma.done.wait [#allocation3], 896  }
 0x437   :  { %6170 = vsyncadd [#allocation3], 4294966400 }
 0x438   :  { %3802 = vsyncpa [#allocation3], 1 }

</bundles_post_ra>
